<compile_context>
chip_gen: v5e
topology: v5e:2x2
jax: 0.10.0
libtpu: 0.0.40
codegen_flags: <defaults>
</compile_context>

<pallas_src>
import jax
import jax.numpy as jnp
from jax.experimental import pallas as pl
from jax.experimental.pallas import tpu as pltpu


def _pool2x2_kernel(x_ref, o_ref):
    """x_ref: (mb, 2*W) -- [image row 2*ho | image row 2*ho+1] per output row.
    o_ref: (mb, Wo)."""
    W = x_ref.shape[1] // 2
    Wo = o_ref.shape[1]

    v = x_ref[...]
    # Vertical (row-pair) max: the two source rows are the two contiguous lane halves.
    r = jnp.maximum(v[:, :W], v[:, W:]).astype(jnp.float32)          # (mb, W)

    # Horizontal (column-pair) max: compact W -> Wo lanes with exact 0/1 selection
    # matmuls (MXU work is free filler in this HBM-bound kernel), then elementwise max.
    w_idx = jax.lax.broadcasted_iota(jnp.int32, (W, Wo), 0)
    wo_idx = jax.lax.broadcasted_iota(jnp.int32, (W, Wo), 1)
    sel_even = (w_idx == 2 * wo_idx).astype(jnp.float32)
    sel_odd = (w_idx == 2 * wo_idx + 1).astype(jnp.float32)
    dn = (((1,), (0,)), ((), ()))
    even = jax.lax.dot_general(r, sel_even, dn,
                               precision=jax.lax.Precision.HIGHEST,
                               preferred_element_type=jnp.float32)
    odd = jax.lax.dot_general(r, sel_odd, dn,
                              precision=jax.lax.Precision.HIGHEST,
                              preferred_element_type=jnp.float32)
    o_ref[...] = jnp.maximum(even, odd).astype(o_ref.dtype)


def _round_up(x, m):
    return ((x + m - 1) // m) * m


def _pick_block_rows(n_rows, W, Wo, itemsize, target_bytes=2 * 1024 * 1024):
    """Rows per block so the lane-padded (x128) in+out VMEM footprint is ~target_bytes.

    With double buffering this keeps resident buffers ~2x target (= ~4 MiB), safe on
    v5e's 16 MiB scoped-VMEM default and v7x's 32 MiB scoped / 64 MiB physical VMEM.
    """
    in_row = _round_up(2 * W, 128) * itemsize
    out_row = _round_up(Wo, 128) * itemsize
    mb = target_bytes // (in_row + out_row)
    mb = min(mb, _round_up(n_rows, 8))
    return max(8, (mb // 8) * 8)


def time_distributed_maxpool2d(x, *, kernel_size=2, stride=2):
    """TimeDistributedPool2d(nn.MaxPool2d(2, 2)) forward.

    x: (B, T, C, H, W) float -> (B, T, C, H//2, W//2)
    """
    # TODO(synk): only the kernel_size == stride == 2 configuration of the reference
    # module (the one it is used with) is implemented.
    assert kernel_size == 2 and stride == 2

    B, T, C, H, W = x.shape
    Ho, Wo = H // 2, W // 2
    if (H % 2) or (W % 2):                 # nn.MaxPool2d floors odd spatial dims
        x = x[:, :, :, :2 * Ho, :2 * Wo]
        H, W = 2 * Ho, 2 * Wo

    Mo = B * T * C * Ho                    # one kernel row per output image row
    x2 = x.reshape(Mo, 2 * W)              # contiguous reshape only -- no transpose pre-pass

    mb = _pick_block_rows(Mo, W, Wo, x.dtype.itemsize)
    grid = (pl.cdiv(Mo, mb),)              # ragged last block is fine: rows are independent

    out = pl.pallas_call(
        _pool2x2_kernel,
        out_shape=jax.ShapeDtypeStruct((Mo, Wo), x.dtype),
        grid_spec=pltpu.PrefetchScalarGridSpec(
            num_scalar_prefetch=0,
            grid=grid,
            in_specs=[pl.BlockSpec((mb, 2 * W), lambda i: (i, 0))],
            out_specs=pl.BlockSpec((mb, Wo), lambda i: (i, 0)),
        ),
        compiler_params=pltpu.CompilerParams(
            dimension_semantics=("parallel",)),
    )(x2)

    return out.reshape(B, T, C, Ho, Wo)


if __name__ == "__main__":
    key = jax.random.PRNGKey(0)
    # (batch, time_steps, in_channels, height, width)
    B, T, C, H, W = 2, 8, 4, 16, 16
    x = jax.random.normal(key, (B, T, C, H, W), dtype=jnp.float32)

    fwd = jax.jit(time_distributed_maxpool2d)
    out = jax.block_until_ready(fwd(x))

    # Pure-JAX reference (MaxPool2d(2, 2) applied per (b, t) frame).
    ref = jnp.max(x.reshape(B, T, C, H // 2, 2, W // 2, 2), axis=(4, 6))

    assert out.shape == (B, T, C, H // 2, W // 2), out.shape
    assert out.dtype == x.dtype
    assert jnp.allclose(out, ref), "mismatch vs reference"
    print("KERNEL_OK")
</pallas_src>

<mosaic_0001>
module attributes {stable_mosaic.version = 11 : i64} {
  func.func @_pool2x2_kernel(%arg0: i32, %arg1: memref<512x32xf32, #tpu.memory_space<vmem>>, %arg2: memref<512x8xf32, #tpu.memory_space<vmem>>) attributes {dimension_semantics = [#tpu.dimension_semantics<parallel>], iteration_bounds = array<i64: 1>, scalar_prefetch = 0 : i64, scratch_operands = 0 : i64, tpu.core_type = #tpu.core_type<tc>, window_params = [{transform_indices = @transform_0, window_bounds = array<i64: 512, 32>}, {transform_indices = @transform_1, window_bounds = array<i64: 512, 8>}]} {
    %c0 = arith.constant 0 : index
    %c0_0 = arith.constant 0 : index
    %0 = vector.load %arg1[%c0, %c0_0] : memref<512x32xf32, #tpu.memory_space<vmem>>, vector<512x32xf32>
    %1 = vector.extract_strided_slice %0 {offsets = [0, 0], sizes = [512, 16], strides = [1, 1]} : vector<512x32xf32> to vector<512x16xf32>
    %2 = vector.extract_strided_slice %0 {offsets = [0, 16], sizes = [512, 16], strides = [1, 1]} : vector<512x32xf32> to vector<512x16xf32>
    %3 = arith.maximumf %1, %2 : vector<512x16xf32>
    %4 = tpu.iota {dimensions = array<i32: 0>} : vector<16x8xi32>
    %5 = tpu.iota {dimensions = array<i32: 1>} : vector<16x8xi32>
    %c2_i32 = arith.constant 2 : i32
    %6 = vector.broadcast %c2_i32 : i32 to vector<16x8xi32>
    %7 = arith.muli %6, %5 : vector<16x8xi32>
    %8 = arith.cmpi eq, %4, %7 : vector<16x8xi32>
    %9 = arith.extui %8 : vector<16x8xi1> to vector<16x8xi32>
    %10 = arith.sitofp %9 : vector<16x8xi32> to vector<16x8xf32>
    %c2_i32_1 = arith.constant 2 : i32
    %11 = vector.broadcast %c2_i32_1 : i32 to vector<16x8xi32>
    %12 = arith.muli %11, %5 : vector<16x8xi32>
    %c1_i32 = arith.constant 1 : i32
    %13 = vector.broadcast %c1_i32 : i32 to vector<16x8xi32>
    %14 = arith.addi %12, %13 : vector<16x8xi32>
    %15 = arith.cmpi eq, %4, %14 : vector<16x8xi32>
    %16 = arith.extui %15 : vector<16x8xi1> to vector<16x8xi32>
    %17 = arith.sitofp %16 : vector<16x8xi32> to vector<16x8xf32>
    %cst = arith.constant dense<0.000000e+00> : vector<512x8xf32>
    %18 = tpu.matmul %3, %10, %cst {dimension_numbers = #tpu.dot_dimension_numbers<[1], [0], [0], [1], [0, 0, 1, 1], [], []>, precision = #tpu.contract_precision<fp32>} : vector<512x16xf32>, vector<16x8xf32>, vector<512x8xf32> -> vector<512x8xf32>
    %cst_2 = arith.constant dense<0.000000e+00> : vector<512x8xf32>
    %19 = tpu.matmul %3, %17, %cst_2 {dimension_numbers = #tpu.dot_dimension_numbers<[1], [0], [0], [1], [0, 0, 1, 1], [], []>, precision = #tpu.contract_precision<fp32>} : vector<512x16xf32>, vector<16x8xf32>, vector<512x8xf32> -> vector<512x8xf32>
    %20 = arith.maximumf %18, %19 : vector<512x8xf32>
    %c0_3 = arith.constant 0 : index
    %c0_4 = arith.constant 0 : index
    %21 = vector.load %arg2[%c0_3, %c0_4] : memref<512x8xf32, #tpu.memory_space<vmem>>, vector<512x8xf32>
    tpu.vector_store %arg2[%c0_3, %c0_4], %20 {strides = array<i32>} : memref<512x8xf32, #tpu.memory_space<vmem>>, vector<512x8xf32>,
    return
  }
  func.func @transform_0(%arg0: i32) -> (i32, i32) {
    %c0_i32 = arith.constant 0 : i32
    %c0_i32_0 = arith.constant 0 : i32
    return %arg0, %c0_i32 : i32, i32
  }
  func.func @transform_1(%arg0: i32) -> (i32, i32) {
    %c0_i32 = arith.constant 0 : i32
    %c0_i32_0 = arith.constant 0 : i32
    return %arg0, %c0_i32 : i32, i32
  }
}

</mosaic_0001>

<bundles_post_ra>
// kernel: time_distributed_maxpool2d.1
= control target key start
LH: loop header
LB: loop body
LE: loop exit
PB: predicated region body
PF: predicated region fallthrough
CT: control target
= control target key end

     0   :  { %s5024_s10 = smov 112   ;;  %s7873_s0 = inlined_call_operand.vmem [shape: f32[512,32], index: 0, kind: input, shape index: {}]   ;;  %s7874_s1 = inlined_call_operand.hbm [shape: f32[512,8], index: 1, kind: output, shape index: {}]  }
   0x1   :  { %v5043_v0 = vld [vmem:[%s7873_s0] sm:$0xff]  ;;  %v5048_v1 = vld [vmem:[%s7873_s0 + $0x10] sm:$0xff] }
   0x2   :  { %137 = vrot.lane.b32.xlu0 %v5043_v0, %s5024_s10  ;;  %141 = vrot.lane.b32.xlu1 %v5048_v1, %s5024_s10  ;;  %v5057_v2 = vld [vmem:[%s7873_s0 + $0x20] sm:$0xff] }
   0x3   :  { %145 = vrot.lane.b32.xlu2 %v5057_v2, %s5024_s10 }
   0x4   :  { %6 = vsyncpa [#allocation3], 0  ;;  %v5064_v3 = vld [vmem:[%s7873_s0 + $0x8] sm:$0xff]  ;;  %v5069_v4 = vld [vmem:[%s7873_s0 + $0x18] sm:$0xff]  ;;  %v393_v14 = vlaneseq  ;;  %v7876_v19 = vmov 0.0   ;;  %v7877_v31 = vmov 1.0  }
   0x5   :  { %v5074_v5 = vld [vmem:[%s7873_s0 + $0x28] sm:$0xff]  ;;  %v5085_v6 = vld [vmem:[%s7873_s0 + $0x30] sm:$0xff]  ;;  %v5090_v7 = vld [vmem:[%s7873_s0 + $0x38] sm:$0xff]  ;;  %vm412_vm3 = vcmask 130048   ;;  %vm4893_vm5 = vcmask 64512   ;;  %s4964_s25 = sshll.u32 %s7874_s1, 4  ;;  %s4965_s25 = int_to_ptr.hbm [resolvable:$true] %s4964_s25 }
   0x6   :  { %v5095_v8 = vld [vmem:[%s7873_s0 + $0x40] sm:$0xff]  ;;  %v5106_v9 = vld [vmem:[%s7873_s0 + $0x48] sm:$0xff]  ;;  %v5111_v10 = vld [vmem:[%s7873_s0 + $0x50] sm:$0xff]  ;;  %v5138_v15 = vshrl.u32 %v393_v14, 7  ;;  %v397_v16 = vand.u32 127, %v393_v14  ;;  %s5028_s26 = smov 128  }
   0x7   :  { %v5116_v11 = vld [vmem:[%s7873_s0 + $0x58] sm:$0xff]  ;;  %v5127_v12 = vld [vmem:[%s7873_s0 + $0x60] sm:$0xff]  ;;  %v5132_v13 = vld [vmem:[%s7873_s0 + $0x68] sm:$0xff]  ;;  %s5029_s27 = smov 8  }
   0x8   :  { %v5141_v17 = vadd.s32 8, %v5138_v15  ;;  %v398_v18 = vmul.u32 2, %v397_v16  ;;  %v5154_v27 = vld [vmem:[%s7873_s0 + $0x78] sm:$0xff]  ;;  %v5173_v32 = vld [vmem:[%s7873_s0 + $0x80] sm:$0xff]  ;;  %v5190_v34 = vld [vmem:[%s7873_s0 + $0x70] sm:$0xff] }
   0x9   :  { %v5211_v40 = vld [vmem:[%s7873_s0 + $0x90] sm:$0xff]  ;;  %v5218_v43 = vld [vmem:[%s7873_s0 + $0x98] sm:$0xff]  ;;  %v5242_v51 = vld [vmem:[%s7873_s0 + $0x88] sm:$0xff] }
   0xa   :  { %139 = vrot.lane.b32.xlu0 %v5064_v3, %s5024_s10  ;;  %143 = vrot.lane.b32.xlu1 %v5069_v4, %s5024_s10  ;;  %vm400_vm0 = vcmp.eq.s32.totalorder %v5141_v17, %v398_v18  ;;  %vm399_vm1 = vcmp.eq.s32.totalorder %v5138_v15, %v398_v18  ;;  %v5183_v33 = vadd.s32 1, %v398_v18 }
   0xb   :  { %147 = vrot.lane.b32.xlu2 %v5074_v5, %s5024_s10  ;;  %v4977_v20 = vsel %vm400_vm0, 1.0, %v7876_v19  ;;  %v4976_v22 = vsel %vm399_vm1, 1.0, %v7876_v19  ;;  %4982 = vmatpush.msk.msra.mxu3 %vm400_vm0, %v7877_v31 }
   0xc   :  { %v1151_v21 = vsub.f32 %v4977_v20, %v4977_v20  ;;  %v1157_v24 = vsub.f32 %v4976_v22, %v4976_v22  ;;  %4980 = vmatpush.msk.msra.mxu0 %vm400_vm0, %v7877_v31  ;;  %vm407_vm2 = vcmp.eq.s32.totalorder %v5141_v17, %v5183_v33  ;;  %vm406_vm4 = vcmp.eq.s32.totalorder %v5138_v15, %v5183_v33  ;;  %v6081_v15 = vld [vmem:[%s7873_s0 + $0x198] sm:$0xff] }
   0xd   :  { %4983 = vmatpush.msk.msra.mxu3 %vm399_vm1, %v7877_v31  ;;  %v4979_v35 = vsel %vm407_vm2, 1.0, %v7876_v19 }
   0xe   :  { %v1152_v23 = vand.u32 4294901760, %v1151_v21  ;;  %1435 = vmatpush.msra.mxu2 %v1151_v21  ;;  %v1158_v26 = vand.u32 4294901760, %v1157_v24  ;;  %4981 = vmatpush.msk.msra.mxu0 %vm399_vm1, %v7877_v31  ;;  %v5202_v36 = vsub.f32 %v4979_v35, %v4979_v35 }
  0x10   :  { %v1153_v25 = vsub.f32 %v1151_v21, %v1152_v23  ;;  %1438 = vmatpush.msra.mxu2 %v1157_v24  ;;  %v1159_v29 = vsub.f32 %v1157_v24, %v1158_v26  ;;  %2180 = vmatpush.msrb.mxu0 %v1152_v23  ;;  %v7875_v37 = vand.u32 4294901760, %v5202_v36  ;;  %v5302_v23 = vld [vmem:[%s7873_s0 + $0xb0] sm:$0xff] }
  0x12   :  { %149 = vrot.lane.b32.xlu0 %v5085_v6, %s5024_s10  ;;  %151 = vrot.lane.b32.xlu1 %v5090_v7, %s5024_s10  ;;  %v1154_v28 = vand.u32 4294901760, %v1153_v25  ;;  %v1160_v30 = vand.u32 4294901760, %v1159_v29  ;;  %v3265_v38 = vsub.f32 %v5202_v36, %v7875_v37 }
  0x13   :  { %153 = vrot.lane.b32.xlu2 %v5095_v8, %s5024_s10  ;;  %2184 = vmatpush.msrb.mxu0 %v1158_v26 }
  0x14   :  { %1155 = vmatpush.msra.mxu1 %v1154_v28  ;;  %4986 = vmatpush.msk.msrb.mxu2 %vm407_vm2, %v7877_v31  ;;  %v3266_v39 = vand.u32 4294901760, %v3265_v38  ;;  %v5327_v38 = vld [vmem:[%s7873_s0 + $0xa0] sm:$0xff] }
  0x16   :  { %1161 = vmatpush.msra.mxu1 %v1160_v30  ;;  %3267 = vmatpush.msrb.mxu3 %v3266_v39 }
  0x18   :  { %4984 = vmatpush.msk.msrb.mxu1 %vm400_vm0, %v7877_v31 }
  0x1a   :  { %155 = vrot.lane.b32.xlu0 %v5106_v9, %s5024_s10  ;;  %157 = vrot.lane.b32.xlu1 %v5111_v10, %s5024_s10 }
  0x1b   :  { %159 = vrot.lane.b32.xlu2 %v5116_v11, %s5024_s10  ;;  %4985 = vmatpush.msk.msrb.mxu1 %vm399_vm1, %v7877_v31 }
  0x22   :  { %161 = vrot.lane.b32.xlu0 %v5127_v12, %s5024_s10  ;;  %163 = vrot.lane.b32.xlu1 %v5132_v13, %s5024_s10 }
  0x23   :  { %165 = vrot.lane.b32.xlu2 %v5190_v34, %s5024_s10 }
  0x2a   :  { %167 = vrot.lane.b32.xlu0 %v5154_v27, %s5024_s10  ;;  %169 = vrot.lane.b32.xlu1 %v5173_v32, %s5024_s10 }
  0x2b   :  { %171 = vrot.lane.b32.xlu2 %v5242_v51, %s5024_s10 }
  0x32   :  { %173 = vrot.lane.b32.xlu0 %v5211_v40, %s5024_s10  ;;  %175 = vrot.lane.b32.xlu1 %v5218_v43, %s5024_s10 }
  0x33   :  { %177 = vrot.lane.b32.xlu2 %v5327_v38, %s5024_s10 }
  0x3a   :  { %181 = vrot.lane.b32.xlu1 %v5302_v23, %s5024_s10 }
  0x74   :  { %v138_v41 = vpop.permute.xlu0 %137  ;;  %v142_v42 = vpop.permute.xlu1 %141 }
  0x75   :  { %v329_v44 = vmax.f32 %v5043_v0, %v138_v41  ;;  %v331_v47 = vmax.f32 %v5048_v1, %v142_v42  ;;  %v146_v0 = vpop.permute.xlu2 %145  ;;  %v5275_v1 = vld [vmem:[%s7873_s0 + $0xa8] sm:$0xff] }
  0x76   :  { %179 = vrot.lane.b32.xlu0 %v5275_v1, %s5024_s10  ;;  %v333_v20 = vmax.f32 %v5057_v2, %v146_v0 }
  0x77   :  { %v414_v45 = vsel %vm412_vm3, %v329_v44, 0  ;;  %v420_v53 = vsel %vm412_vm3, %v331_v47, 0 }
  0x78   :  { %v5224_v46 = vand.u32 4294901760, %v414_v45  ;;  %v5254_v58 = vand.u32 4294901760, %v420_v53  ;;  %v426_v24 = vsel %vm412_vm3, %v333_v20, 0 }
  0x79   :  { %v5308_v25 = vand.u32 4294901760, %v426_v24 }
  0x7a   :  { %v5228_v48 = vsub.f32 %v414_v45, %v5224_v46  ;;  %1163 = vmatmul.f32.vlgmr.msra.gmra.mxu1 %v5224_v46  ;;  %v5266_v62 = vsub.f32 %v420_v53, %v5254_v58 }
  0x7b   :  { %4988 = vmatpush.msk.msra.mxu1 %vm407_vm2, %v7877_v31  ;;  %v5319_v30 = vsub.f32 %v426_v24, %v5308_v25 }
  0x7c   :  { %8173 = vst [vmem:[#allocation5_spill] sm:$0xff] %v5228_v48  ;;  %1441 = vmatmul.f32.vlgmr.msra.gmra.mxu2 %v5228_v48  ;;  %v140_v49 = vpop.permute.xlu0 %139  ;;  %v5237_v50 = vand.u32 4294901760, %v5228_v48  ;;  %v144_v55 = vpop.permute.xlu1 %143  ;;  %v5288_v18 = vand.u32 4294901760, %v5266_v62 }
  0x7d   :  { %v330_v52 = vmax.f32 %v5064_v3, %v140_v49  ;;  %v332_v60 = vmax.f32 %v5069_v4, %v144_v55  ;;  %8176 = vst [vmem:[#allocation8_spill] sm:$0xff] %v5266_v62  ;;  %v148_v2 = vpop.permute.xlu2 %147  ;;  %v5338_v44 = vand.u32 4294901760, %v5319_v30 }
  0x7e   :  { %8174 = vst [vmem:[#allocation6_spill] sm:$0xff] %v5237_v50  ;;  %1781 = vmatmul.f32.vlgmr.msra.gmra.mxu3 %v5237_v50  ;;  %v626_v54 = vsub.f32 %v5228_v48, %v5237_v50  ;;  %v642_v22 = vsub.f32 %v5266_v62, %v5288_v18  ;;  %v334_v29 = vmax.f32 %v5074_v5, %v148_v2 }
  0x7f   :  { %v417_v56 = vsel %vm412_vm3, %v330_v52, 0  ;;  %v423_v3 = vsel %vm412_vm3, %v332_v60, 0  ;;  %8178 = vst [vmem:[#allocation10_spill] sm:$0xff] %v5288_v18  ;;  %v658_v49 = vsub.f32 %v5319_v30, %v5338_v44  ;;  %v5352_v52 = vld [vmem:[%s7873_s0 + $0xc0] sm:$0xff] }
  0x80   :  { %v5252_v57 = vand.u32 4294901760, %v417_v56  ;;  %v5256_v59 = vand.u32 4294901760, %v626_v54  ;;  %v5283_v14 = vand.u32 4294901760, %v423_v3  ;;  %v5310_v26 = vand.u32 4294901760, %v642_v22  ;;  %8181 = vst [vmem:[#allocation13_spill] sm:$0xff] %v5319_v30  ;;  %185 = vrot.lane.b32.xlu0 %v5352_v52, %s5024_s10 }
  0x81   :  { %v429_v39 = vsel %vm412_vm3, %v334_v29, 0  ;;  %8182 = vst [vmem:[#allocation14_spill] sm:$0xff] %v5338_v44  ;;  %v5360_v55 = vand.u32 4294901760, %v658_v49 }
  0x82   :  { %v5260_v61 = vsub.f32 %v417_v56, %v5252_v57  ;;  %628 = vmatmul.f32.vlgmr.msra.gmra.mxu0 %v5256_v59  ;;  %1167 = vmatmul.f32.gmra.mxu1 %v5252_v57  ;;  %v5294_v21 = vsub.f32 %v423_v3, %v5283_v14  ;;  %v5333_v41 = vand.u32 4294901760, %v429_v39 }
  0x83   :  { %3547 = vmatpush.msra.mxu0 %v5202_v36 }
  0x84   :  { %8175 = vst [vmem:[#allocation7_spill] sm:$0xff] %v5260_v61  ;;  %1446 = vmatmul.f32.gmra.mxu2 %v5260_v61  ;;  %v5270_v63 = vand.u32 4294901760, %v5260_v61  ;;  %v5313_v28 = vand.u32 4294901760, %v5294_v21  ;;  %v150_v5 = vpop.permute.xlu0 %149  ;;  %v5344_v47 = vsub.f32 %v429_v39, %v5333_v41 }
  0x85   :  { %8179 = vst [vmem:[#allocation11_spill] sm:$0xff] %v5294_v21  ;;  %v335_v45 = vmax.f32 %v5085_v6, %v150_v5  ;;  %v152_v6 = vpop.permute.xlu1 %151  ;;  %v5402_v5 = vld [vmem:[%s7873_s0 + $0xb8] sm:$0xff] }
  0x86   :  { %8177 = vst [vmem:[#allocation9_spill] sm:$0xff] %v5270_v63  ;;  %1787 = vmatmul.f32.gmra.mxu3 %v5270_v63  ;;  %v634_v4 = vsub.f32 %v5260_v61, %v5270_v63  ;;  %v650_v35 = vsub.f32 %v5294_v21, %v5313_v28  ;;  %v5363_v56 = vand.u32 4294901760, %v5344_v47  ;;  %v336_v60 = vmax.f32 %v5090_v7, %v152_v6  ;;  %v154_v7 = vpop.permute.xlu2 %153 }
  0x87   :  { %8180 = vst [vmem:[#allocation12_spill] sm:$0xff] %v5313_v28  ;;  %v432_v53 = vsel %vm412_vm3, %v335_v45, 0  ;;  %v337_v29 = vmax.f32 %v5095_v8, %v154_v7  ;;  %183 = vrot.lane.b32.xlu2 %v5402_v5, %s5024_s10  ;;  %v5427_v7 = vld [vmem:[%s7873_s0 + $0xd8] sm:$0xff] }
  0x88   :  { %v5285_v16 = vand.u32 4294901760, %v634_v4  ;;  %v5335_v42 = vand.u32 4294901760, %v650_v35  ;;  %8183 = vst [vmem:[#allocation15_spill] sm:$0xff] %v5344_v47  ;;  %v5358_v54 = vand.u32 4294901760, %v432_v53  ;;  %v666_v3 = vsub.f32 %v5344_v47, %v5363_v56  ;;  %v5377_v4 = vld [vmem:[%s7873_s0 + $0xc8] sm:$0xff]  ;;  %191 = vrot.lane.b32.xlu0 %v5427_v7, %s5024_s10 }
  0x89   :  { %8184 = vst [vmem:[#allocation16_spill] sm:$0xff] %v5363_v56  ;;  %v435_v20 = vsel %vm412_vm3, %v336_v60, 0  ;;  %187 = vrot.lane.b32.xlu1 %v5377_v4, %s5024_s10  ;;  %v438_v45 = vsel %vm412_vm3, %v337_v29, 0 }
  0x8a   :  { %636 = vmatmul.f32.gmra.mxu0 %v5285_v16  ;;  %1171 = vmatmul.f32.gmra.mxu1 %v5254_v58  ;;  %v5369_v0 = vsub.f32 %v432_v53, %v5358_v54  ;;  %v5383_v22 = vand.u32 4294901760, %v435_v20  ;;  %v5385_v24 = vand.u32 4294901760, %v666_v3  ;;  %v5408_v49 = vand.u32 4294901760, %v438_v45 }
  0x8c   :  { %1451 = vmatmul.f32.gmra.mxu2 %v5266_v62  ;;  %8185 = vst [vmem:[#allocation17_spill] sm:$0xff] %v5369_v0  ;;  %v5388_v2 = vand.u32 4294901760, %v5369_v0  ;;  %v5394_v35 = vsub.f32 %v435_v20, %v5383_v22  ;;  %v156_v8 = vpop.permute.xlu0 %155  ;;  %v5419_v3 = vsub.f32 %v438_v45, %v5408_v49 }
  0x8d   :  { %v338_v60 = vmax.f32 %v5106_v9, %v156_v8  ;;  %v158_v9 = vpop.permute.xlu1 %157 }
  0x8e   :  { %1793 = vmatmul.f32.gmra.mxu3 %v5288_v18  ;;  %8186 = vst [vmem:[#allocation18_spill] sm:$0xff] %v5388_v2  ;;  %v674_v39 = vsub.f32 %v5369_v0, %v5388_v2  ;;  %v5413_v6 = vand.u32 4294901760, %v5394_v35  ;;  %v5438_v8 = vand.u32 4294901760, %v5419_v3  ;;  %v339_v37 = vmax.f32 %v5111_v10, %v158_v9  ;;  %v160_v10 = vpop.permute.xlu2 %159 }
  0x8f   :  { %8187 = vst [vmem:[#allocation19_spill] sm:$0xff] %v5394_v35  ;;  %v441_v29 = vsel %vm412_vm3, %v338_v60, 0 }
  0x90   :  { %v5410_v53 = vand.u32 4294901760, %v674_v39  ;;  %8188 = vst [vmem:[#allocation20_spill] sm:$0xff] %v5413_v6  ;;  %v682_v20 = vsub.f32 %v5394_v35, %v5413_v6  ;;  %v5433_v39 = vand.u32 4294901760, %v441_v29  ;;  %v690_v19 = vsub.f32 %v5419_v3, %v5438_v8 }
  0x91   :  { %8189 = vst [vmem:[#allocation21_spill] sm:$0xff] %v5419_v3  ;;  %v444_v31 = vsel %vm412_vm3, %v339_v37, 0 }
  0x92   :  { %644 = vmatmul.f32.gmra.mxu0 %v5310_v26  ;;  %1175 = vmatmul.f32.gmra.mxu1 %v5283_v14  ;;  %v5435_v45 = vand.u32 4294901760, %v682_v20  ;;  %8190 = vst [vmem:[#allocation22_spill] sm:$0xff] %v5438_v8  ;;  %v5444_v60 = vsub.f32 %v441_v29, %v5433_v39  ;;  %v5452_v20 = vld [vmem:[%s7873_s0 + $0xe0] sm:$0xff]  ;;  %v5458_v29 = vand.u32 4294901760, %v444_v31  ;;  %v5460_v9 = vand.u32 4294901760, %v690_v19  ;;  %v5477_v19 = vld [vmem:[%s7873_s0 + $0xd0] sm:$0xff] }
  0x93   :  { %193 = vrot.lane.b32.xlu1 %v5452_v20, %s5024_s10  ;;  %189 = vrot.lane.b32.xlu2 %v5477_v19, %s5024_s10 }
  0x94   :  { %1456 = vmatmul.f32.gmra.mxu2 %v5294_v21  ;;  %8191 = vst [vmem:[#allocation23_spill] sm:$0xff] %v5444_v60  ;;  %v5469_v37 = vsub.f32 %v444_v31, %v5458_v29 }
  0x95   :  { %8192 = vst [vmem:[#allocation24_spill] sm:$0xff] %v5458_v29 }
  0x96   :  { %1799 = vmatmul.f32.gmra.mxu3 %v5313_v28  ;;  %8194 = vst [vmem:[#allocation26_spill] sm:$0xff] %v5469_v37 }
  0x9a   :  { %652 = vmatmul.f32.gmra.mxu0 %v5335_v42  ;;  %1179 = vmatmul.f32.gmra.mxu1 %v5308_v25 }
  0x9c   :  { %1461 = vmatmul.f32.gmra.mxu2 %v5319_v30 }
  0x9e   :  { %1805 = vmatmul.f32.gmra.mxu3 %v5338_v44 }
  0xa2   :  { %660 = vmatmul.f32.gmra.mxu0 %v5360_v55  ;;  %1183 = vmatmul.f32.gmra.mxu1 %v5333_v41 }
  0xa4   :  { %1466 = vmatmul.f32.gmra.mxu2 %v5344_v47 }
  0xa6   :  { %1811 = vmatmul.f32.gmra.mxu3 %v5363_v56 }
  0xaa   :  { %668 = vmatmul.f32.gmra.mxu0 %v5385_v24  ;;  %1187 = vmatmul.f32.gmra.mxu1 %v5358_v54 }
  0xac   :  { %1471 = vmatmul.f32.gmra.mxu2 %v5369_v0  ;;  %v5488_v0 = vand.u32 4294901760, %v5469_v37 }
  0xae   :  { %1817 = vmatmul.f32.gmra.mxu3 %v5388_v2  ;;  %8196 = vst [vmem:[#allocation28_spill] sm:$0xff] %v5488_v0 }
  0xb2   :  { %676 = vmatmul.f32.gmra.mxu0 %v5410_v53  ;;  %1191 = vmatmul.f32.gmra.mxu1 %v5383_v22 }
  0xb4   :  { %1476 = vmatmul.f32.gmra.mxu2 %v5394_v35  ;;  %v5463_v35 = vand.u32 4294901760, %v5444_v60 }
  0xb6   :  { %1823 = vmatmul.f32.gmra.mxu3 %v5413_v6  ;;  %8193 = vst [vmem:[#allocation25_spill] sm:$0xff] %v5463_v35 }
  0xba   :  { %684 = vmatmul.f32.gmra.mxu0 %v5435_v45  ;;  %1195 = vmatmul.f32.gmra.mxu1 %v5408_v49 }
  0xbc   :  { %1481 = vmatmul.f32.gmra.mxu2 %v5419_v3  ;;  %v340_v3 = vmax.f32 %v5116_v11, %v160_v10  ;;  %v162_v11 = vpop.permute.xlu0 %161 }
  0xbe   :  { %1829 = vmatmul.f32.gmra.mxu3 %v5438_v8  ;;  %v698_v8 = vsub.f32 %v5444_v60, %v5463_v35  ;;  %v447_v6 = vsel %vm412_vm3, %v340_v3, 0 }
  0xbf   :  { %v5483_v31 = vand.u32 4294901760, %v447_v6 }
  0xc0   :  { %v5485_v10 = vand.u32 4294901760, %v698_v8  ;;  %v5502_v8 = vld [vmem:[%s7873_s0 + $0xf0] sm:$0xff] }
  0xc1   :  { %8195 = vst [vmem:[#allocation27_spill] sm:$0xff] %v5483_v31  ;;  %v5494_v3 = vsub.f32 %v447_v6, %v5483_v31  ;;  %197 = vrot.lane.b32.xlu0 %v5502_v8, %s5024_s10 }
  0xc2   :  { %692 = vmatmul.f32.gmra.mxu0 %v5460_v9  ;;  %1199 = vmatmul.f32.gmra.mxu1 %v5433_v39 }
  0xc3   :  { %8197 = vst [vmem:[#allocation29_spill] sm:$0xff] %v5494_v3  ;;  %v5513_v47 = vand.u32 4294901760, %v5494_v3 }
  0xc4   :  { %1486 = vmatmul.f32.gmra.mxu2 %v5444_v60  ;;  %v341_v60 = vmax.f32 %v5127_v12, %v162_v11  ;;  %v164_v12 = vpop.permute.xlu1 %163 }
  0xc5   :  { %8199 = vst [vmem:[#allocation31_spill] sm:$0xff] %v5513_v47 }
  0xc6   :  { %1835 = vmatmul.f32.gmra.mxu3 %v5463_v35  ;;  %v706_v35 = vsub.f32 %v5469_v37, %v5488_v0  ;;  %v450_v2 = vsel %vm412_vm3, %v341_v60, 0 }
  0xc7   :  { %v5508_v6 = vand.u32 4294901760, %v450_v2 }
  0xc8   :  { %v5510_v11 = vand.u32 4294901760, %v706_v35  ;;  %v5527_v35 = vld [vmem:[%s7873_s0 + $0xf8] sm:$0xff] }
  0xc9   :  { %8198 = vst [vmem:[#allocation30_spill] sm:$0xff] %v5508_v6  ;;  %v5519_v60 = vsub.f32 %v450_v2, %v5508_v6  ;;  %199 = vrot.lane.b32.xlu1 %v5527_v35, %s5024_s10 }
  0xca   :  { %700 = vmatmul.f32.gmra.mxu0 %v5485_v10  ;;  %1203 = vmatmul.f32.gmra.mxu1 %v5458_v29 }
  0xcb   :  { %8200 = vst [vmem:[#allocation32_spill] sm:$0xff] %v5519_v60  ;;  %v5538_v30 = vand.u32 4294901760, %v5519_v60 }
  0xcc   :  { %1491 = vmatmul.f32.gmra.mxu2 %v5469_v37  ;;  %v342_v37 = vmax.f32 %v5132_v13, %v164_v12  ;;  %v166_v13 = vpop.permute.xlu2 %165 }
  0xcd   :  { %8203 = vst [vmem:[#allocation35_spill] sm:$0xff] %v5538_v30 }
  0xce   :  { %1841 = vmatmul.f32.gmra.mxu3 %v5488_v0  ;;  %v714_v0 = vsub.f32 %v5494_v3, %v5513_v47  ;;  %v453_v56 = vsel %vm412_vm3, %v342_v37, 0 }
  0xcf   :  { %v5533_v2 = vand.u32 4294901760, %v453_v56 }
  0xd0   :  { %v5535_v12 = vand.u32 4294901760, %v714_v0  ;;  %v5552_v0 = vld [vmem:[%s7873_s0 + $0xe8] sm:$0xff] }
  0xd1   :  { %8201 = vst [vmem:[#allocation33_spill] sm:$0xff] %v5533_v2  ;;  %v5544_v37 = vsub.f32 %v453_v56, %v5533_v2  ;;  %195 = vrot.lane.b32.xlu2 %v5552_v0, %s5024_s10 }
  0xd2   :  { %708 = vmatmul.f32.gmra.mxu0 %v5510_v11  ;;  %1207 = vmatmul.f32.gmra.mxu1 %v5483_v31  ;;  %8202 = vst [vmem:[#allocation34_spill] sm:$0xff] %v5535_v12 }
  0xd3   :  { %8204 = vst [vmem:[#allocation36_spill] sm:$0xff] %v5544_v37  ;;  %v5563_v21 = vand.u32 4294901760, %v5544_v37 }
  0xd4   :  { %1496 = vmatmul.f32.gmra.mxu2 %v5494_v3  ;;  %v343_v3 = vmax.f32 %v5190_v34, %v166_v13  ;;  %v168_v34 = vpop.permute.xlu0 %167 }
  0xd5   :  { %8207 = vst [vmem:[#allocation39_spill] sm:$0xff] %v5563_v21 }
  0xd6   :  { %1847 = vmatmul.f32.gmra.mxu3 %v5513_v47  ;;  %v722_v47 = vsub.f32 %v5519_v60, %v5538_v30  ;;  %v456_v44 = vsel %vm412_vm3, %v343_v3, 0 }
  0xd7   :  { %v5558_v56 = vand.u32 4294901760, %v456_v44 }
  0xd8   :  { %v5560_v13 = vand.u32 4294901760, %v722_v47  ;;  %v5577_v47 = vld [vmem:[%s7873_s0 + $0x108] sm:$0xff] }
  0xd9   :  { %8205 = vst [vmem:[#allocation37_spill] sm:$0xff] %v5558_v56  ;;  %v5569_v3 = vsub.f32 %v456_v44, %v5558_v56  ;;  %203 = vrot.lane.b32.xlu0 %v5577_v47, %s5024_s10 }
  0xda   :  { %716 = vmatmul.f32.gmra.mxu0 %v5535_v12  ;;  %1211 = vmatmul.f32.gmra.mxu1 %v5508_v6  ;;  %8206 = vst [vmem:[#allocation38_spill] sm:$0xff] %v5560_v13 }
  0xdb   :  { %8208 = vst [vmem:[#allocation40_spill] sm:$0xff] %v5569_v3  ;;  %v5588_v62 = vand.u32 4294901760, %v5569_v3 }
  0xdc   :  { %1501 = vmatmul.f32.gmra.mxu2 %v5519_v60  ;;  %v344_v60 = vmax.f32 %v5154_v27, %v168_v34  ;;  %v170_v27 = vpop.permute.xlu1 %169 }
  0xdd   :  { %8211 = vst [vmem:[#allocation43_spill] sm:$0xff] %v5588_v62 }
  0xde   :  { %1853 = vmatmul.f32.gmra.mxu3 %v5538_v30  ;;  %v730_v30 = vsub.f32 %v5544_v37, %v5563_v21  ;;  %v459_v28 = vsel %vm412_vm3, %v344_v60, 0 }
  0xdf   :  { %v5583_v44 = vand.u32 4294901760, %v459_v28 }
  0xe0   :  { %v5585_v34 = vand.u32 4294901760, %v730_v30  ;;  %v5602_v30 = vld [vmem:[%s7873_s0 + $0x110] sm:$0xff] }
  0xe1   :  { %8209 = vst [vmem:[#allocation41_spill] sm:$0xff] %v5583_v44  ;;  %v5594_v60 = vsub.f32 %v459_v28, %v5583_v44  ;;  %205 = vrot.lane.b32.xlu1 %v5602_v30, %s5024_s10 }
  0xe2   :  { %724 = vmatmul.f32.gmra.mxu0 %v5560_v13  ;;  %1215 = vmatmul.f32.gmra.mxu1 %v5533_v2  ;;  %8210 = vst [vmem:[#allocation42_spill] sm:$0xff] %v5585_v34 }
  0xe3   :  { %8212 = vst [vmem:[#allocation44_spill] sm:$0xff] %v5594_v60  ;;  %v5613_v61 = vand.u32 4294901760, %v5594_v60 }
  0xe4   :  { %1506 = vmatmul.f32.gmra.mxu2 %v5544_v37  ;;  %v345_v37 = vmax.f32 %v5173_v32, %v170_v27  ;;  %v172_v32 = vpop.permute.xlu2 %171 }
  0xe5   :  { %8215 = vst [vmem:[#allocation47_spill] sm:$0xff] %v5613_v61 }
  0xe6   :  { %1859 = vmatmul.f32.gmra.mxu3 %v5563_v21  ;;  %v738_v21 = vsub.f32 %v5569_v3, %v5588_v62  ;;  %v462_v18 = vsel %vm412_vm3, %v345_v37, 0 }
  0xe7   :  { %v5608_v28 = vand.u32 4294901760, %v462_v18 }
  0xe8   :  { %v5610_v27 = vand.u32 4294901760, %v738_v21  ;;  %v5627_v21 = vld [vmem:[%s7873_s0 + $0x100] sm:$0xff] }
  0xe9   :  { %8213 = vst [vmem:[#allocation45_spill] sm:$0xff] %v5608_v28  ;;  %v5619_v37 = vsub.f32 %v462_v18, %v5608_v28  ;;  %201 = vrot.lane.b32.xlu2 %v5627_v21, %s5024_s10 }
  0xea   :  { %732 = vmatmul.f32.gmra.mxu0 %v5585_v34  ;;  %1219 = vmatmul.f32.gmra.mxu1 %v5558_v56  ;;  %8214 = vst [vmem:[#allocation46_spill] sm:$0xff] %v5610_v27 }
  0xeb   :  { %8216 = vst [vmem:[#allocation48_spill] sm:$0xff] %v5619_v37 }
  0xec   :  { %1511 = vmatmul.f32.gmra.mxu2 %v5569_v3  ;;  %v346_v3 = vmax.f32 %v5242_v51, %v172_v32  ;;  %v174_v51 = vpop.permute.xlu0 %173 }
  0xed   :  { %v347_v50 = vmax.f32 %v5211_v40, %v174_v51  ;;  %v176_v40 = vpop.permute.xlu1 %175 }
  0xee   :  { %1865 = vmatmul.f32.gmra.mxu3 %v5588_v62  ;;  %v746_v62 = vsub.f32 %v5594_v60, %v5613_v61  ;;  %v465_v63 = vsel %vm412_vm3, %v346_v3, 0 }
  0xef   :  { %v5633_v32 = vand.u32 4294901760, %v465_v63 }
  0xf0   :  { %v5635_v48 = vand.u32 4294901760, %v746_v62  ;;  %v5652_v62 = vld [vmem:[%s7873_s0 + $0x120] sm:$0xff] }
  0xf1   :  { %8217 = vst [vmem:[#allocation49_spill] sm:$0xff] %v5633_v32  ;;  %v5644_v3 = vsub.f32 %v465_v63, %v5633_v32  ;;  %209 = vrot.lane.b32.xlu0 %v5652_v62, %s5024_s10 }
  0xf2   :  { %740 = vmatmul.f32.gmra.mxu0 %v5610_v27  ;;  %1223 = vmatmul.f32.gmra.mxu1 %v5583_v44  ;;  %8218 = vst [vmem:[#allocation50_spill] sm:$0xff] %v5635_v48  ;;  %v468_v44 = vsel %vm412_vm3, %v347_v50, 0  ;;  %v348_v50 = vmax.f32 %v5218_v43, %v176_v40 }
  0xf3   :  { %8220 = vst [vmem:[#allocation52_spill] sm:$0xff] %v5644_v3  ;;  %v5658_v27 = vand.u32 4294901760, %v468_v44  ;;  %v5663_v56 = vand.u32 4294901760, %v5644_v3 }
  0xf4   :  { %1516 = vmatmul.f32.gmra.mxu2 %v5594_v60  ;;  %v5638_v60 = vand.u32 4294901760, %v5619_v37  ;;  %v471_v43 = vsel %vm412_vm3, %v348_v50, 0 }
  0xf5   :  { %8221 = vst [vmem:[#allocation53_spill] sm:$0xff] %v5658_v27  ;;  %v5685_v40 = vand.u32 4294901760, %v471_v43 }
  0xf6   :  { %1871 = vmatmul.f32.gmra.mxu3 %v5613_v61  ;;  %8219 = vst [vmem:[#allocation51_spill] sm:$0xff] %v5638_v60  ;;  %v754_v61 = vsub.f32 %v5619_v37, %v5638_v60 }
  0xf7   :  { %v1164_v18 = vpop.f32.mrf.mxu1  ;;  %8223 = vst [vmem:[#allocation55_spill] sm:$0xff] %v5663_v56 }
  0xf8   :  { %8226 = vst [vmem:[#allocation58_spill] sm:$0xff] %v5685_v40 }
  0xfa   :  { %748 = vmatmul.f32.gmra.mxu0 %v5635_v48  ;;  %1227 = vmatmul.f32.gmra.mxu1 %v5608_v28 }
  0xfc   :  { %1521 = vmatmul.f32.gmra.mxu2 %v5619_v37  ;;  %v5660_v37 = vand.u32 4294901760, %v754_v61  ;;  %v762_v61 = vsub.f32 %v5644_v3, %v5663_v56 }
  0xfe   :  { %1877 = vmatmul.f32.gmra.mxu3 %v5638_v60  ;;  %8222 = vst [vmem:[#allocation54_spill] sm:$0xff] %v5660_v37  ;;  %v5669_v60 = vsub.f32 %v468_v44, %v5658_v27 }
  0xff   :  { %v629_v63 = vpop.f32.mrf.mxu0  ;;  %v1168_v51 = vpop.f32.mrf.mxu1 }
 0x100   :  { %v1165_v28 = vadd.f32 %v1164_v18, %v629_v63  ;;  %v1442_v48 = vpop.f32.mrf.mxu2  ;;  %8224 = vst [vmem:[#allocation56_spill] sm:$0xff] %v5669_v60  ;;  %v5679_v63 = vld [vmem:[%s7873_s0 + $0x128] sm:$0xff] }
 0x101   :  { %v1782_v34 = vpop.f32.mrf.mxu3  ;;  %211 = vrot.lane.b32.xlu1 %v5679_v63, %s5024_s10 }
 0x102   :  { %v1443_v2 = vadd.f32 %v1442_v48, %v1165_v28  ;;  %756 = vmatmul.f32.gmra.mxu0 %v5660_v37  ;;  %1231 = vmatmul.f32.gmra.mxu1 %v5633_v32  ;;  %v178_v48 = vpop.permute.xlu2 %177  ;;  %v5690_v32 = vand.u32 4294901760, %v5669_v60 }
 0x103   :  { %v349_v50 = vmax.f32 %v5327_v38, %v178_v48 }
 0x104   :  { %v5671_v18 = vadd.f32 %v1782_v34, %v1443_v2  ;;  %1526 = vmatmul.f32.gmra.mxu2 %v5644_v3  ;;  %v5687_v3 = vand.u32 4294901760, %v762_v61  ;;  %8228 = vst [vmem:[#allocation60_spill] sm:$0xff] %v5690_v32  ;;  %v770_v61 = vsub.f32 %v5669_v60, %v5690_v32 }
 0x105   :  { %v474_v38 = vsel %vm412_vm3, %v349_v50, 0 }
 0x106   :  { %8225 = vst [vmem:[#allocation57_spill] sm:$0xff] %v5671_v18  ;;  %1883 = vmatmul.f32.gmra.mxu3 %v5663_v56  ;;  %v5696_v56 = vsub.f32 %v471_v43, %v5685_v40  ;;  %v180_v43 = vpop.permute.xlu0 %179 }
 0x107   :  { %v637_v2 = vpop.f32.mrf.mxu0  ;;  %v1172_v44 = vpop.f32.mrf.mxu1  ;;  %8227 = vst [vmem:[#allocation59_spill] sm:$0xff] %v5687_v3  ;;  %v350_v50 = vmax.f32 %v5275_v1, %v180_v43 }
 0x108   :  { %v1169_v34 = vadd.f32 %v1168_v51, %v637_v2  ;;  %v1447_v28 = vpop.f32.mrf.mxu2  ;;  %8229 = vst [vmem:[#allocation61_spill] sm:$0xff] %v5696_v56  ;;  %v5706_v2 = vld [vmem:[%s7873_s0 + $0x118] sm:$0xff] }
 0x109   :  { %v1788_v18 = vpop.f32.mrf.mxu3  ;;  %207 = vrot.lane.b32.xlu2 %v5706_v2, %s5024_s10  ;;  %v477_v1 = vsel %vm412_vm3, %v350_v50, 0 }
 0x10a   :  { %v1448_v37 = vadd.f32 %v1447_v28, %v1169_v34  ;;  %764 = vmatmul.f32.gmra.mxu0 %v5687_v3  ;;  %1235 = vmatmul.f32.gmra.mxu1 %v5658_v27  ;;  %v5712_v28 = vand.u32 4294901760, %v474_v38  ;;  %v5717_v27 = vand.u32 4294901760, %v5696_v56 }
 0x10c   :  { %v5698_v51 = vadd.f32 %v1788_v18, %v1448_v37  ;;  %1531 = vmatmul.f32.gmra.mxu2 %v5669_v60  ;;  %8231 = vst [vmem:[#allocation63_spill] sm:$0xff] %v5712_v28  ;;  %v5714_v60 = vand.u32 4294901760, %v770_v61  ;;  %v778_v61 = vsub.f32 %v5696_v56, %v5717_v27 }
 0x10d   :  { %8233 = vst [vmem:[#allocation65_spill] sm:$0xff] %v5717_v27 }
 0x10e   :  { %8230 = vst [vmem:[#allocation62_spill] sm:$0xff] %v5698_v51  ;;  %1889 = vmatmul.f32.gmra.mxu3 %v5690_v32  ;;  %v5723_v32 = vsub.f32 %v474_v38, %v5712_v28  ;;  %v182_v38 = vpop.permute.xlu1 %181 }
 0x10f   :  { %v645_v37 = vpop.f32.mrf.mxu0  ;;  %v1176_v18 = vpop.f32.mrf.mxu1  ;;  %8232 = vst [vmem:[#allocation64_spill] sm:$0xff] %v5714_v60  ;;  %v351_v50 = vmax.f32 %v5302_v23, %v182_v38 }
 0x110   :  { %v1173_v48 = vadd.f32 %v1172_v44, %v645_v37  ;;  %v1452_v34 = vpop.f32.mrf.mxu2  ;;  %8234 = vst [vmem:[#allocation66_spill] sm:$0xff] %v5723_v32  ;;  %v5733_v37 = vld [vmem:[%s7873_s0 + $0x138] sm:$0xff] }
 0x111   :  { %v1794_v51 = vpop.f32.mrf.mxu3  ;;  %215 = vrot.lane.b32.xlu0 %v5733_v37, %s5024_s10  ;;  %v480_v23 = vsel %vm412_vm3, %v351_v50, 0 }
 0x112   :  { %v1453_v3 = vadd.f32 %v1452_v34, %v1173_v48  ;;  %772 = vmatmul.f32.gmra.mxu0 %v5714_v60  ;;  %1239 = vmatmul.f32.gmra.mxu1 %v5685_v40  ;;  %v5739_v34 = vand.u32 4294901760, %v477_v1  ;;  %v5744_v40 = vand.u32 4294901760, %v5723_v32 }
 0x114   :  { %v5725_v44 = vadd.f32 %v1794_v51, %v1453_v3  ;;  %1536 = vmatmul.f32.gmra.mxu2 %v5696_v56  ;;  %8236 = vst [vmem:[#allocation68_spill] sm:$0xff] %v5739_v34  ;;  %v5741_v56 = vand.u32 4294901760, %v778_v61  ;;  %v786_v61 = vsub.f32 %v5723_v32, %v5744_v40 }
 0x115   :  { %8238 = vst [vmem:[#allocation70_spill] sm:$0xff] %v5744_v40 }
 0x116   :  { %8235 = vst [vmem:[#allocation67_spill] sm:$0xff] %v5725_v44  ;;  %1895 = vmatmul.f32.gmra.mxu3 %v5717_v27  ;;  %v5750_v27 = vsub.f32 %v477_v1, %v5739_v34  ;;  %v184_v1 = vpop.permute.xlu2 %183 }
 0x117   :  { %v653_v3 = vpop.f32.mrf.mxu0  ;;  %v1180_v51 = vpop.f32.mrf.mxu1  ;;  %8237 = vst [vmem:[#allocation69_spill] sm:$0xff] %v5741_v56  ;;  %v352_v50 = vmax.f32 %v5402_v5, %v184_v1 }
 0x118   :  { %v1177_v43 = vadd.f32 %v1176_v18, %v653_v3  ;;  %v1457_v48 = vpop.f32.mrf.mxu2  ;;  %8239 = vst [vmem:[#allocation71_spill] sm:$0xff] %v5750_v27  ;;  %v5760_v3 = vld [vmem:[%s7873_s0 + $0x140] sm:$0xff] }
 0x119   :  { %v1800_v44 = vpop.f32.mrf.mxu3  ;;  %217 = vrot.lane.b32.xlu1 %v5760_v3, %s5024_s10  ;;  %v483_v5 = vsel %vm412_vm3, %v352_v50, 0 }
 0x11a   :  { %v1458_v60 = vadd.f32 %v1457_v48, %v1177_v43  ;;  %780 = vmatmul.f32.gmra.mxu0 %v5741_v56  ;;  %1243 = vmatmul.f32.gmra.mxu1 %v5712_v28  ;;  %v5766_v48 = vand.u32 4294901760, %v480_v23  ;;  %v5771_v28 = vand.u32 4294901760, %v5750_v27 }
 0x11c   :  { %v5752_v18 = vadd.f32 %v1800_v44, %v1458_v60  ;;  %1541 = vmatmul.f32.gmra.mxu2 %v5723_v32  ;;  %8241 = vst [vmem:[#allocation73_spill] sm:$0xff] %v5766_v48  ;;  %v5768_v32 = vand.u32 4294901760, %v786_v61  ;;  %v794_v61 = vsub.f32 %v5750_v27, %v5771_v28 }
 0x11d   :  { %8243 = vst [vmem:[#allocation75_spill] sm:$0xff] %v5771_v28 }
 0x11e   :  { %8240 = vst [vmem:[#allocation72_spill] sm:$0xff] %v5752_v18  ;;  %1901 = vmatmul.f32.gmra.mxu3 %v5744_v40  ;;  %v5777_v40 = vsub.f32 %v480_v23, %v5766_v48  ;;  %v186_v23 = vpop.permute.xlu0 %185 }
 0x11f   :  { %v661_v60 = vpop.f32.mrf.mxu0  ;;  %v1184_v44 = vpop.f32.mrf.mxu1  ;;  %8242 = vst [vmem:[#allocation74_spill] sm:$0xff] %v5768_v32  ;;  %v353_v50 = vmax.f32 %v5352_v52, %v186_v23 }
 0x120   :  { %v1181_v38 = vadd.f32 %v1180_v51, %v661_v60  ;;  %v1462_v43 = vpop.f32.mrf.mxu2  ;;  %8244 = vst [vmem:[#allocation76_spill] sm:$0xff] %v5777_v40  ;;  %v5787_v60 = vld [vmem:[%s7873_s0 + $0x130] sm:$0xff] }
 0x121   :  { %v1806_v18 = vpop.f32.mrf.mxu3  ;;  %213 = vrot.lane.b32.xlu2 %v5787_v60, %s5024_s10  ;;  %v486_v52 = vsel %vm412_vm3, %v353_v50, 0 }
 0x122   :  { %v1463_v56 = vadd.f32 %v1462_v43, %v1181_v38  ;;  %788 = vmatmul.f32.gmra.mxu0 %v5768_v32  ;;  %1247 = vmatmul.f32.gmra.mxu1 %v5739_v34  ;;  %v5793_v43 = vand.u32 4294901760, %v483_v5  ;;  %v5798_v34 = vand.u32 4294901760, %v5777_v40 }
 0x124   :  { %v5779_v51 = vadd.f32 %v1806_v18, %v1463_v56  ;;  %1546 = vmatmul.f32.gmra.mxu2 %v5750_v27  ;;  %8246 = vst [vmem:[#allocation78_spill] sm:$0xff] %v5793_v43  ;;  %v5795_v27 = vand.u32 4294901760, %v794_v61  ;;  %v802_v61 = vsub.f32 %v5777_v40, %v5798_v34 }
 0x125   :  { %8248 = vst [vmem:[#allocation80_spill] sm:$0xff] %v5798_v34 }
 0x126   :  { %8245 = vst [vmem:[#allocation77_spill] sm:$0xff] %v5779_v51  ;;  %1907 = vmatmul.f32.gmra.mxu3 %v5771_v28  ;;  %v5804_v28 = vsub.f32 %v483_v5, %v5793_v43  ;;  %v188_v5 = vpop.permute.xlu1 %187 }
 0x127   :  { %v669_v56 = vpop.f32.mrf.mxu0  ;;  %v1188_v18 = vpop.f32.mrf.mxu1  ;;  %8247 = vst [vmem:[#allocation79_spill] sm:$0xff] %v5795_v27  ;;  %v354_v50 = vmax.f32 %v5377_v4, %v188_v5 }
 0x128   :  { %v1185_v1 = vadd.f32 %v1184_v44, %v669_v56  ;;  %v1467_v38 = vpop.f32.mrf.mxu2  ;;  %8249 = vst [vmem:[#allocation81_spill] sm:$0xff] %v5804_v28  ;;  %v5814_v56 = vld [vmem:[%s7873_s0 + $0x150] sm:$0xff] }
 0x129   :  { %v1812_v51 = vpop.f32.mrf.mxu3  ;;  %221 = vrot.lane.b32.xlu0 %v5814_v56, %s5024_s10  ;;  %v489_v4 = vsel %vm412_vm3, %v354_v50, 0 }
 0x12a   :  { %v1468_v32 = vadd.f32 %v1467_v38, %v1185_v1  ;;  %796 = vmatmul.f32.gmra.mxu0 %v5795_v27  ;;  %1251 = vmatmul.f32.gmra.mxu1 %v5766_v48  ;;  %v5820_v38 = vand.u32 4294901760, %v486_v52  ;;  %v5825_v48 = vand.u32 4294901760, %v5804_v28 }
 0x12c   :  { %v5806_v44 = vadd.f32 %v1812_v51, %v1468_v32  ;;  %1551 = vmatmul.f32.gmra.mxu2 %v5777_v40  ;;  %8251 = vst [vmem:[#allocation83_spill] sm:$0xff] %v5820_v38  ;;  %v5822_v40 = vand.u32 4294901760, %v802_v61  ;;  %v810_v61 = vsub.f32 %v5804_v28, %v5825_v48 }
 0x12d   :  { %8253 = vst [vmem:[#allocation85_spill] sm:$0xff] %v5825_v48 }
 0x12e   :  { %8250 = vst [vmem:[#allocation82_spill] sm:$0xff] %v5806_v44  ;;  %1913 = vmatmul.f32.gmra.mxu3 %v5798_v34  ;;  %v5831_v34 = vsub.f32 %v486_v52, %v5820_v38  ;;  %v190_v52 = vpop.permute.xlu2 %189 }
 0x12f   :  { %v677_v32 = vpop.f32.mrf.mxu0  ;;  %v1192_v51 = vpop.f32.mrf.mxu1  ;;  %8252 = vst [vmem:[#allocation84_spill] sm:$0xff] %v5822_v40  ;;  %v355_v50 = vmax.f32 %v5477_v19, %v190_v52 }
 0x130   :  { %v1189_v23 = vadd.f32 %v1188_v18, %v677_v32  ;;  %v1472_v1 = vpop.f32.mrf.mxu2  ;;  %8254 = vst [vmem:[#allocation86_spill] sm:$0xff] %v5831_v34  ;;  %v5841_v32 = vld [vmem:[%s7873_s0 + $0x158] sm:$0xff] }
 0x131   :  { %v1818_v44 = vpop.f32.mrf.mxu3  ;;  %223 = vrot.lane.b32.xlu1 %v5841_v32, %s5024_s10  ;;  %v492_v19 = vsel %vm412_vm3, %v355_v50, 0 }
 0x132   :  { %v1473_v27 = vadd.f32 %v1472_v1, %v1189_v23  ;;  %804 = vmatmul.f32.gmra.mxu0 %v5822_v40  ;;  %1255 = vmatmul.f32.gmra.mxu1 %v5793_v43  ;;  %v5847_v1 = vand.u32 4294901760, %v489_v4  ;;  %v5852_v43 = vand.u32 4294901760, %v5831_v34 }
 0x134   :  { %v5833_v18 = vadd.f32 %v1818_v44, %v1473_v27  ;;  %1556 = vmatmul.f32.gmra.mxu2 %v5804_v28  ;;  %8256 = vst [vmem:[#allocation88_spill] sm:$0xff] %v5847_v1  ;;  %v5849_v28 = vand.u32 4294901760, %v810_v61  ;;  %v818_v61 = vsub.f32 %v5831_v34, %v5852_v43 }
 0x135   :  { %8258 = vst [vmem:[#allocation90_spill] sm:$0xff] %v5852_v43 }
 0x136   :  { %8255 = vst [vmem:[#allocation87_spill] sm:$0xff] %v5833_v18  ;;  %1919 = vmatmul.f32.gmra.mxu3 %v5825_v48  ;;  %v5858_v48 = vsub.f32 %v489_v4, %v5847_v1  ;;  %v192_v4 = vpop.permute.xlu0 %191 }
 0x137   :  { %v685_v27 = vpop.f32.mrf.mxu0  ;;  %v1196_v44 = vpop.f32.mrf.mxu1  ;;  %8257 = vst [vmem:[#allocation89_spill] sm:$0xff] %v5849_v28  ;;  %v356_v50 = vmax.f32 %v5427_v7, %v192_v4 }
 0x138   :  { %v1193_v5 = vadd.f32 %v1192_v51, %v685_v27  ;;  %v1477_v23 = vpop.f32.mrf.mxu2  ;;  %8259 = vst [vmem:[#allocation91_spill] sm:$0xff] %v5858_v48  ;;  %v5868_v27 = vld [vmem:[%s7873_s0 + $0x148] sm:$0xff] }
 0x139   :  { %v1824_v18 = vpop.f32.mrf.mxu3  ;;  %219 = vrot.lane.b32.xlu2 %v5868_v27, %s5024_s10  ;;  %v495_v7 = vsel %vm412_vm3, %v356_v50, 0 }
 0x13a   :  { %v1478_v40 = vadd.f32 %v1477_v23, %v1193_v5  ;;  %812 = vmatmul.f32.gmra.mxu0 %v5849_v28  ;;  %1259 = vmatmul.f32.gmra.mxu1 %v5820_v38  ;;  %v5874_v23 = vand.u32 4294901760, %v492_v19  ;;  %v5879_v38 = vand.u32 4294901760, %v5858_v48 }
 0x13c   :  { %v5860_v51 = vadd.f32 %v1824_v18, %v1478_v40  ;;  %1561 = vmatmul.f32.gmra.mxu2 %v5831_v34  ;;  %8261 = vst [vmem:[#allocation93_spill] sm:$0xff] %v5874_v23  ;;  %v5876_v34 = vand.u32 4294901760, %v818_v61  ;;  %v826_v61 = vsub.f32 %v5858_v48, %v5879_v38 }
 0x13d   :  { %8263 = vst [vmem:[#allocation95_spill] sm:$0xff] %v5879_v38 }
 0x13e   :  { %8260 = vst [vmem:[#allocation92_spill] sm:$0xff] %v5860_v51  ;;  %1925 = vmatmul.f32.gmra.mxu3 %v5852_v43  ;;  %v5885_v43 = vsub.f32 %v492_v19, %v5874_v23  ;;  %v194_v19 = vpop.permute.xlu1 %193 }
 0x13f   :  { %v693_v40 = vpop.f32.mrf.mxu0  ;;  %v1200_v18 = vpop.f32.mrf.mxu1  ;;  %8262 = vst [vmem:[#allocation94_spill] sm:$0xff] %v5876_v34  ;;  %v357_v50 = vmax.f32 %v5452_v20, %v194_v19 }
 0x140   :  { %v1197_v52 = vadd.f32 %v1196_v44, %v693_v40  ;;  %v1482_v5 = vpop.f32.mrf.mxu2  ;;  %8264 = vst [vmem:[#allocation96_spill] sm:$0xff] %v5885_v43  ;;  %v5895_v40 = vld [vmem:[%s7873_s0 + $0x168] sm:$0xff] }
 0x141   :  { %v1830_v51 = vpop.f32.mrf.mxu3  ;;  %227 = vrot.lane.b32.xlu0 %v5895_v40, %s5024_s10  ;;  %v498_v20 = vsel %vm412_vm3, %v357_v50, 0 }
 0x142   :  { %v1483_v28 = vadd.f32 %v1482_v5, %v1197_v52  ;;  %820 = vmatmul.f32.gmra.mxu0 %v5876_v34  ;;  %1263 = vmatmul.f32.gmra.mxu1 %v5847_v1  ;;  %v5901_v5 = vand.u32 4294901760, %v495_v7  ;;  %v5906_v1 = vand.u32 4294901760, %v5885_v43 }
 0x144   :  { %v5887_v44 = vadd.f32 %v1830_v51, %v1483_v28  ;;  %1566 = vmatmul.f32.gmra.mxu2 %v5858_v48  ;;  %8266 = vst [vmem:[#allocation98_spill] sm:$0xff] %v5901_v5  ;;  %v5903_v48 = vand.u32 4294901760, %v826_v61  ;;  %v834_v61 = vsub.f32 %v5885_v43, %v5906_v1 }
 0x145   :  { %8268 = vst [vmem:[#allocation100_spill] sm:$0xff] %v5906_v1 }
 0x146   :  { %8265 = vst [vmem:[#allocation97_spill] sm:$0xff] %v5887_v44  ;;  %1931 = vmatmul.f32.gmra.mxu3 %v5879_v38  ;;  %v5912_v38 = vsub.f32 %v495_v7, %v5901_v5  ;;  %v196_v7 = vpop.permute.xlu2 %195 }
 0x147   :  { %v701_v28 = vpop.f32.mrf.mxu0  ;;  %v1204_v51 = vpop.f32.mrf.mxu1  ;;  %8267 = vst [vmem:[#allocation99_spill] sm:$0xff] %v5903_v48  ;;  %v358_v50 = vmax.f32 %v5552_v0, %v196_v7 }
 0x148   :  { %v1201_v4 = vadd.f32 %v1200_v18, %v701_v28  ;;  %v1487_v52 = vpop.f32.mrf.mxu2  ;;  %8269 = vst [vmem:[#allocation101_spill] sm:$0xff] %v5912_v38  ;;  %v5922_v28 = vld [vmem:[%s7873_s0 + $0x170] sm:$0xff] }
 0x149   :  { %v1836_v44 = vpop.f32.mrf.mxu3  ;;  %229 = vrot.lane.b32.xlu1 %v5922_v28, %s5024_s10  ;;  %v501_v0 = vsel %vm412_vm3, %v358_v50, 0 }
 0x14a   :  { %v1488_v34 = vadd.f32 %v1487_v52, %v1201_v4  ;;  %828 = vmatmul.f32.gmra.mxu0 %v5903_v48  ;;  %1267 = vmatmul.f32.gmra.mxu1 %v5874_v23  ;;  %v5928_v52 = vand.u32 4294901760, %v498_v20  ;;  %v5933_v23 = vand.u32 4294901760, %v5912_v38 }
 0x14c   :  { %v5914_v18 = vadd.f32 %v1836_v44, %v1488_v34  ;;  %1571 = vmatmul.f32.gmra.mxu2 %v5885_v43  ;;  %8271 = vst [vmem:[#allocation103_spill] sm:$0xff] %v5928_v52  ;;  %v5930_v43 = vand.u32 4294901760, %v834_v61  ;;  %v842_v61 = vsub.f32 %v5912_v38, %v5933_v23 }
 0x14d   :  { %8273 = vst [vmem:[#allocation105_spill] sm:$0xff] %v5933_v23 }
 0x14e   :  { %8270 = vst [vmem:[#allocation102_spill] sm:$0xff] %v5914_v18  ;;  %1937 = vmatmul.f32.gmra.mxu3 %v5906_v1  ;;  %v5939_v1 = vsub.f32 %v498_v20, %v5928_v52  ;;  %v198_v20 = vpop.permute.xlu0 %197 }
 0x14f   :  { %v709_v34 = vpop.f32.mrf.mxu0  ;;  %v1208_v44 = vpop.f32.mrf.mxu1  ;;  %8272 = vst [vmem:[#allocation104_spill] sm:$0xff] %v5930_v43  ;;  %v359_v50 = vmax.f32 %v5502_v8, %v198_v20 }
 0x150   :  { %v1205_v19 = vadd.f32 %v1204_v51, %v709_v34  ;;  %v1492_v4 = vpop.f32.mrf.mxu2  ;;  %8274 = vst [vmem:[#allocation106_spill] sm:$0xff] %v5939_v1  ;;  %v5949_v34 = vld [vmem:[%s7873_s0 + $0x160] sm:$0xff] }
 0x151   :  { %v1842_v18 = vpop.f32.mrf.mxu3  ;;  %225 = vrot.lane.b32.xlu2 %v5949_v34, %s5024_s10  ;;  %v504_v8 = vsel %vm412_vm3, %v359_v50, 0 }
 0x152   :  { %v1493_v48 = vadd.f32 %v1492_v4, %v1205_v19  ;;  %836 = vmatmul.f32.gmra.mxu0 %v5930_v43  ;;  %1271 = vmatmul.f32.gmra.mxu1 %v5901_v5  ;;  %v5955_v4 = vand.u32 4294901760, %v501_v0  ;;  %v5960_v5 = vand.u32 4294901760, %v5939_v1 }
 0x154   :  { %v5941_v51 = vadd.f32 %v1842_v18, %v1493_v48  ;;  %1576 = vmatmul.f32.gmra.mxu2 %v5912_v38  ;;  %8276 = vst [vmem:[#allocation108_spill] sm:$0xff] %v5955_v4  ;;  %v5957_v38 = vand.u32 4294901760, %v842_v61  ;;  %v850_v61 = vsub.f32 %v5939_v1, %v5960_v5 }
 0x155   :  { %8278 = vst [vmem:[#allocation110_spill] sm:$0xff] %v5960_v5 }
 0x156   :  { %8275 = vst [vmem:[#allocation107_spill] sm:$0xff] %v5941_v51  ;;  %1943 = vmatmul.f32.gmra.mxu3 %v5933_v23  ;;  %v5966_v23 = vsub.f32 %v501_v0, %v5955_v4  ;;  %v200_v0 = vpop.permute.xlu1 %199 }
 0x157   :  { %v717_v48 = vpop.f32.mrf.mxu0  ;;  %v1212_v18 = vpop.f32.mrf.mxu1  ;;  %8277 = vst [vmem:[#allocation109_spill] sm:$0xff] %v5957_v38  ;;  %v360_v50 = vmax.f32 %v5527_v35, %v200_v0 }
 0x158   :  { %v1209_v7 = vadd.f32 %v1208_v44, %v717_v48  ;;  %v1497_v19 = vpop.f32.mrf.mxu2  ;;  %8279 = vst [vmem:[#allocation111_spill] sm:$0xff] %v5966_v23  ;;  %v5976_v48 = vld [vmem:[%s7873_s0 + $0x180] sm:$0xff] }
 0x159   :  { %v1848_v51 = vpop.f32.mrf.mxu3  ;;  %233 = vrot.lane.b32.xlu0 %v5976_v48, %s5024_s10 }
 0x15a   :  { %v1498_v43 = vadd.f32 %v1497_v19, %v1209_v7  ;;  %844 = vmatmul.f32.gmra.mxu0 %v5957_v38  ;;  %1275 = vmatmul.f32.gmra.mxu1 %v5928_v52  ;;  %v5982_v19 = vand.u32 4294901760, %v504_v8  ;;  %v5987_v52 = vand.u32 4294901760, %v5966_v23 }
 0x15c   :  { %v5968_v44 = vadd.f32 %v1848_v51, %v1498_v43  ;;  %1581 = vmatmul.f32.gmra.mxu2 %v5939_v1  ;;  %8281 = vst [vmem:[#allocation113_spill] sm:$0xff] %v5982_v19  ;;  %v5984_v1 = vand.u32 4294901760, %v850_v61  ;;  %v6003_v35 = vsub.f32 %v504_v8, %v5982_v19  ;;  %v858_v0 = vsub.f32 %v5966_v23, %v5987_v52 }
 0x15d   :  { %8283 = vst [vmem:[#allocation115_spill] sm:$0xff] %v5987_v52  ;;  %v507_v8 = vsel %vm412_vm3, %v360_v50, 0 }
 0x15e   :  { %8280 = vst [vmem:[#allocation112_spill] sm:$0xff] %v5968_v44  ;;  %1949 = vmatmul.f32.gmra.mxu3 %v5960_v5  ;;  %v6025_v13 = vand.u32 4294901760, %v507_v8  ;;  %v6027_v6 = vand.u32 4294901760, %v858_v0  ;;  %v6030_v50 = vand.u32 4294901760, %v6003_v35 }
 0x15f   :  { %v725_v43 = vpop.f32.mrf.mxu0  ;;  %v1216_v51 = vpop.f32.mrf.mxu1  ;;  %8282 = vst [vmem:[#allocation114_spill] sm:$0xff] %v5984_v1 }
 0x160   :  { %v1213_v20 = vadd.f32 %v1212_v18, %v725_v43  ;;  %v1502_v7 = vpop.f32.mrf.mxu2  ;;  %v8284_v18 = vmov 1.0   ;;  %8285 = vst [vmem:[#allocation116_spill] sm:$0xff] %v6003_v35  ;;  %v8287_v43 = vmov 0.0   ;;  %v866_v0 = vsub.f32 %v6003_v35, %v6030_v50 }
 0x161   :  { %v1854_v44 = vpop.f32.mrf.mxu3  ;;  %4987 = vmatpush.msk.msrb.mxu2 %vm406_vm4, %v8284_v18  ;;  %4989 = vmatpush.msk.msra.mxu1 %vm406_vm4, %v8284_v18  ;;  %8289 = vst [vmem:[#allocation118_spill] sm:$0xff] %v6025_v13 }
 0x162   :  { %v1503_v38 = vadd.f32 %v1502_v7, %v1213_v20  ;;  %852 = vmatmul.f32.gmra.mxu0 %v5984_v1  ;;  %1279 = vmatmul.f32.gmra.mxu1 %v5955_v4  ;;  %v4978_v20 = vsel %vm406_vm4, 1.0, %v8287_v43  ;;  %v6017_v7 = vld [vmem:[%s7873_s0 + $0x188] sm:$0xff]  ;;  %8290 = vst [vmem:[#allocation119_spill] sm:$0xff] %v6030_v50 }
 0x163   :  { %v3269_v5 = vsub.f32 %v4978_v20, %v4978_v20  ;;  %235 = vrot.lane.b32.xlu1 %v6017_v7, %s5024_s10  ;;  %239 = vrot.lane.b32.xlu0 %v6081_v15, %s5024_s10 }
 0x164   :  { %v6005_v61 = vadd.f32 %v1854_v44, %v1503_v38  ;;  %1586 = vmatmul.f32.gmra.mxu2 %v5966_v23  ;;  %v8288_v38 = vand.u32 4294901760, %v5202_v36  ;;  %v202_v44 = vpop.permute.xlu2 %201 }
 0x165   :  { %v3270_v43 = vand.u32 4294901760, %v3269_v5  ;;  %3550 = vmatpush.msra.mxu0 %v3269_v5  ;;  %v361_v36 = vmax.f32 %v5627_v21, %v202_v44  ;;  %v6046_v21 = vld [vmem:[%s7873_s0 + $0x178] sm:$0xff] }
 0x166   :  { %8286 = vst [vmem:[#allocation117_spill] sm:$0xff] %v6005_v61  ;;  %4292 = vmatpush.msra.mxu2 %v8288_v38  ;;  %1955 = vmatmul.f32.gmra.mxu3 %v5987_v52 }
 0x167   :  { %v733_v23 = vpop.f32.mrf.mxu0  ;;  %v1220_v4 = vpop.f32.mrf.mxu1  ;;  %v3271_v38 = vsub.f32 %v3269_v5, %v3270_v43  ;;  %231 = vrot.lane.b32.xlu2 %v6046_v21, %s5024_s10 }
 0x168   :  { %v1217_v61 = vadd.f32 %v1216_v51, %v733_v23  ;;  %v1507_v1 = vpop.f32.mrf.mxu2  ;;  %4296 = vmatpush.msra.mxu2 %v3270_v43  ;;  %v6036_v23 = vsub.f32 %v507_v8, %v6025_v13  ;;  %v204_v5 = vpop.permute.xlu0 %203 }
 0x169   :  { %v1860_v20 = vpop.f32.mrf.mxu3  ;;  %v3272_v12 = vand.u32 4294901760, %v3271_v38  ;;  %v362_v38 = vmax.f32 %v5577_v47, %v204_v5 }
 0x16a   :  { %v1508_v52 = vadd.f32 %v1507_v1, %v1217_v61  ;;  %860 = vmatmul.f32.gmra.mxu0 %v6027_v6  ;;  %1283 = vmatmul.f32.gmra.mxu1 %v5982_v19  ;;  %8291 = vst [vmem:[#allocation120_spill] sm:$0xff] %v6036_v23  ;;  %v510_v1 = vsel %vm412_vm3, %v361_v36, 0 }
 0x16b   :  { %3273 = vmatpush.msrb.mxu3 %v3272_v12  ;;  %v6056_v43 = vand.u32 4294901760, %v510_v1  ;;  %v6061_v12 = vand.u32 4294901760, %v6036_v23  ;;  %v513_v33 = vsel %vm412_vm3, %v362_v38, 0 }
 0x16c   :  { %v6038_v51 = vadd.f32 %v1860_v20, %v1508_v52  ;;  %1591 = vmatmul.f32.gmra.mxu2 %v6003_v35  ;;  %v6058_v20 = vand.u32 4294901760, %v866_v0 }
 0x16d   :  { %4990 = vmatpush.msk.msra.mxu3 %vm407_vm2, %v8284_v18  ;;  %8292 = vst [vmem:[#allocation121_spill] sm:$0xff] %v6056_v43  ;;  %v6071_v17 = vsub.f32 %v510_v1, %v6056_v43  ;;  %v874_v47 = vsub.f32 %v6036_v23, %v6061_v12 }
 0x16e   :  { %1961 = vmatmul.f32.gmra.mxu3 %v6030_v50  ;;  %8293 = vst [vmem:[#allocation122_spill] sm:$0xff] %v6061_v12 }
 0x16f   :  { %v741_v52 = vpop.f32.mrf.mxu0  ;;  %v1224_v61 = vpop.f32.mrf.mxu1  ;;  %4991 = vmatpush.msk.msra.mxu3 %vm406_vm4, %v8284_v18  ;;  %8294 = vst [vmem:[#allocation123_spill] sm:$0xff] %v6071_v17 }
 0x170   :  { %v1221_v8 = vadd.f32 %v1220_v4, %v741_v52  ;;  %v1512_v44 = vpop.f32.mrf.mxu2  ;;  %v206_v18 = vpop.permute.xlu1 %205  ;;  %v6087_v52 = vand.u32 4294901760, %v513_v33 }
 0x171   :  { %v1866_v36 = vpop.f32.mrf.mxu3  ;;  %v363_v38 = vmax.f32 %v5602_v30, %v206_v18 }
 0x172   :  { %v1513_v35 = vadd.f32 %v1512_v44, %v1221_v8  ;;  %868 = vmatmul.f32.gmra.mxu0 %v6058_v20  ;;  %1287 = vmatmul.f32.gmra.mxu1 %v6025_v13  ;;  %8295 = vst [vmem:[#allocation124_spill] sm:$0xff] %v6087_v52  ;;  %v6089_v8 = vand.u32 4294901760, %v874_v47  ;;  %v6092_v44 = vand.u32 4294901760, %v6071_v17 }
 0x173   :  { %v516_v30 = vsel %vm412_vm3, %v363_v38, 0 }
 0x174   :  { %v6073_v4 = vadd.f32 %v1866_v36, %v1513_v35  ;;  %1596 = vmatmul.f32.gmra.mxu2 %v6036_v23  ;;  %8296 = vst [vmem:[#allocation125_spill] sm:$0xff] %v6092_v44  ;;  %v882_v47 = vsub.f32 %v6071_v17, %v6092_v44 }
 0x176   :  { %1967 = vmatmul.f32.gmra.mxu3 %v6061_v12  ;;  %v6098_v12 = vsub.f32 %v513_v33, %v6087_v52  ;;  %v208_v33 = vpop.permute.xlu2 %207 }
 0x177   :  { %v749_v35 = vpop.f32.mrf.mxu0  ;;  %v1228_v0 = vpop.f32.mrf.mxu1  ;;  %v364_v38 = vmax.f32 %v5706_v2, %v208_v33 }
 0x178   :  { %v1225_v1 = vadd.f32 %v1224_v61, %v749_v35  ;;  %v1517_v5 = vpop.f32.mrf.mxu2  ;;  %8297 = vst [vmem:[#allocation126_spill] sm:$0xff] %v6098_v12  ;;  %v6108_v35 = vld [vmem:[%s7873_s0 + $0x1a0] sm:$0xff]  ;;  %v6119_v50 = vand.u32 4294901760, %v6098_v12 }
 0x179   :  { %v1872_v36 = vpop.f32.mrf.mxu3  ;;  %241 = vrot.lane.b32.xlu1 %v6108_v35, %s5024_s10  ;;  %v519_v2 = vsel %vm412_vm3, %v364_v38, 0 }
 0x17a   :  { %v1518_v23 = vadd.f32 %v1517_v5, %v1225_v1  ;;  %876 = vmatmul.f32.gmra.mxu0 %v6089_v8  ;;  %1291 = vmatmul.f32.gmra.mxu1 %v6056_v43  ;;  %8301 = vst [vmem:[#allocation130_spill] sm:$0xff] %v6119_v50 }
 0x17c   :  { %v6100_v61 = vadd.f32 %v1872_v36, %v1518_v23  ;;  %1601 = vmatmul.f32.gmra.mxu2 %v6071_v17  ;;  %v6114_v36 = vand.u32 4294901760, %v516_v30  ;;  %v6116_v17 = vand.u32 4294901760, %v882_v47  ;;  %v890_v47 = vsub.f32 %v6098_v12, %v6119_v50 }
 0x17e   :  { %8298 = vst [vmem:[#allocation127_spill] sm:$0xff] %v6100_v61  ;;  %1973 = vmatmul.f32.gmra.mxu3 %v6092_v44  ;;  %v6125_v44 = vsub.f32 %v516_v30, %v6114_v36  ;;  %v210_v30 = vpop.permute.xlu0 %209 }
 0x17f   :  { %v757_v23 = vpop.f32.mrf.mxu0  ;;  %v1232_v18 = vpop.f32.mrf.mxu1  ;;  %8299 = vst [vmem:[#allocation128_spill] sm:$0xff] %v6114_v36  ;;  %v365_v38 = vmax.f32 %v5652_v62, %v210_v30 }
 0x180   :  { %v1229_v1 = vadd.f32 %v1228_v0, %v757_v23  ;;  %v1522_v5 = vpop.f32.mrf.mxu2  ;;  %8300 = vst [vmem:[#allocation129_spill] sm:$0xff] %v6116_v17  ;;  %v6135_v23 = vld [vmem:[%s7873_s0 + $0x190] sm:$0xff] }
 0x181   :  { %v1878_v43 = vpop.f32.mrf.mxu3  ;;  %8302 = vst [vmem:[#allocation131_spill] sm:$0xff] %v6125_v44  ;;  %237 = vrot.lane.b32.xlu2 %v6135_v23, %s5024_s10  ;;  %v522_v62 = vsel %vm412_vm3, %v365_v38, 0 }
 0x182   :  { %v1523_v61 = vadd.f32 %v1522_v5, %v1229_v1  ;;  %884 = vmatmul.f32.gmra.mxu0 %v6116_v17  ;;  %1295 = vmatmul.f32.gmra.mxu1 %v6087_v52  ;;  %v6141_v5 = vand.u32 4294901760, %v519_v2  ;;  %v6146_v52 = vand.u32 4294901760, %v6125_v44 }
 0x184   :  { %v6127_v0 = vadd.f32 %v1878_v43, %v1523_v61  ;;  %1606 = vmatmul.f32.gmra.mxu2 %v6098_v12  ;;  %8304 = vst [vmem:[#allocation133_spill] sm:$0xff] %v6141_v5  ;;  %v6143_v12 = vand.u32 4294901760, %v890_v47  ;;  %v898_v47 = vsub.f32 %v6125_v44, %v6146_v52 }
 0x185   :  { %8306 = vst [vmem:[#allocation135_spill] sm:$0xff] %v6146_v52 }
 0x186   :  { %8303 = vst [vmem:[#allocation132_spill] sm:$0xff] %v6127_v0  ;;  %1979 = vmatmul.f32.gmra.mxu3 %v6119_v50  ;;  %v6152_v50 = vsub.f32 %v519_v2, %v6141_v5  ;;  %v212_v2 = vpop.permute.xlu1 %211 }
 0x187   :  { %v765_v43 = vpop.f32.mrf.mxu0  ;;  %v1236_v61 = vpop.f32.mrf.mxu1  ;;  %8305 = vst [vmem:[#allocation134_spill] sm:$0xff] %v6143_v12  ;;  %v366_v38 = vmax.f32 %v5679_v63, %v212_v2 }
 0x188   :  { %v1233_v33 = vadd.f32 %v1232_v18, %v765_v43  ;;  %v1527_v1 = vpop.f32.mrf.mxu2  ;;  %8307 = vst [vmem:[#allocation136_spill] sm:$0xff] %v6152_v50  ;;  %v6162_v43 = vld [vmem:[%s7873_s0 + $0x1b0] sm:$0xff] }
 0x189   :  { %v1884_v0 = vpop.f32.mrf.mxu3  ;;  %245 = vrot.lane.b32.xlu0 %v6162_v43, %s5024_s10  ;;  %v525_v63 = vsel %vm412_vm3, %v366_v38, 0 }
 0x18a   :  { %v1528_v17 = vadd.f32 %v1527_v1, %v1233_v33  ;;  %892 = vmatmul.f32.gmra.mxu0 %v6143_v12  ;;  %1299 = vmatmul.f32.gmra.mxu1 %v6114_v36  ;;  %v6168_v1 = vand.u32 4294901760, %v522_v62  ;;  %v6173_v36 = vand.u32 4294901760, %v6152_v50 }
 0x18c   :  { %v6154_v18 = vadd.f32 %v1884_v0, %v1528_v17  ;;  %1611 = vmatmul.f32.gmra.mxu2 %v6125_v44  ;;  %8309 = vst [vmem:[#allocation138_spill] sm:$0xff] %v6168_v1  ;;  %v6170_v44 = vand.u32 4294901760, %v898_v47  ;;  %v906_v47 = vsub.f32 %v6152_v50, %v6173_v36 }
 0x18d   :  { %8311 = vst [vmem:[#allocation140_spill] sm:$0xff] %v6173_v36 }
 0x18e   :  { %8308 = vst [vmem:[#allocation137_spill] sm:$0xff] %v6154_v18  ;;  %1985 = vmatmul.f32.gmra.mxu3 %v6146_v52  ;;  %v6179_v52 = vsub.f32 %v522_v62, %v6168_v1  ;;  %v214_v62 = vpop.permute.xlu2 %213 }
 0x18f   :  { %v773_v17 = vpop.f32.mrf.mxu0  ;;  %v1240_v0 = vpop.f32.mrf.mxu1  ;;  %8310 = vst [vmem:[#allocation139_spill] sm:$0xff] %v6170_v44  ;;  %v367_v38 = vmax.f32 %v5787_v60, %v214_v62 }
 0x190   :  { %v1237_v30 = vadd.f32 %v1236_v61, %v773_v17  ;;  %v1532_v33 = vpop.f32.mrf.mxu2  ;;  %8312 = vst [vmem:[#allocation141_spill] sm:$0xff] %v6179_v52  ;;  %v6189_v17 = vld [vmem:[%s7873_s0 + $0x1b8] sm:$0xff] }
 0x191   :  { %v1890_v18 = vpop.f32.mrf.mxu3  ;;  %247 = vrot.lane.b32.xlu1 %v6189_v17, %s5024_s10  ;;  %v528_v60 = vsel %vm412_vm3, %v367_v38, 0 }
 0x192   :  { %v1533_v12 = vadd.f32 %v1532_v33, %v1237_v30  ;;  %900 = vmatmul.f32.gmra.mxu0 %v6170_v44  ;;  %1303 = vmatmul.f32.gmra.mxu1 %v6141_v5  ;;  %v6195_v33 = vand.u32 4294901760, %v525_v63  ;;  %v6200_v5 = vand.u32 4294901760, %v6179_v52 }
 0x194   :  { %v6181_v61 = vadd.f32 %v1890_v18, %v1533_v12  ;;  %1616 = vmatmul.f32.gmra.mxu2 %v6152_v50  ;;  %8314 = vst [vmem:[#allocation143_spill] sm:$0xff] %v6195_v33  ;;  %v6197_v50 = vand.u32 4294901760, %v906_v47  ;;  %v914_v47 = vsub.f32 %v6179_v52, %v6200_v5 }
 0x195   :  { %8316 = vst [vmem:[#allocation145_spill] sm:$0xff] %v6200_v5 }
 0x196   :  { %8313 = vst [vmem:[#allocation142_spill] sm:$0xff] %v6181_v61  ;;  %1991 = vmatmul.f32.gmra.mxu3 %v6173_v36  ;;  %v6206_v36 = vsub.f32 %v525_v63, %v6195_v33  ;;  %v216_v63 = vpop.permute.xlu0 %215 }
 0x197   :  { %v781_v12 = vpop.f32.mrf.mxu0  ;;  %v1244_v18 = vpop.f32.mrf.mxu1  ;;  %8315 = vst [vmem:[#allocation144_spill] sm:$0xff] %v6197_v50  ;;  %v368_v38 = vmax.f32 %v5733_v37, %v216_v63 }
 0x198   :  { %v1241_v2 = vadd.f32 %v1240_v0, %v781_v12  ;;  %v1537_v30 = vpop.f32.mrf.mxu2  ;;  %8317 = vst [vmem:[#allocation146_spill] sm:$0xff] %v6206_v36  ;;  %v6216_v12 = vld [vmem:[%s7873_s0 + $0x1a8] sm:$0xff] }
 0x199   :  { %v1896_v61 = vpop.f32.mrf.mxu3  ;;  %243 = vrot.lane.b32.xlu2 %v6216_v12, %s5024_s10  ;;  %v531_v37 = vsel %vm412_vm3, %v368_v38, 0 }
 0x19a   :  { %v1538_v44 = vadd.f32 %v1537_v30, %v1241_v2  ;;  %908 = vmatmul.f32.gmra.mxu0 %v6197_v50  ;;  %1307 = vmatmul.f32.gmra.mxu1 %v6168_v1  ;;  %v6222_v30 = vand.u32 4294901760, %v528_v60  ;;  %v6227_v1 = vand.u32 4294901760, %v6206_v36 }
 0x19c   :  { %v6208_v0 = vadd.f32 %v1896_v61, %v1538_v44  ;;  %1621 = vmatmul.f32.gmra.mxu2 %v6179_v52  ;;  %8319 = vst [vmem:[#allocation148_spill] sm:$0xff] %v6222_v30  ;;  %v6224_v52 = vand.u32 4294901760, %v914_v47  ;;  %v922_v47 = vsub.f32 %v6206_v36, %v6227_v1 }
 0x19d   :  { %8321 = vst [vmem:[#allocation150_spill] sm:$0xff] %v6227_v1 }
 0x19e   :  { %8318 = vst [vmem:[#allocation147_spill] sm:$0xff] %v6208_v0  ;;  %1997 = vmatmul.f32.gmra.mxu3 %v6200_v5  ;;  %v6233_v5 = vsub.f32 %v528_v60, %v6222_v30  ;;  %v218_v60 = vpop.permute.xlu1 %217 }
 0x19f   :  { %v789_v44 = vpop.f32.mrf.mxu0  ;;  %v1248_v61 = vpop.f32.mrf.mxu1  ;;  %8320 = vst [vmem:[#allocation149_spill] sm:$0xff] %v6224_v52  ;;  %v369_v38 = vmax.f32 %v5760_v3, %v218_v60 }
 0x1a0   :  { %v1245_v62 = vadd.f32 %v1244_v18, %v789_v44  ;;  %v1542_v2 = vpop.f32.mrf.mxu2  ;;  %8322 = vst [vmem:[#allocation151_spill] sm:$0xff] %v6233_v5  ;;  %v6243_v44 = vld [vmem:[%s7873_s0 + $0x1c8] sm:$0xff] }
 0x1a1   :  { %v1902_v0 = vpop.f32.mrf.mxu3  ;;  %251 = vrot.lane.b32.xlu0 %v6243_v44, %s5024_s10  ;;  %v534_v3 = vsel %vm412_vm3, %v369_v38, 0 }
 0x1a2   :  { %v1543_v50 = vadd.f32 %v1542_v2, %v1245_v62  ;;  %916 = vmatmul.f32.gmra.mxu0 %v6224_v52  ;;  %1311 = vmatmul.f32.gmra.mxu1 %v6195_v33  ;;  %v6249_v2 = vand.u32 4294901760, %v531_v37  ;;  %v6254_v33 = vand.u32 4294901760, %v6233_v5 }
 0x1a4   :  { %v6235_v18 = vadd.f32 %v1902_v0, %v1543_v50  ;;  %1626 = vmatmul.f32.gmra.mxu2 %v6206_v36  ;;  %8324 = vst [vmem:[#allocation153_spill] sm:$0xff] %v6249_v2  ;;  %v6251_v36 = vand.u32 4294901760, %v922_v47  ;;  %v930_v47 = vsub.f32 %v6233_v5, %v6254_v33 }
 0x1a5   :  { %8326 = vst [vmem:[#allocation155_spill] sm:$0xff] %v6254_v33 }
 0x1a6   :  { %8323 = vst [vmem:[#allocation152_spill] sm:$0xff] %v6235_v18  ;;  %2003 = vmatmul.f32.gmra.mxu3 %v6227_v1  ;;  %v6260_v1 = vsub.f32 %v531_v37, %v6249_v2  ;;  %v220_v37 = vpop.permute.xlu2 %219 }
 0x1a7   :  { %v797_v50 = vpop.f32.mrf.mxu0  ;;  %v1252_v0 = vpop.f32.mrf.mxu1  ;;  %8325 = vst [vmem:[#allocation154_spill] sm:$0xff] %v6251_v36  ;;  %v370_v38 = vmax.f32 %v5868_v27, %v220_v37 }
 0x1a8   :  { %v1249_v63 = vadd.f32 %v1248_v61, %v797_v50  ;;  %v1547_v62 = vpop.f32.mrf.mxu2  ;;  %8327 = vst [vmem:[#allocation156_spill] sm:$0xff] %v6260_v1  ;;  %v6270_v50 = vld [vmem:[%s7873_s0 + $0x1d0] sm:$0xff] }
 0x1a9   :  { %v1908_v18 = vpop.f32.mrf.mxu3  ;;  %253 = vrot.lane.b32.xlu1 %v6270_v50, %s5024_s10  ;;  %v537_v27 = vsel %vm412_vm3, %v370_v38, 0 }
 0x1aa   :  { %v1548_v52 = vadd.f32 %v1547_v62, %v1249_v63  ;;  %924 = vmatmul.f32.gmra.mxu0 %v6251_v36  ;;  %1315 = vmatmul.f32.gmra.mxu1 %v6222_v30  ;;  %v6276_v62 = vand.u32 4294901760, %v534_v3  ;;  %v6281_v30 = vand.u32 4294901760, %v6260_v1 }
 0x1ac   :  { %v6262_v61 = vadd.f32 %v1908_v18, %v1548_v52  ;;  %1631 = vmatmul.f32.gmra.mxu2 %v6233_v5  ;;  %8329 = vst [vmem:[#allocation158_spill] sm:$0xff] %v6276_v62  ;;  %v6278_v5 = vand.u32 4294901760, %v930_v47  ;;  %v938_v47 = vsub.f32 %v6260_v1, %v6281_v30 }
 0x1ad   :  { %8331 = vst [vmem:[#allocation160_spill] sm:$0xff] %v6281_v30 }
 0x1ae   :  { %8328 = vst [vmem:[#allocation157_spill] sm:$0xff] %v6262_v61  ;;  %2009 = vmatmul.f32.gmra.mxu3 %v6254_v33  ;;  %v6287_v33 = vsub.f32 %v534_v3, %v6276_v62  ;;  %v222_v3 = vpop.permute.xlu0 %221 }
 0x1af   :  { %v805_v52 = vpop.f32.mrf.mxu0  ;;  %v1256_v18 = vpop.f32.mrf.mxu1  ;;  %8330 = vst [vmem:[#allocation159_spill] sm:$0xff] %v6278_v5  ;;  %v371_v38 = vmax.f32 %v5814_v56, %v222_v3 }
 0x1b0   :  { %v1253_v60 = vadd.f32 %v1252_v0, %v805_v52  ;;  %v1552_v63 = vpop.f32.mrf.mxu2  ;;  %8332 = vst [vmem:[#allocation161_spill] sm:$0xff] %v6287_v33  ;;  %v6297_v52 = vld [vmem:[%s7873_s0 + $0x1c0] sm:$0xff] }
 0x1b1   :  { %v1914_v61 = vpop.f32.mrf.mxu3  ;;  %249 = vrot.lane.b32.xlu2 %v6297_v52, %s5024_s10  ;;  %v540_v56 = vsel %vm412_vm3, %v371_v38, 0 }
 0x1b2   :  { %v1553_v36 = vadd.f32 %v1552_v63, %v1253_v60  ;;  %932 = vmatmul.f32.gmra.mxu0 %v6278_v5  ;;  %1319 = vmatmul.f32.gmra.mxu1 %v6249_v2  ;;  %v6303_v63 = vand.u32 4294901760, %v537_v27  ;;  %v6308_v2 = vand.u32 4294901760, %v6287_v33 }
 0x1b4   :  { %v6289_v0 = vadd.f32 %v1914_v61, %v1553_v36  ;;  %1636 = vmatmul.f32.gmra.mxu2 %v6260_v1  ;;  %8334 = vst [vmem:[#allocation163_spill] sm:$0xff] %v6303_v63  ;;  %v6305_v1 = vand.u32 4294901760, %v938_v47  ;;  %v946_v47 = vsub.f32 %v6287_v33, %v6308_v2 }
 0x1b5   :  { %8336 = vst [vmem:[#allocation165_spill] sm:$0xff] %v6308_v2 }
 0x1b6   :  { %8333 = vst [vmem:[#allocation162_spill] sm:$0xff] %v6289_v0  ;;  %2015 = vmatmul.f32.gmra.mxu3 %v6281_v30  ;;  %v6314_v30 = vsub.f32 %v537_v27, %v6303_v63  ;;  %v224_v27 = vpop.permute.xlu1 %223 }
 0x1b7   :  { %v813_v36 = vpop.f32.mrf.mxu0  ;;  %v1260_v61 = vpop.f32.mrf.mxu1  ;;  %8335 = vst [vmem:[#allocation164_spill] sm:$0xff] %v6305_v1  ;;  %v372_v38 = vmax.f32 %v5841_v32, %v224_v27 }
 0x1b8   :  { %v1257_v37 = vadd.f32 %v1256_v18, %v813_v36  ;;  %v1557_v60 = vpop.f32.mrf.mxu2  ;;  %8337 = vst [vmem:[#allocation166_spill] sm:$0xff] %v6314_v30  ;;  %v6324_v36 = vld [vmem:[%s7873_s0 + $0x1e0] sm:$0xff] }
 0x1b9   :  { %v1920_v0 = vpop.f32.mrf.mxu3  ;;  %257 = vrot.lane.b32.xlu0 %v6324_v36, %s5024_s10  ;;  %v543_v32 = vsel %vm412_vm3, %v372_v38, 0 }
 0x1ba   :  { %v1558_v5 = vadd.f32 %v1557_v60, %v1257_v37  ;;  %940 = vmatmul.f32.gmra.mxu0 %v6305_v1  ;;  %1323 = vmatmul.f32.gmra.mxu1 %v6276_v62  ;;  %v6330_v60 = vand.u32 4294901760, %v540_v56  ;;  %v6335_v62 = vand.u32 4294901760, %v6314_v30 }
 0x1bc   :  { %v6316_v18 = vadd.f32 %v1920_v0, %v1558_v5  ;;  %1641 = vmatmul.f32.gmra.mxu2 %v6287_v33  ;;  %8339 = vst [vmem:[#allocation168_spill] sm:$0xff] %v6330_v60  ;;  %v6332_v33 = vand.u32 4294901760, %v946_v47  ;;  %v954_v47 = vsub.f32 %v6314_v30, %v6335_v62 }
 0x1bd   :  { %8341 = vst [vmem:[#allocation170_spill] sm:$0xff] %v6335_v62 }
 0x1be   :  { %8338 = vst [vmem:[#allocation167_spill] sm:$0xff] %v6316_v18  ;;  %2021 = vmatmul.f32.gmra.mxu3 %v6308_v2  ;;  %v6341_v2 = vsub.f32 %v540_v56, %v6330_v60  ;;  %v226_v56 = vpop.permute.xlu2 %225 }
 0x1bf   :  { %v821_v5 = vpop.f32.mrf.mxu0  ;;  %v1264_v0 = vpop.f32.mrf.mxu1  ;;  %8340 = vst [vmem:[#allocation169_spill] sm:$0xff] %v6332_v33  ;;  %v373_v38 = vmax.f32 %v5949_v34, %v226_v56 }
 0x1c0   :  { %v1261_v3 = vadd.f32 %v1260_v61, %v821_v5  ;;  %v1562_v37 = vpop.f32.mrf.mxu2  ;;  %8342 = vst [vmem:[#allocation171_spill] sm:$0xff] %v6341_v2  ;;  %v6351_v5 = vld [vmem:[%s7873_s0 + $0x1e8] sm:$0xff] }
 0x1c1   :  { %v1926_v18 = vpop.f32.mrf.mxu3  ;;  %259 = vrot.lane.b32.xlu1 %v6351_v5, %s5024_s10  ;;  %v546_v34 = vsel %vm412_vm3, %v373_v38, 0 }
 0x1c2   :  { %v1563_v1 = vadd.f32 %v1562_v37, %v1261_v3  ;;  %948 = vmatmul.f32.gmra.mxu0 %v6332_v33  ;;  %1327 = vmatmul.f32.gmra.mxu1 %v6303_v63  ;;  %v6357_v37 = vand.u32 4294901760, %v543_v32  ;;  %v6362_v63 = vand.u32 4294901760, %v6341_v2 }
 0x1c4   :  { %v6343_v61 = vadd.f32 %v1926_v18, %v1563_v1  ;;  %1646 = vmatmul.f32.gmra.mxu2 %v6314_v30  ;;  %8344 = vst [vmem:[#allocation173_spill] sm:$0xff] %v6357_v37  ;;  %v6359_v30 = vand.u32 4294901760, %v954_v47  ;;  %v962_v47 = vsub.f32 %v6341_v2, %v6362_v63 }
 0x1c5   :  { %8346 = vst [vmem:[#allocation175_spill] sm:$0xff] %v6362_v63 }
 0x1c6   :  { %8343 = vst [vmem:[#allocation172_spill] sm:$0xff] %v6343_v61  ;;  %2027 = vmatmul.f32.gmra.mxu3 %v6335_v62  ;;  %v6368_v62 = vsub.f32 %v543_v32, %v6357_v37  ;;  %v228_v32 = vpop.permute.xlu0 %227 }
 0x1c7   :  { %v829_v1 = vpop.f32.mrf.mxu0  ;;  %v1268_v18 = vpop.f32.mrf.mxu1  ;;  %8345 = vst [vmem:[#allocation174_spill] sm:$0xff] %v6359_v30  ;;  %v374_v38 = vmax.f32 %v5895_v40, %v228_v32 }
 0x1c8   :  { %v1265_v27 = vadd.f32 %v1264_v0, %v829_v1  ;;  %v1567_v3 = vpop.f32.mrf.mxu2  ;;  %8347 = vst [vmem:[#allocation176_spill] sm:$0xff] %v6368_v62  ;;  %v6378_v1 = vld [vmem:[%s7873_s0 + $0x1d8] sm:$0xff] }
 0x1c9   :  { %v1932_v61 = vpop.f32.mrf.mxu3  ;;  %255 = vrot.lane.b32.xlu2 %v6378_v1, %s5024_s10  ;;  %v549_v40 = vsel %vm412_vm3, %v374_v38, 0 }
 0x1ca   :  { %v1568_v33 = vadd.f32 %v1567_v3, %v1265_v27  ;;  %956 = vmatmul.f32.gmra.mxu0 %v6359_v30  ;;  %1331 = vmatmul.f32.gmra.mxu1 %v6330_v60  ;;  %v6384_v3 = vand.u32 4294901760, %v546_v34  ;;  %v6389_v60 = vand.u32 4294901760, %v6368_v62 }
 0x1cc   :  { %v6370_v0 = vadd.f32 %v1932_v61, %v1568_v33  ;;  %1651 = vmatmul.f32.gmra.mxu2 %v6341_v2  ;;  %8349 = vst [vmem:[#allocation178_spill] sm:$0xff] %v6384_v3  ;;  %v6386_v2 = vand.u32 4294901760, %v962_v47  ;;  %v970_v47 = vsub.f32 %v6368_v62, %v6389_v60 }
 0x1cd   :  { %8351 = vst [vmem:[#allocation180_spill] sm:$0xff] %v6389_v60 }
 0x1ce   :  { %8348 = vst [vmem:[#allocation177_spill] sm:$0xff] %v6370_v0  ;;  %2033 = vmatmul.f32.gmra.mxu3 %v6362_v63  ;;  %v6395_v63 = vsub.f32 %v546_v34, %v6384_v3  ;;  %v230_v34 = vpop.permute.xlu1 %229 }
 0x1cf   :  { %v837_v33 = vpop.f32.mrf.mxu0  ;;  %v1272_v61 = vpop.f32.mrf.mxu1  ;;  %8350 = vst [vmem:[#allocation179_spill] sm:$0xff] %v6386_v2  ;;  %v375_v38 = vmax.f32 %v5922_v28, %v230_v34 }
 0x1d0   :  { %v1269_v56 = vadd.f32 %v1268_v18, %v837_v33  ;;  %v1572_v27 = vpop.f32.mrf.mxu2  ;;  %8352 = vst [vmem:[#allocation181_spill] sm:$0xff] %v6395_v63  ;;  %v6405_v33 = vld [vmem:[%s7873_s0 + $0x1f8] sm:$0xff]  ;;  %v232_v28 = vpop.permute.xlu2 %231 }
 0x1d1   :  { %v1938_v0 = vpop.f32.mrf.mxu3  ;;  %263 = vrot.lane.b32.xlu0 %v6405_v33, %s5024_s10 }
 0x1d2   :  { %v1573_v30 = vadd.f32 %v1572_v27, %v1269_v56  ;;  %964 = vmatmul.f32.gmra.mxu0 %v6386_v2  ;;  %1335 = vmatmul.f32.gmra.mxu1 %v6357_v37  ;;  %v6411_v27 = vand.u32 4294901760, %v549_v40  ;;  %v6416_v37 = vand.u32 4294901760, %v6395_v63 }
 0x1d4   :  { %v6397_v18 = vadd.f32 %v1938_v0, %v1573_v30  ;;  %1656 = vmatmul.f32.gmra.mxu2 %v6368_v62  ;;  %8354 = vst [vmem:[#allocation183_spill] sm:$0xff] %v6411_v27  ;;  %v6413_v62 = vand.u32 4294901760, %v970_v47  ;;  %v978_v47 = vsub.f32 %v6395_v63, %v6416_v37 }
 0x1d5   :  { %8356 = vst [vmem:[#allocation185_spill] sm:$0xff] %v6416_v37 }
 0x1d6   :  { %8353 = vst [vmem:[#allocation182_spill] sm:$0xff] %v6397_v18  ;;  %2039 = vmatmul.f32.gmra.mxu3 %v6389_v60  ;;  %v6422_v60 = vsub.f32 %v549_v40, %v6411_v27  ;;  %v6433_v40 = vand.u32 4294901760, %v978_v47 }
 0x1d7   :  { %v845_v30 = vpop.f32.mrf.mxu0  ;;  %v1276_v0 = vpop.f32.mrf.mxu1  ;;  %8355 = vst [vmem:[#allocation184_spill] sm:$0xff] %v6413_v62 }
 0x1d8   :  { %v1273_v32 = vadd.f32 %v1272_v61, %v845_v30  ;;  %v1577_v56 = vpop.f32.mrf.mxu2  ;;  %8357 = vst [vmem:[#allocation186_spill] sm:$0xff] %v6422_v60  ;;  %v552_v30 = vsel %vm412_vm3, %v375_v38, 0 }
 0x1d9   :  { %v1944_v18 = vpop.f32.mrf.mxu3 }
 0x1da   :  { %v1578_v2 = vadd.f32 %v1577_v56, %v1273_v32  ;;  %972 = vmatmul.f32.gmra.mxu0 %v6413_v62  ;;  %1339 = vmatmul.f32.gmra.mxu1 %v6384_v3  ;;  %v6431_v3 = vand.u32 4294901760, %v552_v30 }
 0x1dc   :  { %v6424_v61 = vadd.f32 %v1944_v18, %v1578_v2  ;;  %1661 = vmatmul.f32.gmra.mxu2 %v6395_v63  ;;  %8359 = vst [vmem:[#allocation188_spill] sm:$0xff] %v6431_v3  ;;  %v6436_v2 = vand.u32 4294901760, %v6422_v60  ;;  %v6442_v38 = vsub.f32 %v552_v30, %v6431_v3 }
 0x1de   :  { %8358 = vst [vmem:[#allocation187_spill] sm:$0xff] %v6424_v61  ;;  %2045 = vmatmul.f32.gmra.mxu3 %v6416_v37  ;;  %v376_v61 = vmax.f32 %v6046_v21, %v232_v28  ;;  %v986_v47 = vsub.f32 %v6422_v60, %v6436_v2  ;;  %v6463_v37 = vand.u32 4294901760, %v6442_v38 }
 0x1df   :  { %v853_v34 = vpop.f32.mrf.mxu0  ;;  %v1280_v32 = vpop.f32.mrf.mxu1  ;;  %8360 = vst [vmem:[#allocation189_spill] sm:$0xff] %v6436_v2 }
 0x1e0   :  { %v1277_v56 = vadd.f32 %v1276_v0, %v853_v34  ;;  %v1582_v62 = vpop.f32.mrf.mxu2  ;;  %8361 = vst [vmem:[#allocation190_spill] sm:$0xff] %v6442_v38  ;;  %v6452_v34 = vld [vmem:[%s7873_s0 + $0x1f0] sm:$0xff]  ;;  %v555_v21 = vsel %vm412_vm3, %v376_v61, 0  ;;  %s5027_s0 = smov [#allocation2]  }
 0x1e1   :  { %v1950_v18 = vpop.f32.mrf.mxu3  ;;  %261 = vrot.lane.b32.xlu2 %v6452_v34, %s5024_s10  ;;  %8365 = vst [vmem:[#allocation194_spill] sm:$0xff] %v6463_v37  ;;  %s4962_s10 = sshll.u32 %s5027_s0, 4  ;;  %s4963_s10 = int_to_ptr.vmem [resolvable:$true] %s4962_s10 }
 0x1e2   :  { %v1583_v63 = vadd.f32 %v1582_v62, %v1277_v56  ;;  %980 = vmatmul.f32.gmra.mxu0 %v6433_v40  ;;  %1343 = vmatmul.f32.gmra.mxu1 %v6411_v27  ;;  %v234_v62 = vpop.permute.xlu0 %233 }
 0x1e3   :  { %v377_v61 = vmax.f32 %v5976_v48, %v234_v62  ;;  %v236_v48 = vpop.permute.xlu1 %235 }
 0x1e4   :  { %v6444_v0 = vadd.f32 %v1950_v18, %v1583_v63  ;;  %1666 = vmatmul.f32.gmra.mxu2 %v6422_v60  ;;  %v6458_v18 = vand.u32 4294901760, %v555_v21  ;;  %v6460_v60 = vand.u32 4294901760, %v986_v47  ;;  %v994_v47 = vsub.f32 %v6442_v38, %v6463_v37 }
 0x1e6   :  { %8362 = vst [vmem:[#allocation191_spill] sm:$0xff] %v6444_v0  ;;  %2051 = vmatmul.f32.gmra.mxu3 %v6436_v2  ;;  %v6469_v2 = vsub.f32 %v555_v21, %v6458_v18  ;;  %v6480_v21 = vand.u32 4294901760, %v994_v47 }
 0x1e7   :  { %v861_v63 = vpop.f32.mrf.mxu0  ;;  %v1284_v30 = vpop.f32.mrf.mxu1  ;;  %8363 = vst [vmem:[#allocation192_spill] sm:$0xff] %v6458_v18 }
 0x1e8   :  { %v1281_v28 = vadd.f32 %v1280_v32, %v861_v63  ;;  %v1587_v56 = vpop.f32.mrf.mxu2  ;;  %8364 = vst [vmem:[#allocation193_spill] sm:$0xff] %v6460_v60  ;;  %v558_v63 = vsel %vm412_vm3, %v377_v61, 0 }
 0x1e9   :  { %v1956_v27 = vpop.f32.mrf.mxu3  ;;  %8366 = vst [vmem:[#allocation195_spill] sm:$0xff] %v6469_v2 }
 0x1ea   :  { %v1588_v0 = vadd.f32 %v1587_v56, %v1281_v28  ;;  %988 = vmatmul.f32.gmra.mxu0 %v6460_v60  ;;  %1347 = vmatmul.f32.gmra.mxu1 %v6431_v3  ;;  %v6478_v3 = vand.u32 4294901760, %v558_v63 }
 0x1ec   :  { %v6471_v32 = vadd.f32 %v1956_v27, %v1588_v0  ;;  %1671 = vmatmul.f32.gmra.mxu2 %v6442_v38  ;;  %8368 = vst [vmem:[#allocation197_spill] sm:$0xff] %v6478_v3  ;;  %v6483_v27 = vand.u32 4294901760, %v6469_v2  ;;  %v6489_v61 = vsub.f32 %v558_v63, %v6478_v3 }
 0x1ee   :  { %8367 = vst [vmem:[#allocation196_spill] sm:$0xff] %v6471_v32  ;;  %2057 = vmatmul.f32.gmra.mxu3 %v6463_v37  ;;  %v378_v32 = vmax.f32 %v6017_v7, %v236_v48  ;;  %v1002_v47 = vsub.f32 %v6469_v2, %v6483_v27  ;;  %v238_v7 = vpop.permute.xlu2 %237 }
 0x1ef   :  { %v869_v62 = vpop.f32.mrf.mxu0  ;;  %v1288_v28 = vpop.f32.mrf.mxu1  ;;  %8369 = vst [vmem:[#allocation198_spill] sm:$0xff] %v6483_v27 }
 0x1f0   :  { %v1285_v56 = vadd.f32 %v1284_v30, %v869_v62  ;;  %v1592_v60 = vpop.f32.mrf.mxu2  ;;  %8370 = vst [vmem:[#allocation199_spill] sm:$0xff] %v6489_v61  ;;  %v561_v62 = vsel %vm412_vm3, %v378_v32, 0  ;;  %v6500_v63 = vand.u32 4294901760, %v1002_v47 }
 0x1f1   :  { %v1962_v0 = vpop.f32.mrf.mxu3 }
 0x1f2   :  { %v1593_v38 = vadd.f32 %v1592_v60, %v1285_v56  ;;  %996 = vmatmul.f32.gmra.mxu0 %v6480_v21  ;;  %1351 = vmatmul.f32.gmra.mxu1 %v6458_v18  ;;  %v6498_v18 = vand.u32 4294901760, %v561_v62 }
 0x1f4   :  { %v6491_v30 = vadd.f32 %v1962_v0, %v1593_v38  ;;  %1676 = vmatmul.f32.gmra.mxu2 %v6469_v2  ;;  %8372 = vst [vmem:[#allocation201_spill] sm:$0xff] %v6498_v18  ;;  %v6503_v38 = vand.u32 4294901760, %v6489_v61  ;;  %v6509_v32 = vsub.f32 %v561_v62, %v6498_v18 }
 0x1f6   :  { %8371 = vst [vmem:[#allocation200_spill] sm:$0xff] %v6491_v30  ;;  %2063 = vmatmul.f32.gmra.mxu3 %v6483_v27  ;;  %v379_v30 = vmax.f32 %v6135_v23, %v238_v7  ;;  %v1010_v47 = vsub.f32 %v6489_v61, %v6503_v38  ;;  %v240_v23 = vpop.permute.xlu0 %239 }
 0x1f7   :  { %v877_v60 = vpop.f32.mrf.mxu0  ;;  %v1292_v48 = vpop.f32.mrf.mxu1  ;;  %8373 = vst [vmem:[#allocation202_spill] sm:$0xff] %v6503_v38 }
 0x1f8   :  { %v1289_v56 = vadd.f32 %v1288_v28, %v877_v60  ;;  %v1597_v37 = vpop.f32.mrf.mxu2  ;;  %8374 = vst [vmem:[#allocation203_spill] sm:$0xff] %v6509_v32  ;;  %v564_v60 = vsel %vm412_vm3, %v379_v30, 0  ;;  %v6520_v62 = vand.u32 4294901760, %v1010_v47 }
 0x1f9   :  { %v1968_v0 = vpop.f32.mrf.mxu3 }
 0x1fa   :  { %v1598_v2 = vadd.f32 %v1597_v37, %v1289_v56  ;;  %1004 = vmatmul.f32.gmra.mxu0 %v6500_v63  ;;  %1355 = vmatmul.f32.gmra.mxu1 %v6478_v3  ;;  %v6518_v3 = vand.u32 4294901760, %v564_v60 }
 0x1fc   :  { %v6511_v28 = vadd.f32 %v1968_v0, %v1598_v2  ;;  %1681 = vmatmul.f32.gmra.mxu2 %v6489_v61  ;;  %8376 = vst [vmem:[#allocation205_spill] sm:$0xff] %v6518_v3  ;;  %v6523_v2 = vand.u32 4294901760, %v6509_v32  ;;  %v6529_v30 = vsub.f32 %v564_v60, %v6518_v3 }
 0x1fe   :  { %8375 = vst [vmem:[#allocation204_spill] sm:$0xff] %v6511_v28  ;;  %2069 = vmatmul.f32.gmra.mxu3 %v6503_v38  ;;  %v380_v28 = vmax.f32 %v6081_v15, %v240_v23  ;;  %v1018_v47 = vsub.f32 %v6509_v32, %v6523_v2  ;;  %v242_v15 = vpop.permute.xlu1 %241 }
 0x1ff   :  { %v885_v37 = vpop.f32.mrf.mxu0  ;;  %v1296_v7 = vpop.f32.mrf.mxu1  ;;  %8377 = vst [vmem:[#allocation206_spill] sm:$0xff] %v6523_v2 }
 0x200   :  { %v1293_v56 = vadd.f32 %v1292_v48, %v885_v37  ;;  %v1602_v27 = vpop.f32.mrf.mxu2  ;;  %8378 = vst [vmem:[#allocation207_spill] sm:$0xff] %v6529_v30  ;;  %v567_v37 = vsel %vm412_vm3, %v380_v28, 0  ;;  %v6540_v60 = vand.u32 4294901760, %v1018_v47 }
 0x201   :  { %v1974_v0 = vpop.f32.mrf.mxu3 }
 0x202   :  { %v1603_v61 = vadd.f32 %v1602_v27, %v1293_v56  ;;  %1012 = vmatmul.f32.gmra.mxu0 %v6520_v62  ;;  %1359 = vmatmul.f32.gmra.mxu1 %v6498_v18  ;;  %v6538_v18 = vand.u32 4294901760, %v567_v37 }
 0x204   :  { %v6531_v48 = vadd.f32 %v1974_v0, %v1603_v61  ;;  %1686 = vmatmul.f32.gmra.mxu2 %v6509_v32  ;;  %8380 = vst [vmem:[#allocation209_spill] sm:$0xff] %v6538_v18  ;;  %v6543_v61 = vand.u32 4294901760, %v6529_v30  ;;  %v6549_v28 = vsub.f32 %v567_v37, %v6538_v18 }
 0x206   :  { %8379 = vst [vmem:[#allocation208_spill] sm:$0xff] %v6531_v48  ;;  %2075 = vmatmul.f32.gmra.mxu3 %v6523_v2  ;;  %v381_v48 = vmax.f32 %v6108_v35, %v242_v15  ;;  %v1026_v47 = vsub.f32 %v6529_v30, %v6543_v61  ;;  %v244_v35 = vpop.permute.xlu2 %243 }
 0x207   :  { %v893_v27 = vpop.f32.mrf.mxu0  ;;  %v1300_v23 = vpop.f32.mrf.mxu1  ;;  %8381 = vst [vmem:[#allocation210_spill] sm:$0xff] %v6543_v61 }
 0x208   :  { %v1297_v56 = vadd.f32 %v1296_v7, %v893_v27  ;;  %v1607_v38 = vpop.f32.mrf.mxu2  ;;  %8382 = vst [vmem:[#allocation211_spill] sm:$0xff] %v6549_v28  ;;  %v570_v27 = vsel %vm412_vm3, %v381_v48, 0  ;;  %v6560_v37 = vand.u32 4294901760, %v1026_v47 }
 0x209   :  { %v1980_v0 = vpop.f32.mrf.mxu3 }
 0x20a   :  { %v1608_v32 = vadd.f32 %v1607_v38, %v1297_v56  ;;  %1020 = vmatmul.f32.gmra.mxu0 %v6540_v60  ;;  %1363 = vmatmul.f32.gmra.mxu1 %v6518_v3  ;;  %v6558_v3 = vand.u32 4294901760, %v570_v27 }
 0x20c   :  { %v6551_v7 = vadd.f32 %v1980_v0, %v1608_v32  ;;  %1691 = vmatmul.f32.gmra.mxu2 %v6529_v30  ;;  %8384 = vst [vmem:[#allocation213_spill] sm:$0xff] %v6558_v3  ;;  %v6563_v32 = vand.u32 4294901760, %v6549_v28  ;;  %v6569_v48 = vsub.f32 %v570_v27, %v6558_v3 }
 0x20e   :  { %8383 = vst [vmem:[#allocation212_spill] sm:$0xff] %v6551_v7  ;;  %2081 = vmatmul.f32.gmra.mxu3 %v6543_v61  ;;  %v382_v7 = vmax.f32 %v6216_v12, %v244_v35  ;;  %v1034_v47 = vsub.f32 %v6549_v28, %v6563_v32  ;;  %v246_v12 = vpop.permute.xlu0 %245 }
 0x20f   :  { %v901_v38 = vpop.f32.mrf.mxu0  ;;  %v1304_v15 = vpop.f32.mrf.mxu1  ;;  %8385 = vst [vmem:[#allocation214_spill] sm:$0xff] %v6563_v32 }
 0x210   :  { %v1301_v56 = vadd.f32 %v1300_v23, %v901_v38  ;;  %v1612_v2 = vpop.f32.mrf.mxu2  ;;  %8386 = vst [vmem:[#allocation215_spill] sm:$0xff] %v6569_v48  ;;  %v573_v38 = vsel %vm412_vm3, %v382_v7, 0  ;;  %v6580_v27 = vand.u32 4294901760, %v1034_v47 }
 0x211   :  { %v1986_v0 = vpop.f32.mrf.mxu3 }
 0x212   :  { %v1613_v30 = vadd.f32 %v1612_v2, %v1301_v56  ;;  %1028 = vmatmul.f32.gmra.mxu0 %v6560_v37  ;;  %1367 = vmatmul.f32.gmra.mxu1 %v6538_v18  ;;  %v6578_v18 = vand.u32 4294901760, %v573_v38 }
 0x214   :  { %v6571_v23 = vadd.f32 %v1986_v0, %v1613_v30  ;;  %1696 = vmatmul.f32.gmra.mxu2 %v6549_v28  ;;  %8388 = vst [vmem:[#allocation217_spill] sm:$0xff] %v6578_v18  ;;  %v6583_v30 = vand.u32 4294901760, %v6569_v48  ;;  %v6589_v7 = vsub.f32 %v573_v38, %v6578_v18 }
 0x216   :  { %8387 = vst [vmem:[#allocation216_spill] sm:$0xff] %v6571_v23  ;;  %2087 = vmatmul.f32.gmra.mxu3 %v6563_v32  ;;  %v383_v23 = vmax.f32 %v6162_v43, %v246_v12  ;;  %v1042_v47 = vsub.f32 %v6569_v48, %v6583_v30  ;;  %v248_v43 = vpop.permute.xlu1 %247 }
 0x217   :  { %v909_v2 = vpop.f32.mrf.mxu0  ;;  %v1308_v35 = vpop.f32.mrf.mxu1  ;;  %8389 = vst [vmem:[#allocation218_spill] sm:$0xff] %v6583_v30 }
 0x218   :  { %v1305_v56 = vadd.f32 %v1304_v15, %v909_v2  ;;  %v1617_v61 = vpop.f32.mrf.mxu2  ;;  %8390 = vst [vmem:[#allocation219_spill] sm:$0xff] %v6589_v7  ;;  %v576_v2 = vsel %vm412_vm3, %v383_v23, 0  ;;  %v6600_v38 = vand.u32 4294901760, %v1042_v47 }
 0x219   :  { %v1992_v0 = vpop.f32.mrf.mxu3 }
 0x21a   :  { %v1618_v28 = vadd.f32 %v1617_v61, %v1305_v56  ;;  %1036 = vmatmul.f32.gmra.mxu0 %v6580_v27  ;;  %1371 = vmatmul.f32.gmra.mxu1 %v6558_v3  ;;  %v6598_v3 = vand.u32 4294901760, %v576_v2 }
 0x21c   :  { %v6591_v15 = vadd.f32 %v1992_v0, %v1618_v28  ;;  %1701 = vmatmul.f32.gmra.mxu2 %v6569_v48  ;;  %8392 = vst [vmem:[#allocation221_spill] sm:$0xff] %v6598_v3  ;;  %v6603_v28 = vand.u32 4294901760, %v6589_v7  ;;  %v6609_v23 = vsub.f32 %v576_v2, %v6598_v3 }
 0x21e   :  { %8391 = vst [vmem:[#allocation220_spill] sm:$0xff] %v6591_v15  ;;  %2093 = vmatmul.f32.gmra.mxu3 %v6583_v30  ;;  %v384_v15 = vmax.f32 %v6189_v17, %v248_v43  ;;  %v1050_v47 = vsub.f32 %v6589_v7, %v6603_v28  ;;  %v250_v17 = vpop.permute.xlu2 %249 }
 0x21f   :  { %v917_v61 = vpop.f32.mrf.mxu0  ;;  %v1312_v12 = vpop.f32.mrf.mxu1  ;;  %8393 = vst [vmem:[#allocation222_spill] sm:$0xff] %v6603_v28 }
 0x220   :  { %v1309_v56 = vadd.f32 %v1308_v35, %v917_v61  ;;  %v1622_v32 = vpop.f32.mrf.mxu2  ;;  %8394 = vst [vmem:[#allocation223_spill] sm:$0xff] %v6609_v23  ;;  %v579_v61 = vsel %vm412_vm3, %v384_v15, 0  ;;  %v6620_v2 = vand.u32 4294901760, %v1050_v47 }
 0x221   :  { %v1998_v0 = vpop.f32.mrf.mxu3 }
 0x222   :  { %v1623_v48 = vadd.f32 %v1622_v32, %v1309_v56  ;;  %1044 = vmatmul.f32.gmra.mxu0 %v6600_v38  ;;  %1375 = vmatmul.f32.gmra.mxu1 %v6578_v18  ;;  %v6618_v18 = vand.u32 4294901760, %v579_v61 }
 0x224   :  { %v6611_v35 = vadd.f32 %v1998_v0, %v1623_v48  ;;  %1706 = vmatmul.f32.gmra.mxu2 %v6589_v7  ;;  %8396 = vst [vmem:[#allocation225_spill] sm:$0xff] %v6618_v18  ;;  %v6623_v48 = vand.u32 4294901760, %v6609_v23  ;;  %v6629_v15 = vsub.f32 %v579_v61, %v6618_v18 }
 0x226   :  { %8395 = vst [vmem:[#allocation224_spill] sm:$0xff] %v6611_v35  ;;  %2099 = vmatmul.f32.gmra.mxu3 %v6603_v28  ;;  %v385_v35 = vmax.f32 %v6297_v52, %v250_v17  ;;  %v1058_v47 = vsub.f32 %v6609_v23, %v6623_v48  ;;  %v252_v52 = vpop.permute.xlu0 %251 }
 0x227   :  { %v925_v32 = vpop.f32.mrf.mxu0  ;;  %v1316_v43 = vpop.f32.mrf.mxu1  ;;  %8397 = vst [vmem:[#allocation226_spill] sm:$0xff] %v6623_v48 }
 0x228   :  { %v1313_v56 = vadd.f32 %v1312_v12, %v925_v32  ;;  %v1627_v30 = vpop.f32.mrf.mxu2  ;;  %8398 = vst [vmem:[#allocation227_spill] sm:$0xff] %v6629_v15  ;;  %v582_v32 = vsel %vm412_vm3, %v385_v35, 0  ;;  %v6640_v61 = vand.u32 4294901760, %v1058_v47 }
 0x229   :  { %v2004_v0 = vpop.f32.mrf.mxu3 }
 0x22a   :  { %v1628_v7 = vadd.f32 %v1627_v30, %v1313_v56  ;;  %1052 = vmatmul.f32.gmra.mxu0 %v6620_v2  ;;  %1379 = vmatmul.f32.gmra.mxu1 %v6598_v3  ;;  %v6638_v3 = vand.u32 4294901760, %v582_v32 }
 0x22c   :  { %v6631_v12 = vadd.f32 %v2004_v0, %v1628_v7  ;;  %1711 = vmatmul.f32.gmra.mxu2 %v6609_v23  ;;  %8400 = vst [vmem:[#allocation229_spill] sm:$0xff] %v6638_v3  ;;  %v6643_v7 = vand.u32 4294901760, %v6629_v15  ;;  %v6649_v35 = vsub.f32 %v582_v32, %v6638_v3 }
 0x22e   :  { %8399 = vst [vmem:[#allocation228_spill] sm:$0xff] %v6631_v12  ;;  %2105 = vmatmul.f32.gmra.mxu3 %v6623_v48  ;;  %v386_v12 = vmax.f32 %v6243_v44, %v252_v52  ;;  %v1066_v47 = vsub.f32 %v6629_v15, %v6643_v7  ;;  %v254_v44 = vpop.permute.xlu1 %253 }
 0x22f   :  { %v933_v30 = vpop.f32.mrf.mxu0  ;;  %v1320_v17 = vpop.f32.mrf.mxu1  ;;  %8401 = vst [vmem:[#allocation230_spill] sm:$0xff] %v6643_v7 }
 0x230   :  { %v1317_v56 = vadd.f32 %v1316_v43, %v933_v30  ;;  %v1632_v28 = vpop.f32.mrf.mxu2  ;;  %8402 = vst [vmem:[#allocation231_spill] sm:$0xff] %v6649_v35  ;;  %v585_v30 = vsel %vm412_vm3, %v386_v12, 0  ;;  %v6660_v32 = vand.u32 4294901760, %v1066_v47 }
 0x231   :  { %v2010_v0 = vpop.f32.mrf.mxu3 }
 0x232   :  { %v1633_v23 = vadd.f32 %v1632_v28, %v1317_v56  ;;  %1060 = vmatmul.f32.gmra.mxu0 %v6640_v61  ;;  %1383 = vmatmul.f32.gmra.mxu1 %v6618_v18  ;;  %v6658_v18 = vand.u32 4294901760, %v585_v30 }
 0x234   :  { %v6651_v43 = vadd.f32 %v2010_v0, %v1633_v23  ;;  %1716 = vmatmul.f32.gmra.mxu2 %v6629_v15  ;;  %8404 = vst [vmem:[#allocation233_spill] sm:$0xff] %v6658_v18  ;;  %v6663_v23 = vand.u32 4294901760, %v6649_v35  ;;  %v6669_v12 = vsub.f32 %v585_v30, %v6658_v18 }
 0x236   :  { %8403 = vst [vmem:[#allocation232_spill] sm:$0xff] %v6651_v43  ;;  %2111 = vmatmul.f32.gmra.mxu3 %v6643_v7  ;;  %v387_v43 = vmax.f32 %v6270_v50, %v254_v44  ;;  %v1074_v47 = vsub.f32 %v6649_v35, %v6663_v23  ;;  %v256_v50 = vpop.permute.xlu2 %255 }
 0x237   :  { %v941_v28 = vpop.f32.mrf.mxu0  ;;  %v1324_v52 = vpop.f32.mrf.mxu1  ;;  %8405 = vst [vmem:[#allocation234_spill] sm:$0xff] %v6663_v23 }
 0x238   :  { %v1321_v56 = vadd.f32 %v1320_v17, %v941_v28  ;;  %v1637_v48 = vpop.f32.mrf.mxu2  ;;  %8406 = vst [vmem:[#allocation235_spill] sm:$0xff] %v6669_v12  ;;  %v588_v28 = vsel %vm412_vm3, %v387_v43, 0  ;;  %v6680_v30 = vand.u32 4294901760, %v1074_v47 }
 0x239   :  { %v2016_v0 = vpop.f32.mrf.mxu3 }
 0x23a   :  { %v1638_v15 = vadd.f32 %v1637_v48, %v1321_v56  ;;  %1068 = vmatmul.f32.gmra.mxu0 %v6660_v32  ;;  %1387 = vmatmul.f32.gmra.mxu1 %v6638_v3  ;;  %v6678_v3 = vand.u32 4294901760, %v588_v28 }
 0x23c   :  { %v6671_v17 = vadd.f32 %v2016_v0, %v1638_v15  ;;  %1721 = vmatmul.f32.gmra.mxu2 %v6649_v35  ;;  %8408 = vst [vmem:[#allocation237_spill] sm:$0xff] %v6678_v3  ;;  %v6683_v15 = vand.u32 4294901760, %v6669_v12  ;;  %v6689_v43 = vsub.f32 %v588_v28, %v6678_v3 }
 0x23e   :  { %8407 = vst [vmem:[#allocation236_spill] sm:$0xff] %v6671_v17  ;;  %2117 = vmatmul.f32.gmra.mxu3 %v6663_v23  ;;  %v388_v17 = vmax.f32 %v6378_v1, %v256_v50  ;;  %v1082_v47 = vsub.f32 %v6669_v12, %v6683_v15  ;;  %v258_v1 = vpop.permute.xlu0 %257 }
 0x23f   :  { %v949_v48 = vpop.f32.mrf.mxu0  ;;  %v1328_v44 = vpop.f32.mrf.mxu1  ;;  %8409 = vst [vmem:[#allocation238_spill] sm:$0xff] %v6683_v15 }
 0x240   :  { %v1325_v56 = vadd.f32 %v1324_v52, %v949_v48  ;;  %v1642_v7 = vpop.f32.mrf.mxu2  ;;  %8410 = vst [vmem:[#allocation239_spill] sm:$0xff] %v6689_v43  ;;  %v591_v48 = vsel %vm412_vm3, %v388_v17, 0  ;;  %v6700_v28 = vand.u32 4294901760, %v1082_v47 }
 0x241   :  { %v2022_v0 = vpop.f32.mrf.mxu3 }
 0x242   :  { %v1643_v35 = vadd.f32 %v1642_v7, %v1325_v56  ;;  %1076 = vmatmul.f32.gmra.mxu0 %v6680_v30  ;;  %1391 = vmatmul.f32.gmra.mxu1 %v6658_v18  ;;  %v6698_v18 = vand.u32 4294901760, %v591_v48 }
 0x244   :  { %v6691_v52 = vadd.f32 %v2022_v0, %v1643_v35  ;;  %1726 = vmatmul.f32.gmra.mxu2 %v6669_v12  ;;  %8412 = vst [vmem:[#allocation241_spill] sm:$0xff] %v6698_v18  ;;  %v6703_v35 = vand.u32 4294901760, %v6689_v43  ;;  %v6709_v17 = vsub.f32 %v591_v48, %v6698_v18 }
 0x246   :  { %8411 = vst [vmem:[#allocation240_spill] sm:$0xff] %v6691_v52  ;;  %2123 = vmatmul.f32.gmra.mxu3 %v6683_v15  ;;  %v389_v52 = vmax.f32 %v6324_v36, %v258_v1  ;;  %v1090_v47 = vsub.f32 %v6689_v43, %v6703_v35  ;;  %v260_v36 = vpop.permute.xlu1 %259 }
 0x247   :  { %v957_v7 = vpop.f32.mrf.mxu0  ;;  %v1332_v50 = vpop.f32.mrf.mxu1  ;;  %8413 = vst [vmem:[#allocation242_spill] sm:$0xff] %v6703_v35 }
 0x248   :  { %v1329_v56 = vadd.f32 %v1328_v44, %v957_v7  ;;  %v1647_v23 = vpop.f32.mrf.mxu2  ;;  %8414 = vst [vmem:[#allocation243_spill] sm:$0xff] %v6709_v17  ;;  %v594_v7 = vsel %vm412_vm3, %v389_v52, 0  ;;  %v6720_v48 = vand.u32 4294901760, %v1090_v47 }
 0x249   :  { %v2028_v0 = vpop.f32.mrf.mxu3 }
 0x24a   :  { %v1648_v12 = vadd.f32 %v1647_v23, %v1329_v56  ;;  %1084 = vmatmul.f32.gmra.mxu0 %v6700_v28  ;;  %1395 = vmatmul.f32.gmra.mxu1 %v6678_v3  ;;  %v6718_v3 = vand.u32 4294901760, %v594_v7 }
 0x24c   :  { %v6711_v44 = vadd.f32 %v2028_v0, %v1648_v12  ;;  %1731 = vmatmul.f32.gmra.mxu2 %v6689_v43  ;;  %8416 = vst [vmem:[#allocation245_spill] sm:$0xff] %v6718_v3  ;;  %v6723_v12 = vand.u32 4294901760, %v6709_v17  ;;  %v6729_v52 = vsub.f32 %v594_v7, %v6718_v3 }
 0x24e   :  { %8415 = vst [vmem:[#allocation244_spill] sm:$0xff] %v6711_v44  ;;  %2129 = vmatmul.f32.gmra.mxu3 %v6703_v35  ;;  %v390_v44 = vmax.f32 %v6351_v5, %v260_v36  ;;  %v1098_v47 = vsub.f32 %v6709_v17, %v6723_v12  ;;  %v262_v5 = vpop.permute.xlu2 %261 }
 0x24f   :  { %v965_v23 = vpop.f32.mrf.mxu0  ;;  %v1336_v1 = vpop.f32.mrf.mxu1  ;;  %8417 = vst [vmem:[#allocation246_spill] sm:$0xff] %v6723_v12 }
 0x250   :  { %v1333_v56 = vadd.f32 %v1332_v50, %v965_v23  ;;  %v1652_v15 = vpop.f32.mrf.mxu2  ;;  %8418 = vst [vmem:[#allocation247_spill] sm:$0xff] %v6729_v52  ;;  %v597_v23 = vsel %vm412_vm3, %v390_v44, 0  ;;  %v6740_v7 = vand.u32 4294901760, %v1098_v47 }
 0x251   :  { %v2034_v0 = vpop.f32.mrf.mxu3 }
 0x252   :  { %v1653_v43 = vadd.f32 %v1652_v15, %v1333_v56  ;;  %1092 = vmatmul.f32.gmra.mxu0 %v6720_v48  ;;  %1399 = vmatmul.f32.gmra.mxu1 %v6698_v18  ;;  %v6738_v18 = vand.u32 4294901760, %v597_v23 }
 0x254   :  { %v6731_v50 = vadd.f32 %v2034_v0, %v1653_v43  ;;  %1736 = vmatmul.f32.gmra.mxu2 %v6709_v17  ;;  %8420 = vst [vmem:[#allocation249_spill] sm:$0xff] %v6738_v18  ;;  %v6743_v43 = vand.u32 4294901760, %v6729_v52  ;;  %v6749_v44 = vsub.f32 %v597_v23, %v6738_v18 }
 0x256   :  { %8419 = vst [vmem:[#allocation248_spill] sm:$0xff] %v6731_v50  ;;  %2135 = vmatmul.f32.gmra.mxu3 %v6723_v12  ;;  %v391_v50 = vmax.f32 %v6452_v34, %v262_v5  ;;  %v1106_v47 = vsub.f32 %v6729_v52, %v6743_v43  ;;  %v264_v34 = vpop.permute.xlu0 %263 }
 0x257   :  { %v973_v15 = vpop.f32.mrf.mxu0  ;;  %v1340_v36 = vpop.f32.mrf.mxu1  ;;  %8421 = vst [vmem:[#allocation250_spill] sm:$0xff] %v6743_v43 }
 0x258   :  { %v1337_v56 = vadd.f32 %v1336_v1, %v973_v15  ;;  %v1657_v35 = vpop.f32.mrf.mxu2  ;;  %8422 = vst [vmem:[#allocation251_spill] sm:$0xff] %v6749_v44  ;;  %v600_v15 = vsel %vm412_vm3, %v391_v50, 0  ;;  %v6760_v23 = vand.u32 4294901760, %v1106_v47 }
 0x259   :  { %v2040_v0 = vpop.f32.mrf.mxu3 }
 0x25a   :  { %v1658_v17 = vadd.f32 %v1657_v35, %v1337_v56  ;;  %1100 = vmatmul.f32.gmra.mxu0 %v6740_v7  ;;  %1403 = vmatmul.f32.gmra.mxu1 %v6718_v3  ;;  %v6758_v3 = vand.u32 4294901760, %v600_v15 }
 0x25c   :  { %v6751_v1 = vadd.f32 %v2040_v0, %v1658_v17  ;;  %1741 = vmatmul.f32.gmra.mxu2 %v6729_v52  ;;  %8424 = vst [vmem:[#allocation253_spill] sm:$0xff] %v6758_v3  ;;  %v6763_v17 = vand.u32 4294901760, %v6749_v44  ;;  %v6769_v50 = vsub.f32 %v600_v15, %v6758_v3 }
 0x25e   :  { %8423 = vst [vmem:[#allocation252_spill] sm:$0xff] %v6751_v1  ;;  %2141 = vmatmul.f32.gmra.mxu3 %v6743_v43  ;;  %v392_v1 = vmax.f32 %v6405_v33, %v264_v34  ;;  %v1114_v47 = vsub.f32 %v6749_v44, %v6763_v17 }
 0x25f   :  { %v981_v35 = vpop.f32.mrf.mxu0  ;;  %v1344_v5 = vpop.f32.mrf.mxu1  ;;  %8425 = vst [vmem:[#allocation254_spill] sm:$0xff] %v6763_v17 }
 0x260   :  { %v1341_v56 = vadd.f32 %v1340_v36, %v981_v35  ;;  %v1662_v12 = vpop.f32.mrf.mxu2  ;;  %8426 = vst [vmem:[#allocation255_spill] sm:$0xff] %v6769_v50  ;;  %v603_v35 = vsel %vm412_vm3, %v392_v1, 0 }
 0x261   :  { %v2046_v0 = vpop.f32.mrf.mxu3  ;;  %v6778_v43 = vand.u32 4294901760, %v603_v35 }
 0x262   :  { %v1663_v52 = vadd.f32 %v1662_v12, %v1341_v56  ;;  %1108 = vmatmul.f32.gmra.mxu0 %v6760_v23  ;;  %1407 = vmatmul.f32.gmra.mxu1 %v6738_v18  ;;  %v6780_v18 = vand.u32 4294901760, %v1114_v47 }
 0x263   :  { %8427 = vst [vmem:[#allocation256_spill] sm:$0xff] %v6778_v43  ;;  %v6788_v1 = vsub.f32 %v603_v35, %v6778_v43 }
 0x264   :  { %v6771_v36 = vadd.f32 %v2046_v0, %v1663_v52  ;;  %1746 = vmatmul.f32.gmra.mxu2 %v6749_v44  ;;  %8428 = vst [vmem:[#allocation257_spill] sm:$0xff] %v6780_v18  ;;  %v6783_v52 = vand.u32 4294901760, %v6769_v50 }
 0x265   :  { %8430 = vst [vmem:[#allocation259_spill] sm:$0xff] %v6788_v1 }
 0x266   :  { %2147 = vmatmul.f32.gmra.mxu3 %v6763_v17  ;;  %8429 = vst [vmem:[#allocation258_spill] sm:$0xff] %v6783_v52 }
 0x267   :  { %v989_v33 = vpop.f32.mrf.mxu0  ;;  %v1348_v12 = vpop.f32.mrf.mxu1 }
 0x268   :  { %v1345_v34 = vadd.f32 %v1344_v5, %v989_v33  ;;  %v1667_v56 = vpop.f32.mrf.mxu2  ;;  %v1122_v5 = vsub.f32 %v6769_v50, %v6783_v52 }
 0x269   :  { %v2052_v15 = vpop.f32.mrf.mxu3 }
 0x26a   :  { %v1668_v0 = vadd.f32 %v1667_v56, %v1345_v34  ;;  %1116 = vmatmul.f32.gmra.mxu0 %v6780_v18  ;;  %1411 = vmatmul.f32.gmra.mxu1 %v6758_v3  ;;  %v6796_v56 = vand.u32 4294901760, %v1122_v5  ;;  %v6799_v3 = vand.u32 4294901760, %v6788_v1 }
 0x26c   :  { %v6790_v44 = vadd.f32 %v2052_v15, %v1668_v0  ;;  %1751 = vmatmul.f32.gmra.mxu2 %v6769_v50  ;;  %8431 = vst [vmem:[#allocation260_spill] sm:$0xff] %v6799_v3  ;;  %v1130_v0 = vsub.f32 %v6788_v1, %v6799_v3 }
 0x26e   :  { %2153 = vmatmul.f32.gmra.mxu3 %v6783_v52  ;;  %v6809_v52 = vand.u32 4294901760, %v1130_v0 }
 0x26f   :  { %v997_v47 = vpop.f32.mrf.mxu0  ;;  %v1352_v33 = vpop.f32.mrf.mxu1 }
 0x270   :  { %v1349_v17 = vadd.f32 %v1348_v12, %v997_v47  ;;  %v1672_v34 = vpop.f32.mrf.mxu2 }
 0x271   :  { %v2058_v35 = vpop.f32.mrf.mxu3 }
 0x272   :  { %v1673_v18 = vadd.f32 %v1672_v34, %v1349_v17  ;;  %1124 = vmatmul.f32.gmra.mxu0 %v6796_v56  ;;  %1415 = vmatmul.f32.gmra.mxu1 %v6778_v43 }
 0x274   :  { %v6803_v15 = vadd.f32 %v2058_v35, %v1673_v18  ;;  %1756 = vmatmul.f32.gmra.mxu2 %v6788_v1 }
 0x276   :  { %2159 = vmatmul.f32.gmra.mxu3 %v6799_v3 }
 0x277   :  { %v1005_v12 = vpop.f32.mrf.mxu0  ;;  %v1356_v5 = vpop.f32.mrf.mxu1 }
 0x278   :  { %v1353_v47 = vadd.f32 %v1352_v33, %v1005_v12  ;;  %v1677_v50 = vpop.f32.mrf.mxu2 }
 0x279   :  { %v2064_v17 = vpop.f32.mrf.mxu3 }
 0x27a   :  { %v1678_v34 = vadd.f32 %v1677_v50, %v1353_v47  ;;  %1132 = vmatmul.f32.gmra.mxu0 %v6809_v52  ;;  %2461 = vmatmul.f32.vlgmr.msrb.gmra.mxu1 %v5224_v46 }
 0x27c   :  { %v6813_v18 = vadd.f32 %v2064_v17, %v1678_v34  ;;  %2740 = vmatmul.f32.vlgmr.msrb.gmra.mxu2 %v5256_v59 }
 0x27e   :  { %8432 = vst [vmem:[#allocation261_spill] sm:$0xff] %v6813_v18  ;;  %3275 = vmatmul.f32.vlgmr.msrb.gmra.mxu3 %v5224_v46 }
 0x27f   :  { %v1013_v35 = vpop.f32.mrf.mxu0  ;;  %v1360_v1 = vpop.f32.mrf.mxu1 }
 0x280   :  { %v1357_v3 = vadd.f32 %v1356_v5, %v1013_v35  ;;  %v1682_v43 = vpop.f32.mrf.mxu2 }
 0x281   :  { %v2070_v33 = vpop.f32.mrf.mxu3 }
 0x282   :  { %v1683_v12 = vadd.f32 %v1682_v43, %v1357_v3  ;;  %2186 = vmatmul.f32.vlgmr.msrb.gmra.mxu0 %v5224_v46  ;;  %2465 = vmatmul.f32.gmra.mxu1 %v5252_v57 }
 0x284   :  { %v6819_v50 = vadd.f32 %v2070_v33, %v1683_v12  ;;  %2748 = vmatmul.f32.gmra.mxu2 %v5285_v16 }
 0x286   :  { %3279 = vmatmul.f32.gmra.mxu3 %v5252_v57 }
 0x287   :  { %v1021_v0 = vpop.f32.mrf.mxu0  ;;  %v1364_v59 = vpop.f32.mrf.mxu1 }
 0x288   :  { %v1361_v47 = vadd.f32 %v1360_v1, %v1021_v0  ;;  %v1687_v17 = vpop.f32.mrf.mxu2 }
 0x289   :  { %v2076_v34 = vpop.f32.mrf.mxu3 }
 0x28a   :  { %v1688_v18 = vadd.f32 %v1687_v17, %v1361_v47  ;;  %2190 = vmatmul.f32.gmra.mxu0 %v5252_v57  ;;  %2469 = vmatmul.f32.gmra.mxu1 %v5254_v58 }
 0x28c   :  { %v6825_v3 = vadd.f32 %v2076_v34, %v1688_v18  ;;  %2756 = vmatmul.f32.gmra.mxu2 %v5310_v26 }
 0x28e   :  { %3283 = vmatmul.f32.gmra.mxu3 %v5254_v58 }
 0x28f   :  { %v1029_v43 = vpop.f32.mrf.mxu0  ;;  %v1368_v16 = vpop.f32.mrf.mxu1 }
 0x290   :  { %v1365_v5 = vadd.f32 %v1364_v59, %v1029_v43  ;;  %v1692_v35 = vpop.f32.mrf.mxu2 }
 0x291   :  { %v2082_v33 = vpop.f32.mrf.mxu3 }
 0x292   :  { %v1693_v12 = vadd.f32 %v1692_v35, %v1365_v5  ;;  %2194 = vmatmul.f32.gmra.mxu0 %v5254_v58  ;;  %2473 = vmatmul.f32.gmra.mxu1 %v5283_v14 }
 0x294   :  { %v6831_v1 = vadd.f32 %v2082_v33, %v1693_v12  ;;  %2764 = vmatmul.f32.gmra.mxu2 %v5335_v42 }
 0x296   :  { %3287 = vmatmul.f32.gmra.mxu3 %v5283_v14 }
 0x297   :  { %v1037_v18 = vpop.f32.mrf.mxu0  ;;  %v1372_v26 = vpop.f32.mrf.mxu1 }
 0x298   :  { %v1369_v0 = vadd.f32 %v1368_v16, %v1037_v18  ;;  %v1697_v47 = vpop.f32.mrf.mxu2 }
 0x299   :  { %v2088_v17 = vpop.f32.mrf.mxu3 }
 0x29a   :  { %v1698_v34 = vadd.f32 %v1697_v47, %v1369_v0  ;;  %2198 = vmatmul.f32.gmra.mxu0 %v5283_v14  ;;  %2477 = vmatmul.f32.gmra.mxu1 %v5308_v25 }
 0x29c   :  { %v6837_v59 = vadd.f32 %v2088_v17, %v1698_v34  ;;  %2772 = vmatmul.f32.gmra.mxu2 %v5360_v55 }
 0x29e   :  { %3291 = vmatmul.f32.gmra.mxu3 %v5308_v25 }
 0x29f   :  { %v1045_v43 = vpop.f32.mrf.mxu0  ;;  %v1376_v42 = vpop.f32.mrf.mxu1 }
 0x2a0   :  { %v1373_v5 = vadd.f32 %v1372_v26, %v1045_v43  ;;  %v1702_v35 = vpop.f32.mrf.mxu2 }
 0x2a1   :  { %v2094_v33 = vpop.f32.mrf.mxu3 }
 0x2a2   :  { %v1703_v12 = vadd.f32 %v1702_v35, %v1373_v5  ;;  %2202 = vmatmul.f32.gmra.mxu0 %v5308_v25  ;;  %2481 = vmatmul.f32.gmra.mxu1 %v5333_v41 }
 0x2a4   :  { %v6843_v16 = vadd.f32 %v2094_v33, %v1703_v12  ;;  %2780 = vmatmul.f32.gmra.mxu2 %v5385_v24 }
 0x2a6   :  { %3295 = vmatmul.f32.gmra.mxu3 %v5333_v41 }
 0x2a7   :  { %v1053_v18 = vpop.f32.mrf.mxu0  ;;  %v1380_v55 = vpop.f32.mrf.mxu1 }
 0x2a8   :  { %v1377_v0 = vadd.f32 %v1376_v42, %v1053_v18  ;;  %v1707_v47 = vpop.f32.mrf.mxu2 }
 0x2a9   :  { %v2100_v17 = vpop.f32.mrf.mxu3 }
 0x2aa   :  { %v1708_v34 = vadd.f32 %v1707_v47, %v1377_v0  ;;  %2206 = vmatmul.f32.gmra.mxu0 %v5333_v41  ;;  %2485 = vmatmul.f32.gmra.mxu1 %v5358_v54 }
 0x2ac   :  { %v6849_v26 = vadd.f32 %v2100_v17, %v1708_v34  ;;  %2788 = vmatmul.f32.gmra.mxu2 %v5410_v53 }
 0x2ae   :  { %3299 = vmatmul.f32.gmra.mxu3 %v5358_v54 }
 0x2af   :  { %v1061_v43 = vpop.f32.mrf.mxu0  ;;  %v1384_v24 = vpop.f32.mrf.mxu1 }
 0x2b0   :  { %v1381_v5 = vadd.f32 %v1380_v55, %v1061_v43  ;;  %v1712_v35 = vpop.f32.mrf.mxu2 }
 0x2b1   :  { %v2106_v33 = vpop.f32.mrf.mxu3 }
 0x2b2   :  { %v1713_v12 = vadd.f32 %v1712_v35, %v1381_v5  ;;  %2210 = vmatmul.f32.gmra.mxu0 %v5358_v54  ;;  %2489 = vmatmul.f32.gmra.mxu1 %v5383_v22 }
 0x2b4   :  { %v6855_v42 = vadd.f32 %v2106_v33, %v1713_v12  ;;  %2796 = vmatmul.f32.gmra.mxu2 %v5435_v45 }
 0x2b6   :  { %3303 = vmatmul.f32.gmra.mxu3 %v5383_v22 }
 0x2b7   :  { %v1069_v18 = vpop.f32.mrf.mxu0  ;;  %v1388_v53 = vpop.f32.mrf.mxu1 }
 0x2b8   :  { %v1385_v0 = vadd.f32 %v1384_v24, %v1069_v18  ;;  %v1717_v47 = vpop.f32.mrf.mxu2 }
 0x2b9   :  { %v2112_v17 = vpop.f32.mrf.mxu3 }
 0x2ba   :  { %v1718_v34 = vadd.f32 %v1717_v47, %v1385_v0  ;;  %2214 = vmatmul.f32.gmra.mxu0 %v5383_v22  ;;  %2493 = vmatmul.f32.gmra.mxu1 %v5408_v49 }
 0x2bc   :  { %v6861_v55 = vadd.f32 %v2112_v17, %v1718_v34  ;;  %2804 = vmatmul.f32.gmra.mxu2 %v5460_v9 }
 0x2be   :  { %3307 = vmatmul.f32.gmra.mxu3 %v5408_v49 }
 0x2bf   :  { %v1077_v43 = vpop.f32.mrf.mxu0  ;;  %v1392_v45 = vpop.f32.mrf.mxu1 }
 0x2c0   :  { %v1389_v5 = vadd.f32 %v1388_v53, %v1077_v43  ;;  %v1722_v35 = vpop.f32.mrf.mxu2 }
 0x2c1   :  { %v2118_v33 = vpop.f32.mrf.mxu3 }
 0x2c2   :  { %v1723_v12 = vadd.f32 %v1722_v35, %v1389_v5  ;;  %2218 = vmatmul.f32.gmra.mxu0 %v5408_v49  ;;  %2497 = vmatmul.f32.gmra.mxu1 %v5433_v39 }
 0x2c4   :  { %v6867_v24 = vadd.f32 %v2118_v33, %v1723_v12  ;;  %2812 = vmatmul.f32.gmra.mxu2 %v5485_v10 }
 0x2c6   :  { %3311 = vmatmul.f32.gmra.mxu3 %v5433_v39 }
 0x2c7   :  { %v1085_v18 = vpop.f32.mrf.mxu0  ;;  %v1396_v9 = vpop.f32.mrf.mxu1 }
 0x2c8   :  { %v1393_v0 = vadd.f32 %v1392_v45, %v1085_v18  ;;  %v1727_v47 = vpop.f32.mrf.mxu2  ;;  %v8435_v18 = vld [vmem:[#allocation34_spill] sm:$0xff] }
 0x2c9   :  { %v2124_v17 = vpop.f32.mrf.mxu3 }
 0x2ca   :  { %v1728_v34 = vadd.f32 %v1727_v47, %v1393_v0  ;;  %2222 = vmatmul.f32.gmra.mxu0 %v5433_v39  ;;  %2501 = vmatmul.f32.gmra.mxu1 %v5458_v29 }
 0x2cc   :  { %v6873_v53 = vadd.f32 %v2124_v17, %v1728_v34  ;;  %2820 = vmatmul.f32.gmra.mxu2 %v5510_v11 }
 0x2ce   :  { %8433 = vst [vmem:[#allocation262_spill] sm:$0xff] %v6873_v53  ;;  %3315 = vmatmul.f32.gmra.mxu3 %v5458_v29 }
 0x2cf   :  { %v1093_v43 = vpop.f32.mrf.mxu0  ;;  %v1400_v10 = vpop.f32.mrf.mxu1 }
 0x2d0   :  { %v1397_v5 = vadd.f32 %v1396_v9, %v1093_v43  ;;  %v1732_v35 = vpop.f32.mrf.mxu2  ;;  %v8436_v9 = vld [vmem:[#allocation30_spill] sm:$0xff] }
 0x2d1   :  { %v2130_v33 = vpop.f32.mrf.mxu3 }
 0x2d2   :  { %v1733_v12 = vadd.f32 %v1732_v35, %v1397_v5  ;;  %2226 = vmatmul.f32.gmra.mxu0 %v5458_v29  ;;  %2505 = vmatmul.f32.gmra.mxu1 %v5483_v31  ;;  %v8438_v5 = vld [vmem:[#allocation38_spill] sm:$0xff] }
 0x2d4   :  { %v6879_v45 = vadd.f32 %v2130_v33, %v1733_v12  ;;  %2828 = vmatmul.f32.gmra.mxu2 %v8435_v18 }
 0x2d6   :  { %8434 = vst [vmem:[#allocation263_spill] sm:$0xff] %v6879_v45  ;;  %3319 = vmatmul.f32.gmra.mxu3 %v5483_v31 }
 0x2d7   :  { %v1101_v0 = vpop.f32.mrf.mxu0  ;;  %v1404_v11 = vpop.f32.mrf.mxu1 }
 0x2d8   :  { %v1401_v47 = vadd.f32 %v1400_v10, %v1101_v0  ;;  %v1737_v17 = vpop.f32.mrf.mxu2  ;;  %v8439_v10 = vld [vmem:[#allocation33_spill] sm:$0xff] }
 0x2d9   :  { %v2136_v34 = vpop.f32.mrf.mxu3 }
 0x2da   :  { %v1738_v53 = vadd.f32 %v1737_v17, %v1401_v47  ;;  %2230 = vmatmul.f32.gmra.mxu0 %v5483_v31  ;;  %2509 = vmatmul.f32.gmra.mxu1 %v8436_v9  ;;  %v8441_v47 = vld [vmem:[#allocation42_spill] sm:$0xff] }
 0x2dc   :  { %v6885_v43 = vadd.f32 %v2136_v34, %v1738_v53  ;;  %2836 = vmatmul.f32.gmra.mxu2 %v8438_v5 }
 0x2de   :  { %8437 = vst [vmem:[#allocation34_spill] sm:$0xff] %v6885_v43  ;;  %3323 = vmatmul.f32.gmra.mxu3 %v8436_v9 }
 0x2df   :  { %v1109_v35 = vpop.f32.mrf.mxu0  ;;  %v1408_v33 = vpop.f32.mrf.mxu1 }
 0x2e0   :  { %v1405_v12 = vadd.f32 %v1404_v11, %v1109_v35  ;;  %v1742_v18 = vpop.f32.mrf.mxu2  ;;  %v8442_v11 = vld [vmem:[#allocation37_spill] sm:$0xff] }
 0x2e1   :  { %v2142_v45 = vpop.f32.mrf.mxu3 }
 0x2e2   :  { %v1743_v29 = vadd.f32 %v1742_v18, %v1405_v12  ;;  %2234 = vmatmul.f32.gmra.mxu0 %v8436_v9  ;;  %2513 = vmatmul.f32.gmra.mxu1 %v8439_v10  ;;  %v8444_v12 = vld [vmem:[#allocation46_spill] sm:$0xff] }
 0x2e4   :  { %v6891_v0 = vadd.f32 %v2142_v45, %v1743_v29  ;;  %2844 = vmatmul.f32.gmra.mxu2 %v8441_v47 }
 0x2e6   :  { %8440 = vst [vmem:[#allocation38_spill] sm:$0xff] %v6891_v0  ;;  %3327 = vmatmul.f32.gmra.mxu3 %v8439_v10 }
 0x2e7   :  { %v1117_v53 = vpop.f32.mrf.mxu0  ;;  %v1412_v17 = vpop.f32.mrf.mxu1 }
 0x2e8   :  { %v1409_v34 = vadd.f32 %v1408_v33, %v1117_v53  ;;  %v1747_v5 = vpop.f32.mrf.mxu2  ;;  %v8445_v33 = vld [vmem:[#allocation41_spill] sm:$0xff] }
 0x2e9   :  { %v2148_v43 = vpop.f32.mrf.mxu3 }
 0x2ea   :  { %v1748_v31 = vadd.f32 %v1747_v5, %v1409_v34  ;;  %2238 = vmatmul.f32.gmra.mxu0 %v8439_v10  ;;  %2517 = vmatmul.f32.gmra.mxu1 %v8442_v11  ;;  %v8447_v34 = vld [vmem:[#allocation50_spill] sm:$0xff] }
 0x2ec   :  { %v6897_v35 = vadd.f32 %v2148_v43, %v1748_v31  ;;  %2852 = vmatmul.f32.gmra.mxu2 %v8444_v12 }
 0x2ee   :  { %8443 = vst [vmem:[#allocation42_spill] sm:$0xff] %v6897_v35  ;;  %3331 = vmatmul.f32.gmra.mxu3 %v8442_v11 }
 0x2ef   :  { %v1125_v29 = vpop.f32.mrf.mxu0  ;;  %v1416_v45 = vpop.f32.mrf.mxu1 }
 0x2f0   :  { %v1413_v18 = vadd.f32 %v1412_v17, %v1125_v29  ;;  %v1752_v47 = vpop.f32.mrf.mxu2  ;;  %v8448_v17 = vld [vmem:[#allocation45_spill] sm:$0xff] }
 0x2f1   :  { %v2154_v0 = vpop.f32.mrf.mxu3 }
 0x2f2   :  { %v1753_v9 = vadd.f32 %v1752_v47, %v1413_v18  ;;  %2242 = vmatmul.f32.gmra.mxu0 %v8442_v11  ;;  %2521 = vmatmul.f32.gmra.mxu1 %v8445_v33  ;;  %v8450_v18 = vld [vmem:[#allocation54_spill] sm:$0xff]  ;;  %v8451_v47 = vld [vmem:[#allocation57_spill] sm:$0xff] }
 0x2f4   :  { %v6903_v53 = vadd.f32 %v2154_v0, %v1753_v9  ;;  %2860 = vmatmul.f32.gmra.mxu2 %v8447_v34 }
 0x2f6   :  { %8446 = vst [vmem:[#allocation46_spill] sm:$0xff] %v6903_v53  ;;  %3335 = vmatmul.f32.gmra.mxu3 %v8445_v33 }
 0x2f7   :  { %v1133_v31 = vpop.f32.mrf.mxu0  ;;  %v2462_v43 = vpop.f32.mrf.mxu1 }
 0x2f8   :  { %v1417_v5 = vadd.f32 %v1416_v45, %v1133_v31  ;;  %v1757_v12 = vpop.f32.mrf.mxu2 }
 0x2f9   :  { %v2160_v35 = vpop.f32.mrf.mxu3 }
 0x2fa   :  { %v1758_v10 = vadd.f32 %v1757_v12, %v1417_v5  ;;  %2246 = vmatmul.f32.gmra.mxu0 %v8445_v33  ;;  %2525 = vmatmul.f32.gmra.mxu1 %v8448_v17  ;;  %v8454_v5 = vld [vmem:[#allocation49_spill] sm:$0xff] }
 0x2fc   :  { %v6909_v29 = vadd.f32 %v2160_v35, %v1758_v10  ;;  %2868 = vmatmul.f32.gmra.mxu2 %v8450_v18  ;;  %v8455_v10 = vld [vmem:[#allocation59_spill] sm:$0xff]  ;;  %v8456_v18 = vld [vmem:[#allocation62_spill] sm:$0xff] }
 0x2fe   :  { %8449 = vst [vmem:[#allocation50_spill] sm:$0xff] %v6909_v29  ;;  %3339 = vmatmul.f32.gmra.mxu3 %v8448_v17 }
 0x2ff   :  { %v2187_v9 = vpop.f32.mrf.mxu0  ;;  %v2466_v0 = vpop.f32.mrf.mxu1 }
 0x300   :  { %v2188_v34 = vadd.f32 %v2187_v9, %v8451_v47  ;;  %v2741_v53 = vpop.f32.mrf.mxu2 }
 0x301   :  { %v3276_v11 = vpop.f32.mrf.mxu3 }
 0x302   :  { %v6914_v45 = vadd.f32 %v2462_v43, %v2188_v34  ;;  %v6916_v31 = vadd.f32 %v3276_v11, %v2741_v53  ;;  %2250 = vmatmul.f32.gmra.mxu0 %v8448_v17  ;;  %2529 = vmatmul.f32.gmra.mxu1 %v8454_v5  ;;  %v8459_v11 = vld [vmem:[#allocation53_spill] sm:$0xff]  ;;  %v8460_v53 = vld [vmem:[#allocation64_spill] sm:$0xff] }
 0x304   :  { %8452 = vst [vmem:[#allocation54_spill] sm:$0xff] %v6914_v45  ;;  %2876 = vmatmul.f32.gmra.mxu2 %v8455_v10  ;;  %v8461_v45 = vld [vmem:[#allocation67_spill] sm:$0xff] }
 0x305   :  { %8453 = vst [vmem:[#allocation57_spill] sm:$0xff] %v6916_v31 }
 0x306   :  { %3343 = vmatmul.f32.gmra.mxu3 %v8454_v5 }
 0x307   :  { %v2191_v35 = vpop.f32.mrf.mxu0  ;;  %v2470_v12 = vpop.f32.mrf.mxu1 }
 0x308   :  { %v2192_v29 = vadd.f32 %v2191_v35, %v8456_v18  ;;  %v2749_v33 = vpop.f32.mrf.mxu2 }
 0x309   :  { %v3280_v9 = vpop.f32.mrf.mxu3 }
 0x30a   :  { %v6923_v47 = vadd.f32 %v2466_v0, %v2192_v29  ;;  %v6925_v43 = vadd.f32 %v3280_v9, %v2749_v33  ;;  %2254 = vmatmul.f32.gmra.mxu0 %v8454_v5  ;;  %2533 = vmatmul.f32.gmra.mxu1 %v8459_v11  ;;  %v8464_v33 = vld [vmem:[#allocation58_spill] sm:$0xff]  ;;  %v8465_v0 = vld [vmem:[#allocation69_spill] sm:$0xff] }
 0x30c   :  { %8457 = vst [vmem:[#allocation59_spill] sm:$0xff] %v6923_v47  ;;  %2884 = vmatmul.f32.gmra.mxu2 %v8460_v53  ;;  %v8466_v47 = vld [vmem:[#allocation72_spill] sm:$0xff] }
 0x30d   :  { %8458 = vst [vmem:[#allocation62_spill] sm:$0xff] %v6925_v43 }
 0x30e   :  { %3347 = vmatmul.f32.gmra.mxu3 %v8459_v11 }
 0x30f   :  { %v2195_v34 = vpop.f32.mrf.mxu0  ;;  %v2474_v10 = vpop.f32.mrf.mxu1 }
 0x310   :  { %v2196_v31 = vadd.f32 %v2195_v34, %v8461_v45  ;;  %v2757_v17 = vpop.f32.mrf.mxu2 }
 0x311   :  { %v3284_v35 = vpop.f32.mrf.mxu3 }
 0x312   :  { %v6932_v18 = vadd.f32 %v2470_v12, %v2196_v31  ;;  %v6934_v29 = vadd.f32 %v3284_v35, %v2757_v17  ;;  %2258 = vmatmul.f32.gmra.mxu0 %v8459_v11  ;;  %2537 = vmatmul.f32.gmra.mxu1 %v8464_v33  ;;  %v8469_v17 = vld [vmem:[#allocation63_spill] sm:$0xff]  ;;  %v8470_v12 = vld [vmem:[#allocation74_spill] sm:$0xff] }
 0x314   :  { %8462 = vst [vmem:[#allocation64_spill] sm:$0xff] %v6932_v18  ;;  %2892 = vmatmul.f32.gmra.mxu2 %v8465_v0  ;;  %v8471_v18 = vld [vmem:[#allocation77_spill] sm:$0xff] }
 0x315   :  { %8463 = vst [vmem:[#allocation67_spill] sm:$0xff] %v6934_v29 }
 0x316   :  { %3351 = vmatmul.f32.gmra.mxu3 %v8464_v33 }
 0x317   :  { %v2199_v9 = vpop.f32.mrf.mxu0  ;;  %v2478_v53 = vpop.f32.mrf.mxu1 }
 0x318   :  { %v2200_v43 = vadd.f32 %v2199_v9, %v8466_v47  ;;  %v2765_v5 = vpop.f32.mrf.mxu2 }
 0x319   :  { %v3288_v45 = vpop.f32.mrf.mxu3 }
 0x31a   :  { %v6941_v34 = vadd.f32 %v2474_v10, %v2200_v43  ;;  %v6943_v31 = vadd.f32 %v3288_v45, %v2765_v5  ;;  %2262 = vmatmul.f32.gmra.mxu0 %v8464_v33  ;;  %2541 = vmatmul.f32.gmra.mxu1 %v8469_v17  ;;  %v8474_v5 = vld [vmem:[#allocation68_spill] sm:$0xff]  ;;  %v8475_v10 = vld [vmem:[#allocation79_spill] sm:$0xff] }
 0x31c   :  { %8467 = vst [vmem:[#allocation69_spill] sm:$0xff] %v6941_v34  ;;  %2900 = vmatmul.f32.gmra.mxu2 %v8470_v12  ;;  %v8476_v34 = vld [vmem:[#allocation82_spill] sm:$0xff] }
 0x31d   :  { %8468 = vst [vmem:[#allocation72_spill] sm:$0xff] %v6943_v31 }
 0x31e   :  { %3355 = vmatmul.f32.gmra.mxu3 %v8469_v17 }
 0x31f   :  { %v2203_v35 = vpop.f32.mrf.mxu0  ;;  %v2482_v0 = vpop.f32.mrf.mxu1 }
 0x320   :  { %v2204_v29 = vadd.f32 %v2203_v35, %v8471_v18  ;;  %v2773_v11 = vpop.f32.mrf.mxu2 }
 0x321   :  { %v3292_v47 = vpop.f32.mrf.mxu3 }
 0x322   :  { %v6950_v9 = vadd.f32 %v2478_v53, %v2204_v29  ;;  %v6952_v43 = vadd.f32 %v3292_v47, %v2773_v11  ;;  %2266 = vmatmul.f32.gmra.mxu0 %v8469_v17  ;;  %2545 = vmatmul.f32.gmra.mxu1 %v8474_v5  ;;  %v8479_v11 = vld [vmem:[#allocation73_spill] sm:$0xff]  ;;  %v8480_v53 = vld [vmem:[#allocation84_spill] sm:$0xff] }
 0x324   :  { %8472 = vst [vmem:[#allocation74_spill] sm:$0xff] %v6950_v9  ;;  %2908 = vmatmul.f32.gmra.mxu2 %v8475_v10  ;;  %v8481_v9 = vld [vmem:[#allocation87_spill] sm:$0xff] }
 0x325   :  { %8473 = vst [vmem:[#allocation77_spill] sm:$0xff] %v6952_v43 }
 0x326   :  { %3359 = vmatmul.f32.gmra.mxu3 %v8474_v5 }
 0x327   :  { %v2207_v45 = vpop.f32.mrf.mxu0  ;;  %v2486_v12 = vpop.f32.mrf.mxu1 }
 0x328   :  { %v2208_v31 = vadd.f32 %v2207_v45, %v8476_v34  ;;  %v2781_v33 = vpop.f32.mrf.mxu2 }
 0x329   :  { %v3296_v18 = vpop.f32.mrf.mxu3 }
 0x32a   :  { %v6959_v35 = vadd.f32 %v2482_v0, %v2208_v31  ;;  %v6961_v29 = vadd.f32 %v3296_v18, %v2781_v33  ;;  %2270 = vmatmul.f32.gmra.mxu0 %v8474_v5  ;;  %2549 = vmatmul.f32.gmra.mxu1 %v8479_v11  ;;  %v8484_v33 = vld [vmem:[#allocation78_spill] sm:$0xff]  ;;  %v8485_v0 = vld [vmem:[#allocation89_spill] sm:$0xff] }
 0x32c   :  { %8477 = vst [vmem:[#allocation79_spill] sm:$0xff] %v6959_v35  ;;  %2916 = vmatmul.f32.gmra.mxu2 %v8480_v53  ;;  %v8486_v35 = vld [vmem:[#allocation92_spill] sm:$0xff] }
 0x32d   :  { %8478 = vst [vmem:[#allocation82_spill] sm:$0xff] %v6961_v29 }
 0x32e   :  { %3363 = vmatmul.f32.gmra.mxu3 %v8479_v11 }
 0x32f   :  { %v2211_v47 = vpop.f32.mrf.mxu0  ;;  %v2490_v10 = vpop.f32.mrf.mxu1 }
 0x330   :  { %v2212_v43 = vadd.f32 %v2211_v47, %v8481_v9  ;;  %v2789_v17 = vpop.f32.mrf.mxu2 }
 0x331   :  { %v3300_v34 = vpop.f32.mrf.mxu3 }
 0x332   :  { %v6968_v45 = vadd.f32 %v2486_v12, %v2212_v43  ;;  %v6970_v31 = vadd.f32 %v3300_v34, %v2789_v17  ;;  %2274 = vmatmul.f32.gmra.mxu0 %v8479_v11  ;;  %2553 = vmatmul.f32.gmra.mxu1 %v8484_v33  ;;  %v8489_v17 = vld [vmem:[#allocation83_spill] sm:$0xff]  ;;  %v8490_v12 = vld [vmem:[#allocation94_spill] sm:$0xff] }
 0x334   :  { %8482 = vst [vmem:[#allocation84_spill] sm:$0xff] %v6968_v45  ;;  %2924 = vmatmul.f32.gmra.mxu2 %v8485_v0  ;;  %v8491_v45 = vld [vmem:[#allocation97_spill] sm:$0xff] }
 0x335   :  { %8483 = vst [vmem:[#allocation87_spill] sm:$0xff] %v6970_v31 }
 0x336   :  { %3367 = vmatmul.f32.gmra.mxu3 %v8484_v33 }
 0x337   :  { %v2215_v18 = vpop.f32.mrf.mxu0  ;;  %v2494_v53 = vpop.f32.mrf.mxu1 }
 0x338   :  { %v2216_v29 = vadd.f32 %v2215_v18, %v8486_v35  ;;  %v2797_v5 = vpop.f32.mrf.mxu2 }
 0x339   :  { %v3304_v9 = vpop.f32.mrf.mxu3 }
 0x33a   :  { %v6977_v47 = vadd.f32 %v2490_v10, %v2216_v29  ;;  %v6979_v43 = vadd.f32 %v3304_v9, %v2797_v5  ;;  %2278 = vmatmul.f32.gmra.mxu0 %v8484_v33  ;;  %2557 = vmatmul.f32.gmra.mxu1 %v8489_v17  ;;  %v8494_v5 = vld [vmem:[#allocation88_spill] sm:$0xff]  ;;  %v8495_v10 = vld [vmem:[#allocation99_spill] sm:$0xff] }
 0x33c   :  { %8487 = vst [vmem:[#allocation89_spill] sm:$0xff] %v6977_v47  ;;  %2932 = vmatmul.f32.gmra.mxu2 %v8490_v12  ;;  %v8496_v47 = vld [vmem:[#allocation102_spill] sm:$0xff] }
 0x33d   :  { %8488 = vst [vmem:[#allocation92_spill] sm:$0xff] %v6979_v43 }
 0x33e   :  { %3371 = vmatmul.f32.gmra.mxu3 %v8489_v17 }
 0x33f   :  { %v2219_v34 = vpop.f32.mrf.mxu0  ;;  %v2498_v0 = vpop.f32.mrf.mxu1 }
 0x340   :  { %v2220_v31 = vadd.f32 %v2219_v34, %v8491_v45  ;;  %v2805_v11 = vpop.f32.mrf.mxu2 }
 0x341   :  { %v3308_v35 = vpop.f32.mrf.mxu3 }
 0x342   :  { %v6986_v18 = vadd.f32 %v2494_v53, %v2220_v31  ;;  %v6988_v29 = vadd.f32 %v3308_v35, %v2805_v11  ;;  %2282 = vmatmul.f32.gmra.mxu0 %v8489_v17  ;;  %2561 = vmatmul.f32.gmra.mxu1 %v8494_v5  ;;  %v8499_v11 = vld [vmem:[#allocation93_spill] sm:$0xff]  ;;  %v8500_v53 = vld [vmem:[#allocation104_spill] sm:$0xff] }
 0x344   :  { %8492 = vst [vmem:[#allocation94_spill] sm:$0xff] %v6986_v18  ;;  %2940 = vmatmul.f32.gmra.mxu2 %v8495_v10  ;;  %v8501_v18 = vld [vmem:[#allocation107_spill] sm:$0xff] }
 0x345   :  { %8493 = vst [vmem:[#allocation97_spill] sm:$0xff] %v6988_v29 }
 0x346   :  { %3375 = vmatmul.f32.gmra.mxu3 %v8494_v5 }
 0x347   :  { %v2223_v9 = vpop.f32.mrf.mxu0  ;;  %v2502_v12 = vpop.f32.mrf.mxu1 }
 0x348   :  { %v2224_v43 = vadd.f32 %v2223_v9, %v8496_v47  ;;  %v2813_v33 = vpop.f32.mrf.mxu2 }
 0x349   :  { %v3312_v45 = vpop.f32.mrf.mxu3 }
 0x34a   :  { %v6995_v34 = vadd.f32 %v2498_v0, %v2224_v43  ;;  %v6997_v31 = vadd.f32 %v3312_v45, %v2813_v33  ;;  %2286 = vmatmul.f32.gmra.mxu0 %v8494_v5  ;;  %2565 = vmatmul.f32.gmra.mxu1 %v8499_v11  ;;  %v8504_v33 = vld [vmem:[#allocation98_spill] sm:$0xff]  ;;  %v8505_v0 = vld [vmem:[#allocation109_spill] sm:$0xff] }
 0x34c   :  { %8497 = vst [vmem:[#allocation99_spill] sm:$0xff] %v6995_v34  ;;  %2948 = vmatmul.f32.gmra.mxu2 %v8500_v53  ;;  %v8506_v34 = vld [vmem:[#allocation112_spill] sm:$0xff] }
 0x34d   :  { %8498 = vst [vmem:[#allocation102_spill] sm:$0xff] %v6997_v31 }
 0x34e   :  { %3379 = vmatmul.f32.gmra.mxu3 %v8499_v11 }
 0x34f   :  { %v2227_v35 = vpop.f32.mrf.mxu0  ;;  %v2506_v10 = vpop.f32.mrf.mxu1 }
 0x350   :  { %v2228_v29 = vadd.f32 %v2227_v35, %v8501_v18  ;;  %v2821_v17 = vpop.f32.mrf.mxu2 }
 0x351   :  { %v3316_v47 = vpop.f32.mrf.mxu3 }
 0x352   :  { %v7004_v9 = vadd.f32 %v2502_v12, %v2228_v29  ;;  %v7006_v43 = vadd.f32 %v3316_v47, %v2821_v17  ;;  %2290 = vmatmul.f32.gmra.mxu0 %v8499_v11  ;;  %2569 = vmatmul.f32.gmra.mxu1 %v8504_v33  ;;  %v8508_v17 = vld [vmem:[#allocation103_spill] sm:$0xff]  ;;  %v8509_v12 = vld [vmem:[#allocation114_spill] sm:$0xff] }
 0x354   :  { %8502 = vst [vmem:[#allocation104_spill] sm:$0xff] %v7004_v9  ;;  %2956 = vmatmul.f32.gmra.mxu2 %v8505_v0  ;;  %v8510_v9 = vld [vmem:[#allocation117_spill] sm:$0xff] }
 0x355   :  { %8503 = vst [vmem:[#allocation107_spill] sm:$0xff] %v7006_v43 }
 0x356   :  { %3383 = vmatmul.f32.gmra.mxu3 %v8504_v33 }
 0x357   :  { %v2231_v45 = vpop.f32.mrf.mxu0  ;;  %v2510_v53 = vpop.f32.mrf.mxu1 }
 0x358   :  { %v2232_v31 = vadd.f32 %v2231_v45, %v8506_v34  ;;  %v2829_v5 = vpop.f32.mrf.mxu2 }
 0x359   :  { %v3320_v18 = vpop.f32.mrf.mxu3 }
 0x35a   :  { %v7013_v35 = vadd.f32 %v2506_v10, %v2232_v31  ;;  %v7015_v29 = vadd.f32 %v3320_v18, %v2829_v5  ;;  %2294 = vmatmul.f32.gmra.mxu0 %v8504_v33  ;;  %2573 = vmatmul.f32.gmra.mxu1 %v8508_v17  ;;  %v8511_v5 = vld [vmem:[#allocation108_spill] sm:$0xff] }
 0x35c   :  { %8507 = vst [vmem:[#allocation98_spill] sm:$0xff] %v7013_v35  ;;  %2964 = vmatmul.f32.gmra.mxu2 %v8509_v12 }
 0x35e   :  { %3387 = vmatmul.f32.gmra.mxu3 %v8508_v17 }
 0x35f   :  { %v2235_v47 = vpop.f32.mrf.mxu0  ;;  %v2514_v0 = vpop.f32.mrf.mxu1 }
 0x360   :  { %v2236_v43 = vadd.f32 %v2235_v47, %v8510_v9  ;;  %v2837_v11 = vpop.f32.mrf.mxu2 }
 0x361   :  { %v3324_v34 = vpop.f32.mrf.mxu3 }
 0x362   :  { %v7022_v45 = vadd.f32 %v2510_v53, %v2236_v43  ;;  %v7024_v31 = vadd.f32 %v3324_v34, %v2837_v11  ;;  %2298 = vmatmul.f32.gmra.mxu0 %v8508_v17  ;;  %2577 = vmatmul.f32.gmra.mxu1 %v8511_v5 }
 0x364   :  { %2972 = vmatmul.f32.gmra.mxu2 %v6027_v6 }
 0x366   :  { %3391 = vmatmul.f32.gmra.mxu3 %v8511_v5 }
 0x367   :  { %v2239_v10 = vpop.f32.mrf.mxu0  ;;  %v2518_v18 = vpop.f32.mrf.mxu1 }
 0x368   :  { %v2240_v12 = vadd.f32 %v2239_v10, %v6038_v51  ;;  %v2845_v35 = vpop.f32.mrf.mxu2 }
 0x369   :  { %v3328_v9 = vpop.f32.mrf.mxu3 }
 0x36a   :  { %v7031_v47 = vadd.f32 %v2514_v0, %v2240_v12  ;;  %v7033_v43 = vadd.f32 %v3328_v9, %v2845_v35  ;;  %2302 = vmatmul.f32.gmra.mxu0 %v8511_v5  ;;  %2581 = vmatmul.f32.gmra.mxu1 %v5982_v19  ;;  %v8515_v12 = vld [vmem:[#allocation127_spill] sm:$0xff] }
 0x36c   :  { %8512 = vst [vmem:[#allocation109_spill] sm:$0xff] %v7031_v47  ;;  %2980 = vmatmul.f32.gmra.mxu2 %v6058_v20 }
 0x36e   :  { %3395 = vmatmul.f32.gmra.mxu3 %v5982_v19 }
 0x36f   :  { %v2243_v6 = vpop.f32.mrf.mxu0  ;;  %v2522_v11 = vpop.f32.mrf.mxu1 }
 0x370   :  { %v2244_v53 = vadd.f32 %v2243_v6, %v6073_v4  ;;  %v2853_v34 = vpop.f32.mrf.mxu2 }
 0x371   :  { %v3332_v51 = vpop.f32.mrf.mxu3 }
 0x372   :  { %v7040_v10 = vadd.f32 %v2518_v18, %v2244_v53  ;;  %v7042_v0 = vadd.f32 %v3332_v51, %v2853_v34  ;;  %2306 = vmatmul.f32.gmra.mxu0 %v5982_v19  ;;  %2585 = vmatmul.f32.gmra.mxu1 %v6025_v13  ;;  %v8518_v53 = vld [vmem:[#allocation121_spill] sm:$0xff] }
 0x373   :  { %v8519_v34 = vld [vmem:[#allocation129_spill] sm:$0xff] }
 0x374   :  { %8513 = vst [vmem:[#allocation112_spill] sm:$0xff] %v7040_v10  ;;  %2988 = vmatmul.f32.gmra.mxu2 %v6089_v8  ;;  %v8520_v10 = vld [vmem:[#allocation132_spill] sm:$0xff] }
 0x375   :  { %8514 = vst [vmem:[#allocation103_spill] sm:$0xff] %v7042_v0 }
 0x376   :  { %3399 = vmatmul.f32.gmra.mxu3 %v6025_v13 }
 0x377   :  { %v2247_v20 = vpop.f32.mrf.mxu0  ;;  %v2526_v35 = vpop.f32.mrf.mxu1 }
 0x378   :  { %v2248_v9 = vadd.f32 %v2247_v20, %v8515_v12  ;;  %v2861_v47 = vpop.f32.mrf.mxu2 }
 0x379   :  { %v3336_v4 = vpop.f32.mrf.mxu3 }
 0x37a   :  { %v7049_v6 = vadd.f32 %v2522_v11, %v2248_v9  ;;  %v7051_v18 = vadd.f32 %v3336_v4, %v2861_v47  ;;  %2310 = vmatmul.f32.gmra.mxu0 %v6025_v13  ;;  %2589 = vmatmul.f32.gmra.mxu1 %v8518_v53  ;;  %v8523_v47 = vld [vmem:[#allocation124_spill] sm:$0xff]  ;;  %v8524_v9 = vld [vmem:[#allocation134_spill] sm:$0xff] }
 0x37c   :  { %8516 = vst [vmem:[#allocation114_spill] sm:$0xff] %v7049_v6  ;;  %2996 = vmatmul.f32.gmra.mxu2 %v8519_v34  ;;  %v8525_v6 = vld [vmem:[#allocation137_spill] sm:$0xff] }
 0x37d   :  { %8517 = vst [vmem:[#allocation117_spill] sm:$0xff] %v7051_v18 }
 0x37e   :  { %3403 = vmatmul.f32.gmra.mxu3 %v8518_v53 }
 0x37f   :  { %v2251_v8 = vpop.f32.mrf.mxu0  ;;  %v2530_v51 = vpop.f32.mrf.mxu1 }
 0x380   :  { %v2252_v0 = vadd.f32 %v2251_v8, %v8520_v10  ;;  %v2869_v19 = vpop.f32.mrf.mxu2 }
 0x381   :  { %v3340_v20 = vpop.f32.mrf.mxu3 }
 0x382   :  { %v7058_v12 = vadd.f32 %v2526_v35, %v2252_v0  ;;  %v7060_v11 = vadd.f32 %v3340_v20, %v2869_v19  ;;  %2314 = vmatmul.f32.gmra.mxu0 %v8518_v53  ;;  %2593 = vmatmul.f32.gmra.mxu1 %v8523_v47  ;;  %v8528_v19 = vld [vmem:[#allocation128_spill] sm:$0xff]  ;;  %v8529_v35 = vld [vmem:[#allocation139_spill] sm:$0xff] }
 0x384   :  { %8521 = vst [vmem:[#allocation108_spill] sm:$0xff] %v7058_v12  ;;  %3004 = vmatmul.f32.gmra.mxu2 %v8524_v9  ;;  %v8530_v12 = vld [vmem:[#allocation142_spill] sm:$0xff] }
 0x385   :  { %8522 = vst [vmem:[#allocation127_spill] sm:$0xff] %v7060_v11 }
 0x386   :  { %3407 = vmatmul.f32.gmra.mxu3 %v8523_v47 }
 0x387   :  { %v2255_v4 = vpop.f32.mrf.mxu0  ;;  %v2534_v34 = vpop.f32.mrf.mxu1 }
 0x388   :  { %v2256_v18 = vadd.f32 %v2255_v4, %v8525_v6  ;;  %v2877_v13 = vpop.f32.mrf.mxu2 }
 0x389   :  { %v3344_v10 = vpop.f32.mrf.mxu3 }
 0x38a   :  { %v7067_v8 = vadd.f32 %v2530_v51, %v2256_v18  ;;  %v7069_v0 = vadd.f32 %v3344_v10, %v2877_v13  ;;  %2318 = vmatmul.f32.gmra.mxu0 %v8523_v47  ;;  %2597 = vmatmul.f32.gmra.mxu1 %v8528_v19  ;;  %v8533_v13 = vld [vmem:[#allocation133_spill] sm:$0xff]  ;;  %v8534_v51 = vld [vmem:[#allocation144_spill] sm:$0xff] }
 0x38c   :  { %8526 = vst [vmem:[#allocation129_spill] sm:$0xff] %v7067_v8  ;;  %3012 = vmatmul.f32.gmra.mxu2 %v8529_v35  ;;  %v8535_v8 = vld [vmem:[#allocation147_spill] sm:$0xff] }
 0x38d   :  { %8527 = vst [vmem:[#allocation132_spill] sm:$0xff] %v7069_v0 }
 0x38e   :  { %3411 = vmatmul.f32.gmra.mxu3 %v8528_v19 }
 0x38f   :  { %v2259_v20 = vpop.f32.mrf.mxu0  ;;  %v2538_v9 = vpop.f32.mrf.mxu1 }
 0x390   :  { %v2260_v11 = vadd.f32 %v2259_v20, %v8530_v12  ;;  %v2885_v53 = vpop.f32.mrf.mxu2 }
 0x391   :  { %v3348_v6 = vpop.f32.mrf.mxu3 }
 0x392   :  { %v7076_v4 = vadd.f32 %v2534_v34, %v2260_v11  ;;  %v7078_v18 = vadd.f32 %v3348_v6, %v2885_v53  ;;  %2322 = vmatmul.f32.gmra.mxu0 %v8528_v19  ;;  %2601 = vmatmul.f32.gmra.mxu1 %v8533_v13  ;;  %v8538_v53 = vld [vmem:[#allocation138_spill] sm:$0xff]  ;;  %v8539_v34 = vld [vmem:[#allocation149_spill] sm:$0xff] }
 0x394   :  { %8531 = vst [vmem:[#allocation134_spill] sm:$0xff] %v7076_v4  ;;  %3020 = vmatmul.f32.gmra.mxu2 %v8534_v51  ;;  %v8540_v4 = vld [vmem:[#allocation152_spill] sm:$0xff] }
 0x395   :  { %8532 = vst [vmem:[#allocation137_spill] sm:$0xff] %v7078_v18 }
 0x396   :  { %3415 = vmatmul.f32.gmra.mxu3 %v8533_v13 }
 0x397   :  { %v2263_v10 = vpop.f32.mrf.mxu0  ;;  %v2542_v35 = vpop.f32.mrf.mxu1 }
 0x398   :  { %v2264_v0 = vadd.f32 %v2263_v10, %v8535_v8  ;;  %v2893_v47 = vpop.f32.mrf.mxu2 }
 0x399   :  { %v3352_v12 = vpop.f32.mrf.mxu3 }
 0x39a   :  { %v7085_v20 = vadd.f32 %v2538_v9, %v2264_v0  ;;  %v7087_v11 = vadd.f32 %v3352_v12, %v2893_v47  ;;  %2326 = vmatmul.f32.gmra.mxu0 %v8533_v13  ;;  %2605 = vmatmul.f32.gmra.mxu1 %v8538_v53  ;;  %v8543_v47 = vld [vmem:[#allocation143_spill] sm:$0xff]  ;;  %v8544_v9 = vld [vmem:[#allocation154_spill] sm:$0xff] }
 0x39c   :  { %8536 = vst [vmem:[#allocation139_spill] sm:$0xff] %v7085_v20  ;;  %3028 = vmatmul.f32.gmra.mxu2 %v8539_v34  ;;  %v8545_v20 = vld [vmem:[#allocation157_spill] sm:$0xff] }
 0x39d   :  { %8537 = vst [vmem:[#allocation142_spill] sm:$0xff] %v7087_v11 }
 0x39e   :  { %3419 = vmatmul.f32.gmra.mxu3 %v8538_v53 }
 0x39f   :  { %v2267_v6 = vpop.f32.mrf.mxu0  ;;  %v2546_v51 = vpop.f32.mrf.mxu1 }
 0x3a0   :  { %v2268_v18 = vadd.f32 %v2267_v6, %v8540_v4  ;;  %v2901_v19 = vpop.f32.mrf.mxu2 }
 0x3a1   :  { %v3356_v8 = vpop.f32.mrf.mxu3 }
 0x3a2   :  { %v7094_v10 = vadd.f32 %v2542_v35, %v2268_v18  ;;  %v7096_v0 = vadd.f32 %v3356_v8, %v2901_v19  ;;  %2330 = vmatmul.f32.gmra.mxu0 %v8538_v53  ;;  %2609 = vmatmul.f32.gmra.mxu1 %v8543_v47  ;;  %v8548_v19 = vld [vmem:[#allocation148_spill] sm:$0xff]  ;;  %v8549_v35 = vld [vmem:[#allocation159_spill] sm:$0xff] }
 0x3a4   :  { %8541 = vst [vmem:[#allocation144_spill] sm:$0xff] %v7094_v10  ;;  %3036 = vmatmul.f32.gmra.mxu2 %v8544_v9  ;;  %v8550_v10 = vld [vmem:[#allocation162_spill] sm:$0xff] }
 0x3a5   :  { %8542 = vst [vmem:[#allocation147_spill] sm:$0xff] %v7096_v0 }
 0x3a6   :  { %3423 = vmatmul.f32.gmra.mxu3 %v8543_v47 }
 0x3a7   :  { %v2271_v12 = vpop.f32.mrf.mxu0  ;;  %v2550_v34 = vpop.f32.mrf.mxu1 }
 0x3a8   :  { %v2272_v11 = vadd.f32 %v2271_v12, %v8545_v20  ;;  %v2909_v13 = vpop.f32.mrf.mxu2 }
 0x3a9   :  { %v3360_v4 = vpop.f32.mrf.mxu3 }
 0x3aa   :  { %v7103_v6 = vadd.f32 %v2546_v51, %v2272_v11  ;;  %v7105_v18 = vadd.f32 %v3360_v4, %v2909_v13  ;;  %2334 = vmatmul.f32.gmra.mxu0 %v8543_v47  ;;  %2613 = vmatmul.f32.gmra.mxu1 %v8548_v19  ;;  %v8553_v13 = vld [vmem:[#allocation153_spill] sm:$0xff]  ;;  %v8554_v51 = vld [vmem:[#allocation164_spill] sm:$0xff] }
 0x3ac   :  { %8546 = vst [vmem:[#allocation149_spill] sm:$0xff] %v7103_v6  ;;  %3044 = vmatmul.f32.gmra.mxu2 %v8549_v35  ;;  %v8555_v6 = vld [vmem:[#allocation167_spill] sm:$0xff] }
 0x3ad   :  { %8547 = vst [vmem:[#allocation152_spill] sm:$0xff] %v7105_v18 }
 0x3ae   :  { %3427 = vmatmul.f32.gmra.mxu3 %v8548_v19 }
 0x3af   :  { %v2275_v8 = vpop.f32.mrf.mxu0  ;;  %v2554_v9 = vpop.f32.mrf.mxu1 }
 0x3b0   :  { %v2276_v0 = vadd.f32 %v2275_v8, %v8550_v10  ;;  %v2917_v53 = vpop.f32.mrf.mxu2 }
 0x3b1   :  { %v3364_v20 = vpop.f32.mrf.mxu3 }
 0x3b2   :  { %v7112_v12 = vadd.f32 %v2550_v34, %v2276_v0  ;;  %v7114_v11 = vadd.f32 %v3364_v20, %v2917_v53  ;;  %2338 = vmatmul.f32.gmra.mxu0 %v8548_v19  ;;  %2617 = vmatmul.f32.gmra.mxu1 %v8553_v13  ;;  %v8558_v53 = vld [vmem:[#allocation158_spill] sm:$0xff]  ;;  %v8559_v34 = vld [vmem:[#allocation169_spill] sm:$0xff] }
 0x3b4   :  { %8551 = vst [vmem:[#allocation154_spill] sm:$0xff] %v7112_v12  ;;  %3052 = vmatmul.f32.gmra.mxu2 %v8554_v51  ;;  %v8560_v12 = vld [vmem:[#allocation172_spill] sm:$0xff] }
 0x3b5   :  { %8552 = vst [vmem:[#allocation157_spill] sm:$0xff] %v7114_v11 }
 0x3b6   :  { %3431 = vmatmul.f32.gmra.mxu3 %v8553_v13 }
 0x3b7   :  { %v2279_v4 = vpop.f32.mrf.mxu0  ;;  %v2558_v35 = vpop.f32.mrf.mxu1 }
 0x3b8   :  { %v2280_v18 = vadd.f32 %v2279_v4, %v8555_v6  ;;  %v2925_v47 = vpop.f32.mrf.mxu2 }
 0x3b9   :  { %v3368_v10 = vpop.f32.mrf.mxu3 }
 0x3ba   :  { %v7121_v8 = vadd.f32 %v2554_v9, %v2280_v18  ;;  %v7123_v0 = vadd.f32 %v3368_v10, %v2925_v47  ;;  %2342 = vmatmul.f32.gmra.mxu0 %v8553_v13  ;;  %2621 = vmatmul.f32.gmra.mxu1 %v8558_v53  ;;  %v8563_v47 = vld [vmem:[#allocation163_spill] sm:$0xff]  ;;  %v8564_v9 = vld [vmem:[#allocation174_spill] sm:$0xff] }
 0x3bc   :  { %8556 = vst [vmem:[#allocation159_spill] sm:$0xff] %v7121_v8  ;;  %3060 = vmatmul.f32.gmra.mxu2 %v8559_v34  ;;  %v8565_v8 = vld [vmem:[#allocation177_spill] sm:$0xff] }
 0x3bd   :  { %8557 = vst [vmem:[#allocation162_spill] sm:$0xff] %v7123_v0 }
 0x3be   :  { %3435 = vmatmul.f32.gmra.mxu3 %v8558_v53 }
 0x3bf   :  { %v2283_v20 = vpop.f32.mrf.mxu0  ;;  %v2562_v51 = vpop.f32.mrf.mxu1 }
 0x3c0   :  { %v2284_v11 = vadd.f32 %v2283_v20, %v8560_v12  ;;  %v2933_v19 = vpop.f32.mrf.mxu2 }
 0x3c1   :  { %v3372_v6 = vpop.f32.mrf.mxu3 }
 0x3c2   :  { %v7130_v4 = vadd.f32 %v2558_v35, %v2284_v11  ;;  %v7132_v18 = vadd.f32 %v3372_v6, %v2933_v19  ;;  %2346 = vmatmul.f32.gmra.mxu0 %v8558_v53  ;;  %2625 = vmatmul.f32.gmra.mxu1 %v8563_v47  ;;  %v8568_v19 = vld [vmem:[#allocation168_spill] sm:$0xff]  ;;  %v8569_v35 = vld [vmem:[#allocation179_spill] sm:$0xff] }
 0x3c4   :  { %8561 = vst [vmem:[#allocation164_spill] sm:$0xff] %v7130_v4  ;;  %3068 = vmatmul.f32.gmra.mxu2 %v8564_v9  ;;  %v8570_v4 = vld [vmem:[#allocation182_spill] sm:$0xff] }
 0x3c5   :  { %8562 = vst [vmem:[#allocation167_spill] sm:$0xff] %v7132_v18 }
 0x3c6   :  { %3439 = vmatmul.f32.gmra.mxu3 %v8563_v47 }
 0x3c7   :  { %v2287_v10 = vpop.f32.mrf.mxu0  ;;  %v2566_v34 = vpop.f32.mrf.mxu1 }
 0x3c8   :  { %v2288_v0 = vadd.f32 %v2287_v10, %v8565_v8  ;;  %v2941_v13 = vpop.f32.mrf.mxu2 }
 0x3c9   :  { %v3376_v12 = vpop.f32.mrf.mxu3 }
 0x3ca   :  { %v7139_v20 = vadd.f32 %v2562_v51, %v2288_v0  ;;  %v7141_v11 = vadd.f32 %v3376_v12, %v2941_v13  ;;  %2350 = vmatmul.f32.gmra.mxu0 %v8563_v47  ;;  %2629 = vmatmul.f32.gmra.mxu1 %v8568_v19  ;;  %v8573_v13 = vld [vmem:[#allocation173_spill] sm:$0xff]  ;;  %v8574_v51 = vld [vmem:[#allocation184_spill] sm:$0xff] }
 0x3cc   :  { %8566 = vst [vmem:[#allocation169_spill] sm:$0xff] %v7139_v20  ;;  %3076 = vmatmul.f32.gmra.mxu2 %v8569_v35  ;;  %v8575_v20 = vld [vmem:[#allocation187_spill] sm:$0xff] }
 0x3cd   :  { %8567 = vst [vmem:[#allocation172_spill] sm:$0xff] %v7141_v11 }
 0x3ce   :  { %3443 = vmatmul.f32.gmra.mxu3 %v8568_v19 }
 0x3cf   :  { %v2291_v6 = vpop.f32.mrf.mxu0  ;;  %v2570_v9 = vpop.f32.mrf.mxu1 }
 0x3d0   :  { %v2292_v18 = vadd.f32 %v2291_v6, %v8570_v4  ;;  %v2949_v53 = vpop.f32.mrf.mxu2 }
 0x3d1   :  { %v3380_v8 = vpop.f32.mrf.mxu3 }
 0x3d2   :  { %v7148_v10 = vadd.f32 %v2566_v34, %v2292_v18  ;;  %v7150_v0 = vadd.f32 %v3380_v8, %v2949_v53  ;;  %2354 = vmatmul.f32.gmra.mxu0 %v8568_v19  ;;  %2633 = vmatmul.f32.gmra.mxu1 %v8573_v13  ;;  %v8578_v53 = vld [vmem:[#allocation178_spill] sm:$0xff] }
 0x3d4   :  { %8571 = vst [vmem:[#allocation174_spill] sm:$0xff] %v7148_v10  ;;  %3084 = vmatmul.f32.gmra.mxu2 %v8574_v51  ;;  %v8579_v51 = vld [vmem:[#allocation191_spill] sm:$0xff] }
 0x3d5   :  { %8572 = vst [vmem:[#allocation177_spill] sm:$0xff] %v7150_v0 }
 0x3d6   :  { %3447 = vmatmul.f32.gmra.mxu3 %v8573_v13 }
 0x3d7   :  { %v2295_v12 = vpop.f32.mrf.mxu0  ;;  %v2574_v35 = vpop.f32.mrf.mxu1 }
 0x3d8   :  { %v2296_v11 = vadd.f32 %v2295_v12, %v8575_v20  ;;  %v2957_v47 = vpop.f32.mrf.mxu2 }
 0x3d9   :  { %v3384_v4 = vpop.f32.mrf.mxu3 }
 0x3da   :  { %v7157_v6 = vadd.f32 %v2570_v9, %v2296_v11  ;;  %v7159_v18 = vadd.f32 %v3384_v4, %v2957_v47  ;;  %2358 = vmatmul.f32.gmra.mxu0 %v8573_v13  ;;  %2637 = vmatmul.f32.gmra.mxu1 %v8578_v53  ;;  %v8582_v47 = vld [vmem:[#allocation183_spill] sm:$0xff]  ;;  %v8583_v9 = vld [vmem:[#allocation193_spill] sm:$0xff] }
 0x3dc   :  { %8576 = vst [vmem:[#allocation168_spill] sm:$0xff] %v7157_v6  ;;  %3092 = vmatmul.f32.gmra.mxu2 %v6433_v40  ;;  %v8584_v6 = vld [vmem:[#allocation196_spill] sm:$0xff] }
 0x3dd   :  { %8577 = vst [vmem:[#allocation179_spill] sm:$0xff] %v7159_v18 }
 0x3de   :  { %3451 = vmatmul.f32.gmra.mxu3 %v8578_v53 }
 0x3df   :  { %v2299_v34 = vpop.f32.mrf.mxu0  ;;  %v2578_v8 = vpop.f32.mrf.mxu1 }
 0x3e0   :  { %v2300_v10 = vadd.f32 %v2299_v34, %v8579_v51  ;;  %v2965_v0 = vpop.f32.mrf.mxu2 }
 0x3e1   :  { %v3388_v20 = vpop.f32.mrf.mxu3 }
 0x3e2   :  { %v7166_v12 = vadd.f32 %v2574_v35, %v2300_v10  ;;  %v7168_v11 = vadd.f32 %v3388_v20, %v2965_v0  ;;  %2362 = vmatmul.f32.gmra.mxu0 %v8578_v53  ;;  %2641 = vmatmul.f32.gmra.mxu1 %v8582_v47  ;;  %v8587_v0 = vld [vmem:[#allocation188_spill] sm:$0xff] }
 0x3e4   :  { %8580 = vst [vmem:[#allocation182_spill] sm:$0xff] %v7166_v12  ;;  %3100 = vmatmul.f32.gmra.mxu2 %v8583_v9  ;;  %v8588_v9 = vld [vmem:[#allocation200_spill] sm:$0xff] }
 0x3e5   :  { %8581 = vst [vmem:[#allocation184_spill] sm:$0xff] %v7168_v11 }
 0x3e6   :  { %3455 = vmatmul.f32.gmra.mxu3 %v8582_v47 }
 0x3e7   :  { %v2303_v40 = vpop.f32.mrf.mxu0  ;;  %v2582_v4 = vpop.f32.mrf.mxu1 }
 0x3e8   :  { %v2304_v18 = vadd.f32 %v2303_v40, %v8584_v6  ;;  %v2973_v13 = vpop.f32.mrf.mxu2 }
 0x3e9   :  { %v3392_v34 = vpop.f32.mrf.mxu3 }
 0x3ea   :  { %v7175_v51 = vadd.f32 %v2578_v8, %v2304_v18  ;;  %v7177_v10 = vadd.f32 %v3392_v34, %v2973_v13  ;;  %2366 = vmatmul.f32.gmra.mxu0 %v8582_v47  ;;  %2645 = vmatmul.f32.gmra.mxu1 %v8587_v0  ;;  %v8591_v13 = vld [vmem:[#allocation192_spill] sm:$0xff] }
 0x3eb   :  { %v8592_v34 = vld [vmem:[#allocation204_spill] sm:$0xff] }
 0x3ec   :  { %8585 = vst [vmem:[#allocation187_spill] sm:$0xff] %v7175_v51  ;;  %3108 = vmatmul.f32.gmra.mxu2 %v6480_v21 }
 0x3ed   :  { %8586 = vst [vmem:[#allocation178_spill] sm:$0xff] %v7177_v10 }
 0x3ee   :  { %3459 = vmatmul.f32.gmra.mxu3 %v8587_v0 }
 0x3ef   :  { %v2307_v35 = vpop.f32.mrf.mxu0  ;;  %v2586_v20 = vpop.f32.mrf.mxu1 }
 0x3f0   :  { %v2308_v12 = vadd.f32 %v2307_v35, %v8588_v9  ;;  %v2981_v11 = vpop.f32.mrf.mxu2 }
 0x3f1   :  { %v3396_v6 = vpop.f32.mrf.mxu3 }
 0x3f2   :  { %v7184_v40 = vadd.f32 %v2582_v4, %v2308_v12  ;;  %v7186_v18 = vadd.f32 %v3396_v6, %v2981_v11  ;;  %2370 = vmatmul.f32.gmra.mxu0 %v8587_v0  ;;  %2649 = vmatmul.f32.gmra.mxu1 %v8591_v13  ;;  %v8595_v11 = vld [vmem:[#allocation197_spill] sm:$0xff]  ;;  %v8596_v6 = vld [vmem:[#allocation208_spill] sm:$0xff] }
 0x3f4   :  { %8589 = vst [vmem:[#allocation191_spill] sm:$0xff] %v7184_v40  ;;  %3116 = vmatmul.f32.gmra.mxu2 %v6500_v63 }
 0x3f5   :  { %8590 = vst [vmem:[#allocation183_spill] sm:$0xff] %v7186_v18 }
 0x3f6   :  { %3463 = vmatmul.f32.gmra.mxu3 %v8591_v13 }
 0x3f7   :  { %v2311_v21 = vpop.f32.mrf.mxu0  ;;  %v2590_v8 = vpop.f32.mrf.mxu1 }
 0x3f8   :  { %v2312_v51 = vadd.f32 %v2311_v21, %v8592_v34  ;;  %v2989_v10 = vpop.f32.mrf.mxu2 }
 0x3f9   :  { %v3400_v35 = vpop.f32.mrf.mxu3 }
 0x3fa   :  { %v7193_v9 = vadd.f32 %v2586_v20, %v2312_v51  ;;  %v7195_v12 = vadd.f32 %v3400_v35, %v2989_v10  ;;  %2374 = vmatmul.f32.gmra.mxu0 %v8591_v13  ;;  %2653 = vmatmul.f32.gmra.mxu1 %v8595_v11  ;;  %v8599_v10 = vld [vmem:[#allocation201_spill] sm:$0xff]  ;;  %v8600_v35 = vld [vmem:[#allocation212_spill] sm:$0xff] }
 0x3fc   :  { %8593 = vst [vmem:[#allocation193_spill] sm:$0xff] %v7193_v9  ;;  %3124 = vmatmul.f32.gmra.mxu2 %v6520_v62 }
 0x3fd   :  { %8594 = vst [vmem:[#allocation196_spill] sm:$0xff] %v7195_v12 }
 0x3fe   :  { %3467 = vmatmul.f32.gmra.mxu3 %v8595_v11 }
 0x3ff   :  { %v2315_v63 = vpop.f32.mrf.mxu0  ;;  %v2594_v4 = vpop.f32.mrf.mxu1 }
 0x400   :  { %v2316_v40 = vadd.f32 %v2315_v63, %v8596_v6  ;;  %v2997_v18 = vpop.f32.mrf.mxu2 }
 0x401   :  { %v3404_v21 = vpop.f32.mrf.mxu3 }
 0x402   :  { %v7202_v34 = vadd.f32 %v2590_v8, %v2316_v40  ;;  %v7204_v51 = vadd.f32 %v3404_v21, %v2997_v18  ;;  %2378 = vmatmul.f32.gmra.mxu0 %v8595_v11  ;;  %2657 = vmatmul.f32.gmra.mxu1 %v8599_v10  ;;  %v8603_v18 = vld [vmem:[#allocation205_spill] sm:$0xff]  ;;  %v8604_v21 = vld [vmem:[#allocation216_spill] sm:$0xff] }
 0x404   :  { %8597 = vst [vmem:[#allocation188_spill] sm:$0xff] %v7202_v34  ;;  %3132 = vmatmul.f32.gmra.mxu2 %v6540_v60 }
 0x405   :  { %8598 = vst [vmem:[#allocation200_spill] sm:$0xff] %v7204_v51 }
 0x406   :  { %3471 = vmatmul.f32.gmra.mxu3 %v8599_v10 }
 0x407   :  { %v2319_v62 = vpop.f32.mrf.mxu0  ;;  %v2598_v20 = vpop.f32.mrf.mxu1 }
 0x408   :  { %v2320_v9 = vadd.f32 %v2319_v62, %v8600_v35  ;;  %v3005_v12 = vpop.f32.mrf.mxu2 }
 0x409   :  { %v3408_v63 = vpop.f32.mrf.mxu3 }
 0x40a   :  { %v7211_v6 = vadd.f32 %v2594_v4, %v2320_v9  ;;  %v7213_v40 = vadd.f32 %v3408_v63, %v3005_v12  ;;  %2382 = vmatmul.f32.gmra.mxu0 %v8599_v10  ;;  %2661 = vmatmul.f32.gmra.mxu1 %v8603_v18  ;;  %v8607_v12 = vld [vmem:[#allocation209_spill] sm:$0xff]  ;;  %v8608_v63 = vld [vmem:[#allocation220_spill] sm:$0xff] }
 0x40c   :  { %8601 = vst [vmem:[#allocation192_spill] sm:$0xff] %v7211_v6  ;;  %3140 = vmatmul.f32.gmra.mxu2 %v6560_v37 }
 0x40d   :  { %8602 = vst [vmem:[#allocation204_spill] sm:$0xff] %v7213_v40 }
 0x40e   :  { %3475 = vmatmul.f32.gmra.mxu3 %v8603_v18 }
 0x40f   :  { %v2323_v60 = vpop.f32.mrf.mxu0  ;;  %v2602_v8 = vpop.f32.mrf.mxu1 }
 0x410   :  { %v2324_v34 = vadd.f32 %v2323_v60, %v8604_v21  ;;  %v3013_v51 = vpop.f32.mrf.mxu2 }
 0x411   :  { %v3412_v62 = vpop.f32.mrf.mxu3 }
 0x412   :  { %v7220_v35 = vadd.f32 %v2598_v20, %v2324_v34  ;;  %v7222_v9 = vadd.f32 %v3412_v62, %v3013_v51  ;;  %2386 = vmatmul.f32.gmra.mxu0 %v8603_v18  ;;  %2665 = vmatmul.f32.gmra.mxu1 %v8607_v12  ;;  %v8611_v51 = vld [vmem:[#allocation213_spill] sm:$0xff]  ;;  %v8612_v62 = vld [vmem:[#allocation224_spill] sm:$0xff] }
 0x414   :  { %8605 = vst [vmem:[#allocation197_spill] sm:$0xff] %v7220_v35  ;;  %3148 = vmatmul.f32.gmra.mxu2 %v6580_v27 }
 0x415   :  { %8606 = vst [vmem:[#allocation208_spill] sm:$0xff] %v7222_v9 }
 0x416   :  { %3479 = vmatmul.f32.gmra.mxu3 %v8607_v12 }
 0x417   :  { %v2327_v37 = vpop.f32.mrf.mxu0  ;;  %v2606_v4 = vpop.f32.mrf.mxu1 }
 0x418   :  { %v2328_v6 = vadd.f32 %v2327_v37, %v8608_v63  ;;  %v3021_v40 = vpop.f32.mrf.mxu2 }
 0x419   :  { %v3416_v60 = vpop.f32.mrf.mxu3 }
 0x41a   :  { %v7229_v21 = vadd.f32 %v2602_v8, %v2328_v6  ;;  %v7231_v34 = vadd.f32 %v3416_v60, %v3021_v40  ;;  %2390 = vmatmul.f32.gmra.mxu0 %v8607_v12  ;;  %2669 = vmatmul.f32.gmra.mxu1 %v8611_v51  ;;  %v8615_v40 = vld [vmem:[#allocation217_spill] sm:$0xff]  ;;  %v8616_v60 = vld [vmem:[#allocation228_spill] sm:$0xff] }
 0x41c   :  { %8609 = vst [vmem:[#allocation201_spill] sm:$0xff] %v7229_v21  ;;  %3156 = vmatmul.f32.gmra.mxu2 %v6600_v38 }
 0x41d   :  { %8610 = vst [vmem:[#allocation212_spill] sm:$0xff] %v7231_v34 }
 0x41e   :  { %3483 = vmatmul.f32.gmra.mxu3 %v8611_v51 }
 0x41f   :  { %v2331_v27 = vpop.f32.mrf.mxu0  ;;  %v2610_v20 = vpop.f32.mrf.mxu1 }
 0x420   :  { %v2332_v35 = vadd.f32 %v2331_v27, %v8612_v62  ;;  %v3029_v9 = vpop.f32.mrf.mxu2 }
 0x421   :  { %v3420_v37 = vpop.f32.mrf.mxu3 }
 0x422   :  { %v7238_v63 = vadd.f32 %v2606_v4, %v2332_v35  ;;  %v7240_v6 = vadd.f32 %v3420_v37, %v3029_v9  ;;  %2394 = vmatmul.f32.gmra.mxu0 %v8611_v51  ;;  %2673 = vmatmul.f32.gmra.mxu1 %v8615_v40  ;;  %v8619_v9 = vld [vmem:[#allocation221_spill] sm:$0xff]  ;;  %v8620_v37 = vld [vmem:[#allocation232_spill] sm:$0xff] }
 0x424   :  { %8613 = vst [vmem:[#allocation205_spill] sm:$0xff] %v7238_v63  ;;  %3164 = vmatmul.f32.gmra.mxu2 %v6620_v2 }
 0x425   :  { %8614 = vst [vmem:[#allocation216_spill] sm:$0xff] %v7240_v6 }
 0x426   :  { %3487 = vmatmul.f32.gmra.mxu3 %v8615_v40 }
 0x427   :  { %v2335_v38 = vpop.f32.mrf.mxu0  ;;  %v2614_v8 = vpop.f32.mrf.mxu1 }
 0x428   :  { %v2336_v21 = vadd.f32 %v2335_v38, %v8616_v60  ;;  %v3037_v34 = vpop.f32.mrf.mxu2 }
 0x429   :  { %v3424_v27 = vpop.f32.mrf.mxu3 }
 0x42a   :  { %v7247_v62 = vadd.f32 %v2610_v20, %v2336_v21  ;;  %v7249_v35 = vadd.f32 %v3424_v27, %v3037_v34  ;;  %2398 = vmatmul.f32.gmra.mxu0 %v8615_v40  ;;  %2677 = vmatmul.f32.gmra.mxu1 %v8619_v9  ;;  %v8623_v34 = vld [vmem:[#allocation225_spill] sm:$0xff]  ;;  %v8624_v27 = vld [vmem:[#allocation236_spill] sm:$0xff] }
 0x42c   :  { %8617 = vst [vmem:[#allocation209_spill] sm:$0xff] %v7247_v62  ;;  %3172 = vmatmul.f32.gmra.mxu2 %v6640_v61 }
 0x42d   :  { %8618 = vst [vmem:[#allocation220_spill] sm:$0xff] %v7249_v35 }
 0x42e   :  { %3491 = vmatmul.f32.gmra.mxu3 %v8619_v9 }
 0x42f   :  { %v2339_v2 = vpop.f32.mrf.mxu0  ;;  %v2618_v4 = vpop.f32.mrf.mxu1 }
 0x430   :  { %v2340_v63 = vadd.f32 %v2339_v2, %v8620_v37  ;;  %v3045_v6 = vpop.f32.mrf.mxu2 }
 0x431   :  { %v3428_v38 = vpop.f32.mrf.mxu3 }
 0x432   :  { %v7256_v60 = vadd.f32 %v2614_v8, %v2340_v63  ;;  %v7258_v21 = vadd.f32 %v3428_v38, %v3045_v6  ;;  %2402 = vmatmul.f32.gmra.mxu0 %v8619_v9  ;;  %2681 = vmatmul.f32.gmra.mxu1 %v8623_v34  ;;  %v8627_v6 = vld [vmem:[#allocation229_spill] sm:$0xff]  ;;  %v8628_v38 = vld [vmem:[#allocation240_spill] sm:$0xff] }
 0x434   :  { %8621 = vst [vmem:[#allocation213_spill] sm:$0xff] %v7256_v60  ;;  %3180 = vmatmul.f32.gmra.mxu2 %v6660_v32 }
 0x435   :  { %8622 = vst [vmem:[#allocation224_spill] sm:$0xff] %v7258_v21 }
 0x436   :  { %3495 = vmatmul.f32.gmra.mxu3 %v8623_v34 }
 0x437   :  { %v2343_v61 = vpop.f32.mrf.mxu0  ;;  %v2622_v20 = vpop.f32.mrf.mxu1 }
 0x438   :  { %v2344_v62 = vadd.f32 %v2343_v61, %v8624_v27  ;;  %v3053_v35 = vpop.f32.mrf.mxu2 }
 0x439   :  { %v3432_v2 = vpop.f32.mrf.mxu3 }
 0x43a   :  { %v7265_v37 = vadd.f32 %v2618_v4, %v2344_v62  ;;  %v7267_v63 = vadd.f32 %v3432_v2, %v3053_v35  ;;  %2406 = vmatmul.f32.gmra.mxu0 %v8623_v34  ;;  %2685 = vmatmul.f32.gmra.mxu1 %v8627_v6  ;;  %v8631_v35 = vld [vmem:[#allocation233_spill] sm:$0xff]  ;;  %v8632_v2 = vld [vmem:[#allocation244_spill] sm:$0xff] }
 0x43c   :  { %8625 = vst [vmem:[#allocation217_spill] sm:$0xff] %v7265_v37  ;;  %3188 = vmatmul.f32.gmra.mxu2 %v6680_v30 }
 0x43d   :  { %8626 = vst [vmem:[#allocation228_spill] sm:$0xff] %v7267_v63 }
 0x43e   :  { %3499 = vmatmul.f32.gmra.mxu3 %v8627_v6 }
 0x43f   :  { %v2347_v32 = vpop.f32.mrf.mxu0  ;;  %v2626_v8 = vpop.f32.mrf.mxu1 }
 0x440   :  { %v2348_v60 = vadd.f32 %v2347_v32, %v8628_v38  ;;  %v3061_v21 = vpop.f32.mrf.mxu2 }
 0x441   :  { %v3436_v61 = vpop.f32.mrf.mxu3 }
 0x442   :  { %v7274_v27 = vadd.f32 %v2622_v20, %v2348_v60  ;;  %v7276_v62 = vadd.f32 %v3436_v61, %v3061_v21  ;;  %2410 = vmatmul.f32.gmra.mxu0 %v8627_v6  ;;  %2689 = vmatmul.f32.gmra.mxu1 %v8631_v35  ;;  %v8635_v21 = vld [vmem:[#allocation237_spill] sm:$0xff]  ;;  %v8636_v61 = vld [vmem:[#allocation248_spill] sm:$0xff] }
 0x444   :  { %8629 = vst [vmem:[#allocation221_spill] sm:$0xff] %v7274_v27  ;;  %3196 = vmatmul.f32.gmra.mxu2 %v6700_v28 }
 0x445   :  { %8630 = vst [vmem:[#allocation232_spill] sm:$0xff] %v7276_v62 }
 0x446   :  { %3503 = vmatmul.f32.gmra.mxu3 %v8631_v35 }
 0x447   :  { %v2351_v30 = vpop.f32.mrf.mxu0  ;;  %v2630_v4 = vpop.f32.mrf.mxu1 }
 0x448   :  { %v2352_v37 = vadd.f32 %v2351_v30, %v8632_v2  ;;  %v3069_v63 = vpop.f32.mrf.mxu2 }
 0x449   :  { %v3440_v32 = vpop.f32.mrf.mxu3 }
 0x44a   :  { %v7283_v38 = vadd.f32 %v2626_v8, %v2352_v37  ;;  %v7285_v60 = vadd.f32 %v3440_v32, %v3069_v63  ;;  %2414 = vmatmul.f32.gmra.mxu0 %v8631_v35  ;;  %2693 = vmatmul.f32.gmra.mxu1 %v8635_v21  ;;  %v8638_v63 = vld [vmem:[#allocation241_spill] sm:$0xff]  ;;  %v8639_v32 = vld [vmem:[#allocation252_spill] sm:$0xff] }
 0x44c   :  { %8633 = vst [vmem:[#allocation225_spill] sm:$0xff] %v7283_v38  ;;  %3204 = vmatmul.f32.gmra.mxu2 %v6720_v48 }
 0x44d   :  { %8634 = vst [vmem:[#allocation236_spill] sm:$0xff] %v7285_v60 }
 0x44e   :  { %3507 = vmatmul.f32.gmra.mxu3 %v8635_v21 }
 0x44f   :  { %v2355_v28 = vpop.f32.mrf.mxu0  ;;  %v2634_v20 = vpop.f32.mrf.mxu1 }
 0x450   :  { %v2356_v27 = vadd.f32 %v2355_v28, %v8636_v61  ;;  %v3077_v62 = vpop.f32.mrf.mxu2 }
 0x451   :  { %v3444_v30 = vpop.f32.mrf.mxu3 }
 0x452   :  { %v7292_v2 = vadd.f32 %v2630_v4, %v2356_v27  ;;  %v7294_v37 = vadd.f32 %v3444_v30, %v3077_v62  ;;  %2418 = vmatmul.f32.gmra.mxu0 %v8635_v21  ;;  %2697 = vmatmul.f32.gmra.mxu1 %v8638_v63  ;;  %v8642_v62 = vld [vmem:[#allocation245_spill] sm:$0xff] }
 0x454   :  { %8637 = vst [vmem:[#allocation229_spill] sm:$0xff] %v7292_v2  ;;  %3212 = vmatmul.f32.gmra.mxu2 %v6740_v7 }
 0x456   :  { %3511 = vmatmul.f32.gmra.mxu3 %v8638_v63 }
 0x457   :  { %v2359_v48 = vpop.f32.mrf.mxu0  ;;  %v2638_v8 = vpop.f32.mrf.mxu1 }
 0x458   :  { %v2360_v38 = vadd.f32 %v2359_v48, %v8639_v32  ;;  %v3085_v60 = vpop.f32.mrf.mxu2 }
 0x459   :  { %v3448_v28 = vpop.f32.mrf.mxu3 }
 0x45a   :  { %v7301_v61 = vadd.f32 %v2634_v20, %v2360_v38  ;;  %v7303_v27 = vadd.f32 %v3448_v28, %v3085_v60  ;;  %2422 = vmatmul.f32.gmra.mxu0 %v8638_v63  ;;  %2701 = vmatmul.f32.gmra.mxu1 %v8642_v62  ;;  %v8644_v60 = vld [vmem:[#allocation249_spill] sm:$0xff] }
 0x45b   :  { %v8645_v20 = vld [vmem:[#allocation257_spill] sm:$0xff] }
 0x45c   :  { %8640 = vst [vmem:[#allocation240_spill] sm:$0xff] %v7301_v61  ;;  %3220 = vmatmul.f32.gmra.mxu2 %v6760_v23 }
 0x45d   :  { %8641 = vst [vmem:[#allocation233_spill] sm:$0xff] %v7303_v27 }
 0x45e   :  { %3515 = vmatmul.f32.gmra.mxu3 %v8642_v62 }
 0x45f   :  { %v2363_v7 = vpop.f32.mrf.mxu0  ;;  %v2642_v4 = vpop.f32.mrf.mxu1 }
 0x460   :  { %v2364_v30 = vadd.f32 %v2363_v7, %v6771_v36  ;;  %v3093_v2 = vpop.f32.mrf.mxu2 }
 0x461   :  { %v3452_v48 = vpop.f32.mrf.mxu3 }
 0x462   :  { %v7310_v32 = vadd.f32 %v2638_v8, %v2364_v30  ;;  %v7312_v38 = vadd.f32 %v3452_v48, %v3093_v2  ;;  %2426 = vmatmul.f32.gmra.mxu0 %v8642_v62  ;;  %2705 = vmatmul.f32.gmra.mxu1 %v8644_v60  ;;  %v8648_v2 = vld [vmem:[#allocation253_spill] sm:$0xff] }
 0x464   :  { %8643 = vst [vmem:[#allocation244_spill] sm:$0xff] %v7310_v32  ;;  %3228 = vmatmul.f32.gmra.mxu2 %v8645_v20 }
 0x466   :  { %3519 = vmatmul.f32.gmra.mxu3 %v8644_v60 }
 0x467   :  { %v2367_v23 = vpop.f32.mrf.mxu0  ;;  %v2646_v28 = vpop.f32.mrf.mxu1 }
 0x468   :  { %v2368_v61 = vadd.f32 %v2367_v23, %v6790_v44  ;;  %v3101_v27 = vpop.f32.mrf.mxu2 }
 0x469   :  { %v3456_v36 = vpop.f32.mrf.mxu3 }
 0x46a   :  { %v7319_v7 = vadd.f32 %v2642_v4, %v2368_v61  ;;  %v7321_v8 = vadd.f32 %v3456_v36, %v3101_v27  ;;  %2430 = vmatmul.f32.gmra.mxu0 %v8644_v60  ;;  %2709 = vmatmul.f32.gmra.mxu1 %v8648_v2  ;;  %v8650_v27 = vld [vmem:[#allocation256_spill] sm:$0xff]  ;;  %v8651_v36 = vld [vmem:[#allocation261_spill] sm:$0xff] }
 0x46c   :  { %8646 = vst [vmem:[#allocation237_spill] sm:$0xff] %v7319_v7  ;;  %3236 = vmatmul.f32.gmra.mxu2 %v6796_v56 }
 0x46d   :  { %8647 = vst [vmem:[#allocation248_spill] sm:$0xff] %v7321_v8 }
 0x46e   :  { %3523 = vmatmul.f32.gmra.mxu3 %v8648_v2 }
 0x46f   :  { %v2371_v30 = vpop.f32.mrf.mxu0  ;;  %v2650_v48 = vpop.f32.mrf.mxu1 }
 0x470   :  { %v2372_v20 = vadd.f32 %v2371_v30, %v6803_v15  ;;  %v3109_v32 = vpop.f32.mrf.mxu2 }
 0x471   :  { %v3460_v44 = vpop.f32.mrf.mxu3 }
 0x472   :  { %v7328_v23 = vadd.f32 %v2646_v28, %v2372_v20  ;;  %v7330_v61 = vadd.f32 %v3460_v44, %v3109_v32  ;;  %2434 = vmatmul.f32.gmra.mxu0 %v8648_v2  ;;  %2713 = vmatmul.f32.gmra.mxu1 %v8650_v27  ;;  %v8653_v32 = vld [vmem:[#allocation6_spill] sm:$0xff] }
 0x474   :  { %8649 = vst [vmem:[#allocation241_spill] sm:$0xff] %v7328_v23  ;;  %3244 = vmatmul.f32.gmra.mxu2 %v6809_v52 }
 0x476   :  { %3527 = vmatmul.f32.gmra.mxu3 %v8650_v27 }
 0x477   :  { %v2375_v56 = vpop.f32.mrf.mxu0  ;;  %v2654_v4 = vpop.f32.mrf.mxu1 }
 0x478   :  { %v2376_v7 = vadd.f32 %v2375_v56, %v8651_v36  ;;  %v3117_v8 = vpop.f32.mrf.mxu2 }
 0x479   :  { %v3464_v15 = vpop.f32.mrf.mxu3 }
 0x47a   :  { %v7337_v30 = vadd.f32 %v2650_v48, %v2376_v7  ;;  %v7339_v28 = vadd.f32 %v3464_v15, %v3117_v8  ;;  %2438 = vmatmul.f32.gmra.mxu0 %v8650_v27  ;;  %3893 = vmatmul.f32.vlgmr.msra.gmra.mxu1 %v8653_v32  ;;  %v8654_v8 = vld [vmem:[#allocation5_spill] sm:$0xff] }
 0x47b   :  { %v8655_v48 = vld [vmem:[#allocation9_spill] sm:$0xff] }
 0x47c   :  { %8652 = vst [vmem:[#allocation252_spill] sm:$0xff] %v7337_v30  ;;  %4298 = vmatmul.f32.vlgmr.msra.gmra.mxu2 %v5224_v46 }
 0x47e   :  { %4573 = vmatmul.f32.vlgmr.msra.gmra.mxu3 %v5224_v46 }
 0x47f   :  { %v2379_v52 = vpop.f32.mrf.mxu0  ;;  %v2658_v20 = vpop.f32.mrf.mxu1 }
 0x480   :  { %v2380_v44 = vadd.f32 %v2379_v52, %v6819_v50  ;;  %v3125_v23 = vpop.f32.mrf.mxu2 }
 0x481   :  { %v3468_v56 = vpop.f32.mrf.mxu3 }
 0x482   :  { %v7346_v36 = vadd.f32 %v2654_v4, %v2380_v44  ;;  %v7348_v7 = vadd.f32 %v3468_v56, %v3125_v23  ;;  %3553 = vmatmul.f32.vlgmr.msra.gmra.mxu0 %v8654_v8  ;;  %3899 = vmatmul.f32.gmra.mxu1 %v8655_v48  ;;  %v8656_v23 = vld [vmem:[#allocation7_spill] sm:$0xff]  ;;  %v8657_v44 = vld [vmem:[#allocation10_spill] sm:$0xff] }
 0x484   :  { %4302 = vmatmul.f32.gmra.mxu2 %v5252_v57 }
 0x486   :  { %4577 = vmatmul.f32.gmra.mxu3 %v5252_v57 }
 0x487   :  { %v2383_v15 = vpop.f32.mrf.mxu0  ;;  %v2662_v46 = vpop.f32.mrf.mxu1 }
 0x488   :  { %v2384_v32 = vadd.f32 %v2383_v15, %v6825_v3  ;;  %v3133_v30 = vpop.f32.mrf.mxu2 }
 0x489   :  { %v3472_v50 = vpop.f32.mrf.mxu3 }
 0x48a   :  { %v7355_v52 = vadd.f32 %v2658_v20, %v2384_v32  ;;  %v7357_v4 = vadd.f32 %v3472_v50, %v3133_v30  ;;  %3558 = vmatmul.f32.gmra.mxu0 %v8656_v23  ;;  %3905 = vmatmul.f32.gmra.mxu1 %v8657_v44  ;;  %v8658_v30 = vld [vmem:[#allocation8_spill] sm:$0xff] }
 0x48b   :  { %v8659_v32 = vld [vmem:[#allocation12_spill] sm:$0xff] }
 0x48c   :  { %4306 = vmatmul.f32.gmra.mxu2 %v5254_v58 }
 0x48e   :  { %4581 = vmatmul.f32.gmra.mxu3 %v5254_v58 }
 0x48f   :  { %v2387_v56 = vpop.f32.mrf.mxu0  ;;  %v2666_v57 = vpop.f32.mrf.mxu1 }
 0x490   :  { %v2388_v8 = vadd.f32 %v2387_v56, %v6831_v1  ;;  %v3141_v48 = vpop.f32.mrf.mxu2 }
 0x491   :  { %v3476_v3 = vpop.f32.mrf.mxu3 }
 0x492   :  { %v7364_v15 = vadd.f32 %v2662_v46, %v2388_v8  ;;  %v7366_v20 = vadd.f32 %v3476_v3, %v3141_v48  ;;  %3563 = vmatmul.f32.gmra.mxu0 %v8658_v30  ;;  %3911 = vmatmul.f32.gmra.mxu1 %v8659_v32  ;;  %v8660_v8 = vld [vmem:[#allocation11_spill] sm:$0xff]  ;;  %v8661_v48 = vld [vmem:[#allocation14_spill] sm:$0xff] }
 0x494   :  { %4310 = vmatmul.f32.gmra.mxu2 %v5283_v14 }
 0x496   :  { %4585 = vmatmul.f32.gmra.mxu3 %v5283_v14 }
 0x497   :  { %v2391_v50 = vpop.f32.mrf.mxu0  ;;  %v2670_v58 = vpop.f32.mrf.mxu1 }
 0x498   :  { %v2392_v23 = vadd.f32 %v2391_v50, %v6837_v59  ;;  %v3149_v44 = vpop.f32.mrf.mxu2 }
 0x499   :  { %v3480_v1 = vpop.f32.mrf.mxu3 }
 0x49a   :  { %v7373_v56 = vadd.f32 %v2666_v57, %v2392_v23  ;;  %v7375_v46 = vadd.f32 %v3480_v1, %v3149_v44  ;;  %3568 = vmatmul.f32.gmra.mxu0 %v8660_v8  ;;  %3917 = vmatmul.f32.gmra.mxu1 %v8661_v48  ;;  %v8662_v23 = vld [vmem:[#allocation13_spill] sm:$0xff]  ;;  %v8663_v44 = vld [vmem:[#allocation16_spill] sm:$0xff] }
 0x49c   :  { %4314 = vmatmul.f32.gmra.mxu2 %v5308_v25 }
 0x49e   :  { %4589 = vmatmul.f32.gmra.mxu3 %v5308_v25 }
 0x49f   :  { %v2395_v3 = vpop.f32.mrf.mxu0  ;;  %v2674_v14 = vpop.f32.mrf.mxu1 }
 0x4a0   :  { %v2396_v30 = vadd.f32 %v2395_v3, %v6843_v16  ;;  %v3157_v32 = vpop.f32.mrf.mxu2 }
 0x4a1   :  { %v3484_v59 = vpop.f32.mrf.mxu3 }
 0x4a2   :  { %v7382_v50 = vadd.f32 %v2670_v58, %v2396_v30  ;;  %v7384_v57 = vadd.f32 %v3484_v59, %v3157_v32  ;;  %3573 = vmatmul.f32.gmra.mxu0 %v8662_v23  ;;  %3923 = vmatmul.f32.gmra.mxu1 %v8663_v44  ;;  %v8664_v30 = vld [vmem:[#allocation15_spill] sm:$0xff]  ;;  %v8665_v32 = vld [vmem:[#allocation18_spill] sm:$0xff] }
 0x4a4   :  { %4318 = vmatmul.f32.gmra.mxu2 %v5333_v41 }
 0x4a6   :  { %4593 = vmatmul.f32.gmra.mxu3 %v5333_v41 }
 0x4a7   :  { %v2399_v1 = vpop.f32.mrf.mxu0  ;;  %v2678_v25 = vpop.f32.mrf.mxu1 }
 0x4a8   :  { %v2400_v8 = vadd.f32 %v2399_v1, %v6849_v26  ;;  %v3165_v48 = vpop.f32.mrf.mxu2 }
 0x4a9   :  { %v3488_v16 = vpop.f32.mrf.mxu3 }
 0x4aa   :  { %v7391_v3 = vadd.f32 %v2674_v14, %v2400_v8  ;;  %v7393_v58 = vadd.f32 %v3488_v16, %v3165_v48  ;;  %3578 = vmatmul.f32.gmra.mxu0 %v8664_v30  ;;  %3929 = vmatmul.f32.gmra.mxu1 %v8665_v32  ;;  %v8668_v8 = vld [vmem:[#allocation17_spill] sm:$0xff]  ;;  %v8669_v48 = vld [vmem:[#allocation20_spill] sm:$0xff] }
 0x4ac   :  { %4322 = vmatmul.f32.gmra.mxu2 %v5358_v54 }
 0x4ae   :  { %4597 = vmatmul.f32.gmra.mxu3 %v5358_v54 }
 0x4af   :  { %v2403_v59 = vpop.f32.mrf.mxu0  ;;  %v2682_v41 = vpop.f32.mrf.mxu1 }
 0x4b0   :  { %v2404_v23 = vadd.f32 %v2403_v59, %v6855_v42  ;;  %v3173_v44 = vpop.f32.mrf.mxu2 }
 0x4b1   :  { %v3492_v26 = vpop.f32.mrf.mxu3 }
 0x4b2   :  { %v7400_v1 = vadd.f32 %v2678_v25, %v2404_v23  ;;  %v7402_v14 = vadd.f32 %v3492_v26, %v3173_v44  ;;  %3583 = vmatmul.f32.gmra.mxu0 %v8668_v8  ;;  %3935 = vmatmul.f32.gmra.mxu1 %v8669_v48  ;;  %v8672_v23 = vld [vmem:[#allocation19_spill] sm:$0xff]  ;;  %v8673_v44 = vld [vmem:[#allocation22_spill] sm:$0xff] }
 0x4b4   :  { %8666 = vst [vmem:[#allocation245_spill] sm:$0xff] %v7400_v1  ;;  %4326 = vmatmul.f32.gmra.mxu2 %v5383_v22 }
 0x4b5   :  { %8667 = vst [vmem:[#allocation249_spill] sm:$0xff] %v7402_v14 }
 0x4b6   :  { %4601 = vmatmul.f32.gmra.mxu3 %v5383_v22 }
 0x4b7   :  { %v2407_v16 = vpop.f32.mrf.mxu0  ;;  %v2686_v54 = vpop.f32.mrf.mxu1 }
 0x4b8   :  { %v2408_v30 = vadd.f32 %v2407_v16, %v6861_v55  ;;  %v3181_v32 = vpop.f32.mrf.mxu2 }
 0x4b9   :  { %v3496_v42 = vpop.f32.mrf.mxu3 }
 0x4ba   :  { %v7409_v59 = vadd.f32 %v2682_v41, %v2408_v30  ;;  %v7411_v25 = vadd.f32 %v3496_v42, %v3181_v32  ;;  %3588 = vmatmul.f32.gmra.mxu0 %v8672_v23  ;;  %3941 = vmatmul.f32.gmra.mxu1 %v8673_v44  ;;  %v8676_v30 = vld [vmem:[#allocation21_spill] sm:$0xff]  ;;  %v8678_v23 = vld [vmem:[#allocation262_spill] sm:$0xff] }
 0x4bb   :  { %v8677_v32 = vld [vmem:[#allocation25_spill] sm:$0xff] }
 0x4bc   :  { %8670 = vst [vmem:[#allocation257_spill] sm:$0xff] %v7409_v59  ;;  %4330 = vmatmul.f32.gmra.mxu2 %v5408_v49 }
 0x4bd   :  { %8671 = vst [vmem:[#allocation253_spill] sm:$0xff] %v7411_v25  ;;  %v8721_v25 = vld [vmem:[#allocation48_spill] sm:$0xff] }
 0x4be   :  { %4605 = vmatmul.f32.gmra.mxu3 %v5408_v49 }
 0x4bf   :  { %v2411_v26 = vpop.f32.mrf.mxu0  ;;  %v2690_v22 = vpop.f32.mrf.mxu1 }
 0x4c0   :  { %v2412_v8 = vadd.f32 %v2411_v26, %v6867_v24  ;;  %v3189_v48 = vpop.f32.mrf.mxu2 }
 0x4c1   :  { %v3500_v55 = vpop.f32.mrf.mxu3 }
 0x4c2   :  { %v7418_v16 = vadd.f32 %v2686_v54, %v2412_v8  ;;  %v7420_v41 = vadd.f32 %v3500_v55, %v3189_v48  ;;  %3593 = vmatmul.f32.gmra.mxu0 %v8676_v30  ;;  %3947 = vmatmul.f32.gmra.mxu1 %v8677_v32  ;;  %v8681_v8 = vld [vmem:[#allocation23_spill] sm:$0xff]  ;;  %v8682_v48 = vld [vmem:[#allocation28_spill] sm:$0xff] }
 0x4c3   :  { %v8683_v55 = vld [vmem:[#allocation24_spill] sm:$0xff]  ;;  %v8684_v32 = vld [vmem:[#allocation263_spill] sm:$0xff] }
 0x4c4   :  { %8674 = vst [vmem:[#allocation256_spill] sm:$0xff] %v7418_v16  ;;  %4334 = vmatmul.f32.gmra.mxu2 %v5433_v39 }
 0x4c5   :  { %8675 = vst [vmem:[#allocation261_spill] sm:$0xff] %v7420_v41 }
 0x4c6   :  { %4609 = vmatmul.f32.gmra.mxu3 %v5433_v39 }
 0x4c7   :  { %v2415_v42 = vpop.f32.mrf.mxu0  ;;  %v2694_v49 = vpop.f32.mrf.mxu1 }
 0x4c8   :  { %v2416_v44 = vadd.f32 %v2415_v42, %v8678_v23  ;;  %v3197_v59 = vpop.f32.mrf.mxu2 }
 0x4c9   :  { %v3504_v24 = vpop.f32.mrf.mxu3 }
 0x4ca   :  { %v7427_v26 = vadd.f32 %v2690_v22, %v2416_v44  ;;  %v7429_v54 = vadd.f32 %v3504_v24, %v3197_v59  ;;  %3598 = vmatmul.f32.gmra.mxu0 %v8681_v8  ;;  %3953 = vmatmul.f32.gmra.mxu1 %v8682_v48  ;;  %v8687_v59 = vld [vmem:[#allocation26_spill] sm:$0xff]  ;;  %v8688_v44 = vld [vmem:[#allocation31_spill] sm:$0xff] }
 0x4cb   :  { %v8689_v24 = vld [vmem:[#allocation27_spill] sm:$0xff] }
 0x4cc   :  { %8679 = vst [vmem:[#allocation6_spill] sm:$0xff] %v7427_v26  ;;  %4338 = vmatmul.f32.gmra.mxu2 %v8683_v55 }
 0x4cd   :  { %8680 = vst [vmem:[#allocation5_spill] sm:$0xff] %v7429_v54 }
 0x4ce   :  { %4613 = vmatmul.f32.gmra.mxu3 %v8683_v55  ;;  %v8690_v55 = vld [vmem:[#allocation34_spill] sm:$0xff] }
 0x4cf   :  { %v2419_v30 = vpop.f32.mrf.mxu0  ;;  %v2698_v39 = vpop.f32.mrf.mxu1 }
 0x4d0   :  { %v2420_v16 = vadd.f32 %v2419_v30, %v8684_v32  ;;  %v3205_v41 = vpop.f32.mrf.mxu2 }
 0x4d1   :  { %v3508_v42 = vpop.f32.mrf.mxu3 }
 0x4d2   :  { %v7436_v23 = vadd.f32 %v2694_v49, %v2420_v16  ;;  %v7438_v22 = vadd.f32 %v3508_v42, %v3205_v41  ;;  %3603 = vmatmul.f32.gmra.mxu0 %v8687_v59  ;;  %3959 = vmatmul.f32.gmra.mxu1 %v8688_v44  ;;  %v8693_v41 = vld [vmem:[#allocation29_spill] sm:$0xff]  ;;  %v8694_v49 = vld [vmem:[#allocation35_spill] sm:$0xff]  ;;  %v8695_v42 = vld [vmem:[#allocation30_spill] sm:$0xff] }
 0x4d4   :  { %8685 = vst [vmem:[#allocation9_spill] sm:$0xff] %v7436_v23  ;;  %4342 = vmatmul.f32.gmra.mxu2 %v8689_v24 }
 0x4d5   :  { %8686 = vst [vmem:[#allocation7_spill] sm:$0xff] %v7438_v22 }
 0x4d6   :  { %4617 = vmatmul.f32.gmra.mxu3 %v8689_v24  ;;  %v8696_v24 = vld [vmem:[#allocation38_spill] sm:$0xff] }
 0x4d7   :  { %v2423_v8 = vpop.f32.mrf.mxu0  ;;  %v2702_v48 = vpop.f32.mrf.mxu1 }
 0x4d8   :  { %v2424_v26 = vadd.f32 %v2423_v8, %v8690_v55  ;;  %v3213_v54 = vpop.f32.mrf.mxu2 }
 0x4d9   :  { %v3512_v30 = vpop.f32.mrf.mxu3 }
 0x4da   :  { %v7445_v32 = vadd.f32 %v2698_v39, %v2424_v26  ;;  %v7447_v16 = vadd.f32 %v3512_v30, %v3213_v54  ;;  %3608 = vmatmul.f32.gmra.mxu0 %v8693_v41  ;;  %3965 = vmatmul.f32.gmra.mxu1 %v8694_v49  ;;  %v8699_v54 = vld [vmem:[#allocation32_spill] sm:$0xff]  ;;  %v8700_v39 = vld [vmem:[#allocation39_spill] sm:$0xff]  ;;  %v8701_v30 = vld [vmem:[#allocation33_spill] sm:$0xff] }
 0x4dc   :  { %8691 = vst [vmem:[#allocation10_spill] sm:$0xff] %v7445_v32  ;;  %4346 = vmatmul.f32.gmra.mxu2 %v8695_v42 }
 0x4dd   :  { %8692 = vst [vmem:[#allocation8_spill] sm:$0xff] %v7447_v16 }
 0x4de   :  { %4621 = vmatmul.f32.gmra.mxu3 %v8695_v42  ;;  %v8702_v42 = vld [vmem:[#allocation42_spill] sm:$0xff] }
 0x4df   :  { %v2427_v59 = vpop.f32.mrf.mxu0  ;;  %v2706_v44 = vpop.f32.mrf.mxu1 }
 0x4e0   :  { %v2428_v23 = vadd.f32 %v2427_v59, %v8696_v24  ;;  %v3221_v22 = vpop.f32.mrf.mxu2 }
 0x4e1   :  { %v3516_v8 = vpop.f32.mrf.mxu3 }
 0x4e2   :  { %v7454_v55 = vadd.f32 %v2702_v48, %v2428_v23  ;;  %v7456_v26 = vadd.f32 %v3516_v8, %v3221_v22  ;;  %3613 = vmatmul.f32.gmra.mxu0 %v8699_v54  ;;  %3971 = vmatmul.f32.gmra.mxu1 %v8700_v39  ;;  %v8705_v22 = vld [vmem:[#allocation36_spill] sm:$0xff]  ;;  %v8706_v48 = vld [vmem:[#allocation43_spill] sm:$0xff]  ;;  %v8707_v8 = vld [vmem:[#allocation37_spill] sm:$0xff] }
 0x4e4   :  { %8697 = vst [vmem:[#allocation12_spill] sm:$0xff] %v7454_v55  ;;  %4350 = vmatmul.f32.gmra.mxu2 %v8701_v30 }
 0x4e5   :  { %8698 = vst [vmem:[#allocation11_spill] sm:$0xff] %v7456_v26 }
 0x4e6   :  { %4625 = vmatmul.f32.gmra.mxu3 %v8701_v30  ;;  %v8708_v30 = vld [vmem:[#allocation46_spill] sm:$0xff] }
 0x4e7   :  { %v2431_v41 = vpop.f32.mrf.mxu0  ;;  %v2710_v49 = vpop.f32.mrf.mxu1 }
 0x4e8   :  { %v2432_v32 = vadd.f32 %v2431_v41, %v8702_v42  ;;  %v3229_v16 = vpop.f32.mrf.mxu2 }
 0x4e9   :  { %v3520_v59 = vpop.f32.mrf.mxu3 }
 0x4ea   :  { %v7463_v24 = vadd.f32 %v2706_v44, %v2432_v32  ;;  %v7465_v23 = vadd.f32 %v3520_v59, %v3229_v16  ;;  %3618 = vmatmul.f32.gmra.mxu0 %v8705_v22  ;;  %3977 = vmatmul.f32.gmra.mxu1 %v8706_v48  ;;  %v8711_v16 = vld [vmem:[#allocation40_spill] sm:$0xff]  ;;  %v8712_v44 = vld [vmem:[#allocation47_spill] sm:$0xff]  ;;  %v8713_v59 = vld [vmem:[#allocation41_spill] sm:$0xff] }
 0x4ec   :  { %8703 = vst [vmem:[#allocation14_spill] sm:$0xff] %v7463_v24  ;;  %4354 = vmatmul.f32.gmra.mxu2 %v8707_v8 }
 0x4ed   :  { %8704 = vst [vmem:[#allocation13_spill] sm:$0xff] %v7465_v23 }
 0x4ee   :  { %4629 = vmatmul.f32.gmra.mxu3 %v8707_v8  ;;  %v8714_v8 = vld [vmem:[#allocation50_spill] sm:$0xff] }
 0x4ef   :  { %v2435_v54 = vpop.f32.mrf.mxu0  ;;  %v2714_v39 = vpop.f32.mrf.mxu1 }
 0x4f0   :  { %v2436_v55 = vadd.f32 %v2435_v54, %v8708_v30  ;;  %v3237_v26 = vpop.f32.mrf.mxu2 }
 0x4f1   :  { %v3524_v41 = vpop.f32.mrf.mxu3 }
 0x4f2   :  { %v7472_v42 = vadd.f32 %v2710_v49, %v2436_v55  ;;  %v7474_v32 = vadd.f32 %v3524_v41, %v3237_v26  ;;  %3623 = vmatmul.f32.gmra.mxu0 %v8711_v16  ;;  %3983 = vmatmul.f32.gmra.mxu1 %v8712_v44  ;;  %v8717_v26 = vld [vmem:[#allocation44_spill] sm:$0xff]  ;;  %v8718_v49 = vld [vmem:[#allocation51_spill] sm:$0xff]  ;;  %v8719_v41 = vld [vmem:[#allocation45_spill] sm:$0xff] }
 0x4f4   :  { %8709 = vst [vmem:[#allocation16_spill] sm:$0xff] %v7472_v42  ;;  %4358 = vmatmul.f32.gmra.mxu2 %v8713_v59 }
 0x4f5   :  { %8710 = vst [vmem:[#allocation15_spill] sm:$0xff] %v7474_v32 }
 0x4f6   :  { %4633 = vmatmul.f32.gmra.mxu3 %v8713_v59  ;;  %v8720_v59 = vld [vmem:[#allocation57_spill] sm:$0xff] }
 0x4f7   :  { %v2439_v22 = vpop.f32.mrf.mxu0  ;;  %v3894_v48 = vpop.f32.mrf.mxu1 }
 0x4f8   :  { %v2440_v24 = vadd.f32 %v2439_v22, %v8714_v8  ;;  %v3245_v23 = vpop.f32.mrf.mxu2 }
 0x4f9   :  { %v3528_v54 = vpop.f32.mrf.mxu3 }
 0x4fa   :  { %v7481_v30 = vadd.f32 %v2714_v39, %v2440_v24  ;;  %v7483_v55 = vadd.f32 %v3528_v54, %v3245_v23  ;;  %3628 = vmatmul.f32.gmra.mxu0 %v8717_v26  ;;  %3989 = vmatmul.f32.gmra.mxu1 %v8718_v49  ;;  %v8722_v24 = vld [vmem:[#allocation55_spill] sm:$0xff]  ;;  %v8723_v39 = vld [vmem:[#allocation49_spill] sm:$0xff] }
 0x4fc   :  { %8715 = vst [vmem:[#allocation18_spill] sm:$0xff] %v7481_v30  ;;  %4362 = vmatmul.f32.gmra.mxu2 %v8719_v41 }
 0x4fd   :  { %8716 = vst [vmem:[#allocation17_spill] sm:$0xff] %v7483_v55  ;;  %v8725_v55 = vld [vmem:[#allocation62_spill] sm:$0xff] }
 0x4fe   :  { %4637 = vmatmul.f32.gmra.mxu3 %v8719_v41  ;;  %v8724_v41 = vld [vmem:[#allocation54_spill] sm:$0xff] }
 0x4ff   :  { %v3554_v16 = vpop.f32.mrf.mxu0  ;;  %v3900_v44 = vpop.f32.mrf.mxu1 }
 0x500   :  { %v3555_v42 = vadd.f32 %v3554_v16, %v8720_v59  ;;  %v4299_v32 = vpop.f32.mrf.mxu2 }
 0x501   :  { %v4574_v22 = vpop.f32.mrf.mxu3 }
 0x502   :  { %v3895_v8 = vadd.f32 %v3894_v48, %v3555_v42  ;;  %3633 = vmatmul.f32.gmra.mxu0 %v8721_v25  ;;  %3995 = vmatmul.f32.gmra.mxu1 %v8722_v24  ;;  %v8726_v42 = vld [vmem:[#allocation52_spill] sm:$0xff] }
 0x504   :  { %v4300_v23 = vadd.f32 %v4299_v32, %v3895_v8  ;;  %4366 = vmatmul.f32.gmra.mxu2 %v8723_v39  ;;  %v8727_v32 = vld [vmem:[#allocation60_spill] sm:$0xff] }
 0x506   :  { %v4575_v54 = vadd.f32 %v4574_v22, %v4300_v23  ;;  %4641 = vmatmul.f32.gmra.mxu3 %v8723_v39  ;;  %v8728_v22 = vld [vmem:[#allocation53_spill] sm:$0xff]  ;;  %v8729_v39 = vld [vmem:[#allocation59_spill] sm:$0xff] }
 0x507   :  { %v3559_v26 = vpop.f32.mrf.mxu0  ;;  %v3906_v49 = vpop.f32.mrf.mxu1 }
 0x508   :  { %v4829_v30 = vmax.f32 %v8724_v41, %v4575_v54  ;;  %v3560_v16 = vadd.f32 %v3559_v26, %v8725_v55  ;;  %v4303_v59 = vpop.f32.mrf.mxu2  ;;  %v8730_v55 = vld [vmem:[#allocation67_spill] sm:$0xff] }
 0x509   :  { %v4578_v1 = vpop.f32.mrf.mxu3 }
 0x50a   :  { %4894 = vst.msk [vmem:[#allocation2] sm:$0xff] %vm4893_vm5, %v4829_v30  ;;  %v3901_v25 = vadd.f32 %v3900_v44, %v3560_v16  ;;  %3638 = vmatmul.f32.gmra.mxu0 %v8726_v42  ;;  %4001 = vmatmul.f32.gmra.mxu1 %v8727_v32  ;;  %v8731_v44 = vld [vmem:[#allocation56_spill] sm:$0xff]  ;;  %v8732_v16 = vld [vmem:[#allocation65_spill] sm:$0xff] }
 0x50c   :  { %v4304_v48 = vadd.f32 %v4303_v59, %v3901_v25  ;;  %4370 = vmatmul.f32.gmra.mxu2 %v8728_v22  ;;  %v8733_v25 = vld [vmem:[#allocation58_spill] sm:$0xff] }
 0x50e   :  { %v4579_v8 = vadd.f32 %v4578_v1, %v4304_v48  ;;  %4645 = vmatmul.f32.gmra.mxu3 %v8728_v22  ;;  %v8734_v48 = vld [vmem:[#allocation64_spill] sm:$0xff] }
 0x50f   :  { %v3564_v24 = vpop.f32.mrf.mxu0  ;;  %v3912_v23 = vpop.f32.mrf.mxu1 }
 0x510   :  { %v4830_v54 = vmax.f32 %v8729_v39, %v4579_v8  ;;  %v3565_v26 = vadd.f32 %v3564_v24, %v8730_v55  ;;  %v4307_v41 = vpop.f32.mrf.mxu2  ;;  %v8735_v8 = vld [vmem:[#allocation72_spill] sm:$0xff] }
 0x511   :  { %v4582_v14 = vpop.f32.mrf.mxu3 }
 0x512   :  { %4895 = vst.msk [vmem:[#allocation2 + $0x8] sm:$0xff] %vm4893_vm5, %v4830_v54  ;;  %v3907_v30 = vadd.f32 %v3906_v49, %v3565_v26  ;;  %3643 = vmatmul.f32.gmra.mxu0 %v8731_v44  ;;  %4007 = vmatmul.f32.gmra.mxu1 %v8732_v16  ;;  %v8736_v54 = vld [vmem:[#allocation61_spill] sm:$0xff]  ;;  %v8737_v26 = vld [vmem:[#allocation70_spill] sm:$0xff] }
 0x514   :  { %v4308_v59 = vadd.f32 %v4307_v41, %v3907_v30  ;;  %4374 = vmatmul.f32.gmra.mxu2 %v8733_v25  ;;  %v8738_v30 = vld [vmem:[#allocation63_spill] sm:$0xff] }
 0x516   :  { %v4583_v1 = vadd.f32 %v4582_v14, %v4308_v59  ;;  %4649 = vmatmul.f32.gmra.mxu3 %v8733_v25  ;;  %v8739_v59 = vld [vmem:[#allocation69_spill] sm:$0xff] }
 0x517   :  { %v3569_v42 = vpop.f32.mrf.mxu0  ;;  %v3918_v32 = vpop.f32.mrf.mxu1 }
 0x518   :  { %v4831_v22 = vmax.f32 %v8734_v48, %v4583_v1  ;;  %v3570_v24 = vadd.f32 %v3569_v42, %v8735_v8  ;;  %v4311_v39 = vpop.f32.mrf.mxu2  ;;  %v8740_v1 = vld [vmem:[#allocation77_spill] sm:$0xff] }
 0x519   :  { %v4586_v55 = vpop.f32.mrf.mxu3 }
 0x51a   :  { %4896 = vst.msk [vmem:[#allocation2 + $0x10] sm:$0xff] %vm4893_vm5, %v4831_v22  ;;  %v3913_v49 = vadd.f32 %v3912_v23, %v3570_v24  ;;  %3648 = vmatmul.f32.gmra.mxu0 %v8736_v54  ;;  %4013 = vmatmul.f32.gmra.mxu1 %v8737_v26  ;;  %v8741_v22 = vld [vmem:[#allocation66_spill] sm:$0xff]  ;;  %v8742_v24 = vld [vmem:[#allocation75_spill] sm:$0xff] }
 0x51c   :  { %v4312_v41 = vadd.f32 %v4311_v39, %v3913_v49  ;;  %4378 = vmatmul.f32.gmra.mxu2 %v8738_v30  ;;  %v8743_v49 = vld [vmem:[#allocation68_spill] sm:$0xff] }
 0x51e   :  { %v4587_v14 = vadd.f32 %v4586_v55, %v4312_v41  ;;  %4653 = vmatmul.f32.gmra.mxu3 %v8738_v30  ;;  %v8744_v41 = vld [vmem:[#allocation74_spill] sm:$0xff] }
 0x51f   :  { %v3574_v44 = vpop.f32.mrf.mxu0  ;;  %v3924_v16 = vpop.f32.mrf.mxu1 }
 0x520   :  { %v4832_v25 = vmax.f32 %v8739_v59, %v4587_v14  ;;  %v3575_v42 = vadd.f32 %v3574_v44, %v8740_v1  ;;  %v4315_v48 = vpop.f32.mrf.mxu2  ;;  %v8745_v14 = vld [vmem:[#allocation82_spill] sm:$0xff] }
 0x521   :  { %v4590_v8 = vpop.f32.mrf.mxu3 }
 0x522   :  { %4897 = vst.msk [vmem:[#allocation2 + $0x18] sm:$0xff] %vm4893_vm5, %v4832_v25  ;;  %v3919_v23 = vadd.f32 %v3918_v32, %v3575_v42  ;;  %3653 = vmatmul.f32.gmra.mxu0 %v8741_v22  ;;  %4019 = vmatmul.f32.gmra.mxu1 %v8742_v24  ;;  %v8746_v25 = vld [vmem:[#allocation71_spill] sm:$0xff]  ;;  %v8747_v42 = vld [vmem:[#allocation80_spill] sm:$0xff] }
 0x524   :  { %v4316_v39 = vadd.f32 %v4315_v48, %v3919_v23  ;;  %4382 = vmatmul.f32.gmra.mxu2 %v8743_v49  ;;  %v8748_v23 = vld [vmem:[#allocation73_spill] sm:$0xff] }
 0x526   :  { %v4591_v55 = vadd.f32 %v4590_v8, %v4316_v39  ;;  %4657 = vmatmul.f32.gmra.mxu3 %v8743_v49  ;;  %v8749_v39 = vld [vmem:[#allocation79_spill] sm:$0xff] }
 0x527   :  { %v3579_v54 = vpop.f32.mrf.mxu0  ;;  %v3930_v26 = vpop.f32.mrf.mxu1 }
 0x528   :  { %v4833_v30 = vmax.f32 %v8744_v41, %v4591_v55  ;;  %v3580_v44 = vadd.f32 %v3579_v54, %v8745_v14  ;;  %v4319_v59 = vpop.f32.mrf.mxu2  ;;  %v8750_v55 = vld [vmem:[#allocation87_spill] sm:$0xff] }
 0x529   :  { %v4594_v1 = vpop.f32.mrf.mxu3 }
 0x52a   :  { %4898 = vst.msk [vmem:[#allocation2 + $0x20] sm:$0xff] %vm4893_vm5, %v4833_v30  ;;  %v3925_v32 = vadd.f32 %v3924_v16, %v3580_v44  ;;  %3658 = vmatmul.f32.gmra.mxu0 %v8746_v25  ;;  %4025 = vmatmul.f32.gmra.mxu1 %v8747_v42  ;;  %v8751_v30 = vld [vmem:[#allocation76_spill] sm:$0xff]  ;;  %v8752_v44 = vld [vmem:[#allocation85_spill] sm:$0xff] }
 0x52c   :  { %v4320_v48 = vadd.f32 %v4319_v59, %v3925_v32  ;;  %4386 = vmatmul.f32.gmra.mxu2 %v8748_v23  ;;  %v8753_v32 = vld [vmem:[#allocation78_spill] sm:$0xff] }
 0x52e   :  { %v4595_v8 = vadd.f32 %v4594_v1, %v4320_v48  ;;  %4661 = vmatmul.f32.gmra.mxu3 %v8748_v23  ;;  %v8754_v48 = vld [vmem:[#allocation84_spill] sm:$0xff] }
 0x52f   :  { %v3584_v22 = vpop.f32.mrf.mxu0  ;;  %v3936_v24 = vpop.f32.mrf.mxu1 }
 0x530   :  { %v4834_v49 = vmax.f32 %v8749_v39, %v4595_v8  ;;  %v3585_v54 = vadd.f32 %v3584_v22, %v8750_v55  ;;  %v4323_v41 = vpop.f32.mrf.mxu2  ;;  %v8755_v8 = vld [vmem:[#allocation92_spill] sm:$0xff] }
 0x531   :  { %v4598_v14 = vpop.f32.mrf.mxu3 }
 0x532   :  { %4899 = vst.msk [vmem:[#allocation2 + $0x28] sm:$0xff] %vm4893_vm5, %v4834_v49  ;;  %v3931_v16 = vadd.f32 %v3930_v26, %v3585_v54  ;;  %3663 = vmatmul.f32.gmra.mxu0 %v8751_v30  ;;  %4031 = vmatmul.f32.gmra.mxu1 %v8752_v44  ;;  %v8756_v49 = vld [vmem:[#allocation81_spill] sm:$0xff]  ;;  %v8757_v54 = vld [vmem:[#allocation90_spill] sm:$0xff] }
 0x534   :  { %v4324_v59 = vadd.f32 %v4323_v41, %v3931_v16  ;;  %4390 = vmatmul.f32.gmra.mxu2 %v8753_v32  ;;  %v8758_v16 = vld [vmem:[#allocation83_spill] sm:$0xff] }
 0x536   :  { %v4599_v1 = vadd.f32 %v4598_v14, %v4324_v59  ;;  %4665 = vmatmul.f32.gmra.mxu3 %v8753_v32  ;;  %v8759_v59 = vld [vmem:[#allocation89_spill] sm:$0xff] }
 0x537   :  { %v3589_v25 = vpop.f32.mrf.mxu0  ;;  %v3942_v42 = vpop.f32.mrf.mxu1 }
 0x538   :  { %v4835_v23 = vmax.f32 %v8754_v48, %v4599_v1  ;;  %v3590_v22 = vadd.f32 %v3589_v25, %v8755_v8  ;;  %v4327_v39 = vpop.f32.mrf.mxu2  ;;  %v8760_v1 = vld [vmem:[#allocation97_spill] sm:$0xff] }
 0x539   :  { %v4602_v55 = vpop.f32.mrf.mxu3 }
 0x53a   :  { %4900 = vst.msk [vmem:[#allocation2 + $0x30] sm:$0xff] %vm4893_vm5, %v4835_v23  ;;  %v3937_v26 = vadd.f32 %v3936_v24, %v3590_v22  ;;  %3668 = vmatmul.f32.gmra.mxu0 %v8756_v49  ;;  %4037 = vmatmul.f32.gmra.mxu1 %v8757_v54  ;;  %v8761_v23 = vld [vmem:[#allocation86_spill] sm:$0xff]  ;;  %v8762_v22 = vld [vmem:[#allocation95_spill] sm:$0xff] }
 0x53c   :  { %v4328_v41 = vadd.f32 %v4327_v39, %v3937_v26  ;;  %4394 = vmatmul.f32.gmra.mxu2 %v8758_v16  ;;  %v8763_v26 = vld [vmem:[#allocation88_spill] sm:$0xff] }
 0x53e   :  { %v4603_v14 = vadd.f32 %v4602_v55, %v4328_v41  ;;  %4669 = vmatmul.f32.gmra.mxu3 %v8758_v16  ;;  %v8764_v41 = vld [vmem:[#allocation94_spill] sm:$0xff] }
 0x53f   :  { %v3594_v30 = vpop.f32.mrf.mxu0  ;;  %v3948_v44 = vpop.f32.mrf.mxu1 }
 0x540   :  { %v4836_v32 = vmax.f32 %v8759_v59, %v4603_v14  ;;  %v3595_v25 = vadd.f32 %v3594_v30, %v8760_v1  ;;  %v4331_v48 = vpop.f32.mrf.mxu2  ;;  %v8765_v14 = vld [vmem:[#allocation102_spill] sm:$0xff] }
 0x541   :  { %v4606_v8 = vpop.f32.mrf.mxu3 }
 0x542   :  { %4901 = vst.msk [vmem:[#allocation2 + $0x38] sm:$0xff] %vm4893_vm5, %v4836_v32  ;;  %v3943_v24 = vadd.f32 %v3942_v42, %v3595_v25  ;;  %3673 = vmatmul.f32.gmra.mxu0 %v8761_v23  ;;  %4043 = vmatmul.f32.gmra.mxu1 %v8762_v22  ;;  %v8766_v32 = vld [vmem:[#allocation91_spill] sm:$0xff]  ;;  %v8767_v25 = vld [vmem:[#allocation100_spill] sm:$0xff] }
 0x544   :  { %v4332_v39 = vadd.f32 %v4331_v48, %v3943_v24  ;;  %4398 = vmatmul.f32.gmra.mxu2 %v8763_v26  ;;  %v8768_v24 = vld [vmem:[#allocation93_spill] sm:$0xff] }
 0x546   :  { %v4607_v55 = vadd.f32 %v4606_v8, %v4332_v39  ;;  %4673 = vmatmul.f32.gmra.mxu3 %v8763_v26  ;;  %v8769_v39 = vld [vmem:[#allocation99_spill] sm:$0xff] }
 0x547   :  { %v3599_v49 = vpop.f32.mrf.mxu0  ;;  %v3954_v54 = vpop.f32.mrf.mxu1 }
 0x548   :  { %v4837_v16 = vmax.f32 %v8764_v41, %v4607_v55  ;;  %v3600_v30 = vadd.f32 %v3599_v49, %v8765_v14  ;;  %v4335_v59 = vpop.f32.mrf.mxu2  ;;  %v8770_v55 = vld [vmem:[#allocation107_spill] sm:$0xff] }
 0x549   :  { %v4610_v1 = vpop.f32.mrf.mxu3 }
 0x54a   :  { %4902 = vst.msk [vmem:[#allocation2 + $0x40] sm:$0xff] %vm4893_vm5, %v4837_v16  ;;  %v3949_v42 = vadd.f32 %v3948_v44, %v3600_v30  ;;  %3678 = vmatmul.f32.gmra.mxu0 %v8766_v32  ;;  %4049 = vmatmul.f32.gmra.mxu1 %v8767_v25  ;;  %v8771_v16 = vld [vmem:[#allocation96_spill] sm:$0xff]  ;;  %v8772_v30 = vld [vmem:[#allocation105_spill] sm:$0xff] }
 0x54b   :  { %v8773_v25 = vld [vmem:[#allocation104_spill] sm:$0xff] }
 0x54c   :  { %v4336_v48 = vadd.f32 %v4335_v59, %v3949_v42  ;;  %4402 = vmatmul.f32.gmra.mxu2 %v8768_v24 }
 0x54e   :  { %v4611_v8 = vadd.f32 %v4610_v1, %v4336_v48  ;;  %4677 = vmatmul.f32.gmra.mxu3 %v8768_v24 }
 0x54f   :  { %v3604_v23 = vpop.f32.mrf.mxu0  ;;  %v3960_v22 = vpop.f32.mrf.mxu1 }
 0x550   :  { %v4838_v26 = vmax.f32 %v8769_v39, %v4611_v8  ;;  %v3605_v49 = vadd.f32 %v3604_v23, %v8770_v55  ;;  %v4339_v41 = vpop.f32.mrf.mxu2  ;;  %v8774_v39 = vld [vmem:[#allocation101_spill] sm:$0xff] }
 0x551   :  { %v4614_v14 = vpop.f32.mrf.mxu3 }
 0x552   :  { %4903 = vst.msk [vmem:[#allocation2 + $0x48] sm:$0xff] %vm4893_vm5, %v4838_v26  ;;  %v3955_v44 = vadd.f32 %v3954_v54, %v3605_v49  ;;  %3683 = vmatmul.f32.gmra.mxu0 %v8771_v16  ;;  %4055 = vmatmul.f32.gmra.mxu1 %v8772_v30  ;;  %v8775_v26 = vld [vmem:[#allocation110_spill] sm:$0xff] }
 0x554   :  { %v4340_v59 = vadd.f32 %v4339_v41, %v3955_v44  ;;  %4406 = vmatmul.f32.gmra.mxu2 %v8504_v33 }
 0x556   :  { %v4615_v1 = vadd.f32 %v4614_v14, %v4340_v59  ;;  %4681 = vmatmul.f32.gmra.mxu3 %v8504_v33  ;;  %v8776_v14 = vld [vmem:[#allocation98_spill] sm:$0xff] }
 0x557   :  { %v3609_v42 = vpop.f32.mrf.mxu0  ;;  %v3966_v32 = vpop.f32.mrf.mxu1  ;;  %v8777_v59 = vld [vmem:[#allocation106_spill] sm:$0xff] }
 0x558   :  { %v4839_v48 = vmax.f32 %v8773_v25, %v4615_v1  ;;  %v3610_v24 = vadd.f32 %v3609_v42, %v7015_v29  ;;  %v4343_v8 = vpop.f32.mrf.mxu2  ;;  %v8778_v1 = vld [vmem:[#allocation115_spill] sm:$0xff] }
 0x559   :  { %v4618_v23 = vpop.f32.mrf.mxu3 }
 0x55a   :  { %4904 = vst.msk [vmem:[#allocation2 + $0x50] sm:$0xff] %vm4893_vm5, %v4839_v48  ;;  %v3961_v54 = vadd.f32 %v3960_v22, %v3610_v24  ;;  %3688 = vmatmul.f32.gmra.mxu0 %v8774_v39  ;;  %4061 = vmatmul.f32.gmra.mxu1 %v8775_v26  ;;  %v8780_v39 = vld [vmem:[#allocation119_spill] sm:$0xff] }
 0x55c   :  { %v4344_v55 = vadd.f32 %v4343_v8, %v3961_v54  ;;  %4410 = vmatmul.f32.gmra.mxu2 %v8508_v17  ;;  %v8779_v54 = vld [vmem:[#allocation111_spill] sm:$0xff] }
 0x55e   :  { %v4619_v49 = vadd.f32 %v4618_v23, %v4344_v55  ;;  %4685 = vmatmul.f32.gmra.mxu3 %v8508_v17  ;;  %v8781_v55 = vld [vmem:[#allocation113_spill] sm:$0xff] }
 0x55f   :  { %v3614_v33 = vpop.f32.mrf.mxu0  ;;  %v3972_v41 = vpop.f32.mrf.mxu1 }
 0x560   :  { %v4840_v44 = vmax.f32 %v8776_v14, %v4619_v49  ;;  %v3615_v29 = vadd.f32 %v3614_v33, %v7024_v31  ;;  %v4347_v16 = vpop.f32.mrf.mxu2 }
 0x561   :  { %v4622_v30 = vpop.f32.mrf.mxu3 }
 0x562   :  { %4905 = vst.msk [vmem:[#allocation2 + $0x58] sm:$0xff] %vm4893_vm5, %v4840_v44  ;;  %v3967_v22 = vadd.f32 %v3966_v32, %v3615_v29  ;;  %3693 = vmatmul.f32.gmra.mxu0 %v8777_v59  ;;  %4067 = vmatmul.f32.gmra.mxu1 %v8778_v1  ;;  %v8786_v1 = vld [vmem:[#allocation118_spill] sm:$0xff] }
 0x564   :  { %v4348_v42 = vadd.f32 %v4347_v16, %v3967_v22  ;;  %4414 = vmatmul.f32.gmra.mxu2 %v8511_v5  ;;  %v8785_v22 = vld [vmem:[#allocation122_spill] sm:$0xff] }
 0x566   :  { %v4623_v25 = vadd.f32 %v4622_v30, %v4348_v42  ;;  %4689 = vmatmul.f32.gmra.mxu3 %v8511_v5  ;;  %v8784_v30 = vld [vmem:[#allocation116_spill] sm:$0xff] }
 0x567   :  { %v3619_v17 = vpop.f32.mrf.mxu0  ;;  %v3978_v48 = vpop.f32.mrf.mxu1 }
 0x568   :  { %v4841_v24 = vmax.f32 %v7022_v45, %v4623_v25  ;;  %v3620_v31 = vadd.f32 %v3619_v17, %v7033_v43  ;;  %v4351_v8 = vpop.f32.mrf.mxu2  ;;  %v8782_v45 = vld [vmem:[#allocation109_spill] sm:$0xff]  ;;  %v8783_v43 = vld [vmem:[#allocation103_spill] sm:$0xff] }
 0x569   :  { %v4626_v23 = vpop.f32.mrf.mxu3 }
 0x56a   :  { %4906 = vst.msk [vmem:[#allocation2 + $0x60] sm:$0xff] %vm4893_vm5, %v4841_v24  ;;  %v3973_v32 = vadd.f32 %v3972_v41, %v3620_v31  ;;  %3698 = vmatmul.f32.gmra.mxu0 %v8779_v54  ;;  %4073 = vmatmul.f32.gmra.mxu1 %v8780_v39  ;;  %v8787_v24 = vld [vmem:[#allocation112_spill] sm:$0xff] }
 0x56b   :  { %v8789_v39 = vld [vmem:[#allocation120_spill] sm:$0xff] }
 0x56c   :  { %v4352_v26 = vadd.f32 %v4351_v8, %v3973_v32  ;;  %4418 = vmatmul.f32.gmra.mxu2 %v8781_v55  ;;  %v8788_v8 = vld [vmem:[#allocation117_spill] sm:$0xff] }
 0x56e   :  { %v4627_v49 = vadd.f32 %v4626_v23, %v4352_v26  ;;  %4693 = vmatmul.f32.gmra.mxu3 %v8781_v55  ;;  %v8790_v26 = vld [vmem:[#allocation125_spill] sm:$0xff] }
 0x56f   :  { %v3624_v5 = vpop.f32.mrf.mxu0  ;;  %v3984_v33 = vpop.f32.mrf.mxu1 }
 0x570   :  { %v4842_v14 = vmax.f32 %v8782_v45, %v4627_v49  ;;  %v3625_v44 = vadd.f32 %v3624_v5, %v8783_v43  ;;  %v4355_v29 = vpop.f32.mrf.mxu2  ;;  %v8791_v49 = vld [vmem:[#allocation121_spill] sm:$0xff]  ;;  %v8792_v43 = vld [vmem:[#allocation114_spill] sm:$0xff] }
 0x571   :  { %v4630_v16 = vpop.f32.mrf.mxu3 }
 0x572   :  { %4907 = vst.msk [vmem:[#allocation2 + $0x68] sm:$0xff] %vm4893_vm5, %v4842_v14  ;;  %v3979_v41 = vadd.f32 %v3978_v48, %v3625_v44  ;;  %3703 = vmatmul.f32.gmra.mxu0 %v8784_v30  ;;  %4079 = vmatmul.f32.gmra.mxu1 %v8785_v22  ;;  %v8794_v22 = vld [vmem:[#allocation123_spill] sm:$0xff] }
 0x574   :  { %v4356_v59 = vadd.f32 %v4355_v29, %v3979_v41  ;;  %4422 = vmatmul.f32.gmra.mxu2 %v8786_v1  ;;  %v8793_v29 = vld [vmem:[#allocation127_spill] sm:$0xff] }
 0x576   :  { %v4631_v42 = vadd.f32 %v4630_v16, %v4356_v59  ;;  %4697 = vmatmul.f32.gmra.mxu3 %v8786_v1  ;;  %v8795_v59 = vld [vmem:[#allocation130_spill] sm:$0xff] }
 0x577   :  { %v3629_v25 = vpop.f32.mrf.mxu0  ;;  %v3990_v17 = vpop.f32.mrf.mxu1 }
 0x578   :  { %v4843_v31 = vmax.f32 %v8787_v24, %v4631_v42  ;;  %v3630_v23 = vadd.f32 %v3629_v25, %v8788_v8  ;;  %v4359_v32 = vpop.f32.mrf.mxu2  ;;  %v8796_v42 = vld [vmem:[#allocation124_spill] sm:$0xff] }
 0x579   :  { %v4634_v54 = vpop.f32.mrf.mxu3  ;;  %v8797_v8 = vld [vmem:[#allocation108_spill] sm:$0xff] }
 0x57a   :  { %4908 = vst.msk [vmem:[#allocation2 + $0x70] sm:$0xff] %vm4893_vm5, %v4843_v31  ;;  %v3985_v48 = vadd.f32 %v3984_v33, %v3630_v23  ;;  %3708 = vmatmul.f32.gmra.mxu0 %v8789_v39  ;;  %4085 = vmatmul.f32.gmra.mxu1 %v8790_v26  ;;  %v8799_v26 = vld [vmem:[#allocation126_spill] sm:$0xff] }
 0x57c   :  { %v4360_v55 = vadd.f32 %v4359_v32, %v3985_v48  ;;  %4426 = vmatmul.f32.gmra.mxu2 %v8791_v49  ;;  %v8798_v32 = vld [vmem:[#allocation132_spill] sm:$0xff] }
 0x57e   :  { %v4635_v5 = vadd.f32 %v4634_v54, %v4360_v55  ;;  %4701 = vmatmul.f32.gmra.mxu3 %v8791_v49  ;;  %v8800_v55 = vld [vmem:[#allocation135_spill] sm:$0xff] }
 0x57f   :  { %v3634_v45 = vpop.f32.mrf.mxu0  ;;  %v3996_v14 = vpop.f32.mrf.mxu1 }
 0x580   :  { %v4844_v44 = vmax.f32 %v8792_v43, %v4635_v5  ;;  %v3635_v16 = vadd.f32 %v3634_v45, %v8793_v29  ;;  %v4363_v41 = vpop.f32.mrf.mxu2  ;;  %v8801_v5 = vld [vmem:[#allocation128_spill] sm:$0xff]  ;;  %v8802_v29 = vld [vmem:[#allocation129_spill] sm:$0xff] }
 0x581   :  { %v4638_v30 = vpop.f32.mrf.mxu3 }
 0x582   :  { %4909 = vst.msk [vmem:[#allocation2 + $0x78] sm:$0xff] %vm4893_vm5, %v4844_v44  ;;  %v3991_v33 = vadd.f32 %v3990_v17, %v3635_v16  ;;  %3713 = vmatmul.f32.gmra.mxu0 %v8794_v22  ;;  %4091 = vmatmul.f32.gmra.mxu1 %v8795_v59  ;;  %v8804_v59 = vld [vmem:[#allocation131_spill] sm:$0xff] }
 0x584   :  { %v4364_v1 = vadd.f32 %v4363_v41, %v3991_v33  ;;  %4430 = vmatmul.f32.gmra.mxu2 %v8796_v42  ;;  %v8803_v41 = vld [vmem:[#allocation137_spill] sm:$0xff] }
 0x586   :  { %v4639_v25 = vadd.f32 %v4638_v30, %v4364_v1  ;;  %4705 = vmatmul.f32.gmra.mxu3 %v8796_v42  ;;  %v8805_v1 = vld [vmem:[#allocation140_spill] sm:$0xff] }
 0x587   :  { %v3639_v24 = vpop.f32.mrf.mxu0  ;;  %v4002_v31 = vpop.f32.mrf.mxu1 }
 0x588   :  { %v4845_v23 = vmax.f32 %v8797_v8, %v4639_v25  ;;  %v3640_v54 = vadd.f32 %v3639_v24, %v8798_v32  ;;  %v4367_v48 = vpop.f32.mrf.mxu2  ;;  %v8806_v25 = vld [vmem:[#allocation133_spill] sm:$0xff]  ;;  %v8807_v32 = vld [vmem:[#allocation134_spill] sm:$0xff] }
 0x589   :  { %v4642_v39 = vpop.f32.mrf.mxu3 }
 0x58a   :  { %4910 = vst.msk [vmem:[#allocation2 + $0x80] sm:$0xff] %vm4893_vm5, %v4845_v23  ;;  %v3997_v17 = vadd.f32 %v3996_v14, %v3640_v54  ;;  %3718 = vmatmul.f32.gmra.mxu0 %v8799_v26  ;;  %4097 = vmatmul.f32.gmra.mxu1 %v8800_v55  ;;  %v8809_v55 = vld [vmem:[#allocation136_spill] sm:$0xff] }
 0x58c   :  { %v4368_v49 = vadd.f32 %v4367_v48, %v3997_v17  ;;  %4434 = vmatmul.f32.gmra.mxu2 %v8801_v5  ;;  %v8808_v48 = vld [vmem:[#allocation142_spill] sm:$0xff] }
 0x58e   :  { %v4643_v45 = vadd.f32 %v4642_v39, %v4368_v49  ;;  %4709 = vmatmul.f32.gmra.mxu3 %v8801_v5  ;;  %v8810_v49 = vld [vmem:[#allocation145_spill] sm:$0xff] }
 0x58f   :  { %v3644_v43 = vpop.f32.mrf.mxu0  ;;  %v4008_v44 = vpop.f32.mrf.mxu1 }
 0x590   :  { %v4846_v16 = vmax.f32 %v8802_v29, %v4643_v45  ;;  %v3645_v30 = vadd.f32 %v3644_v43, %v8803_v41  ;;  %v4371_v33 = vpop.f32.mrf.mxu2  ;;  %v8811_v45 = vld [vmem:[#allocation138_spill] sm:$0xff]  ;;  %v8812_v41 = vld [vmem:[#allocation139_spill] sm:$0xff] }
 0x591   :  { %v4646_v22 = vpop.f32.mrf.mxu3 }
 0x592   :  { %4911 = vst.msk [vmem:[#allocation2 + $0x88] sm:$0xff] %vm4893_vm5, %v4846_v16  ;;  %v4003_v14 = vadd.f32 %v4002_v31, %v3645_v30  ;;  %3723 = vmatmul.f32.gmra.mxu0 %v8804_v59  ;;  %4103 = vmatmul.f32.gmra.mxu1 %v8805_v1  ;;  %v8814_v1 = vld [vmem:[#allocation141_spill] sm:$0xff] }
 0x594   :  { %v4372_v42 = vadd.f32 %v4371_v33, %v4003_v14  ;;  %4438 = vmatmul.f32.gmra.mxu2 %v8806_v25  ;;  %v8813_v33 = vld [vmem:[#allocation147_spill] sm:$0xff] }
 0x596   :  { %v4647_v24 = vadd.f32 %v4646_v22, %v4372_v42  ;;  %4713 = vmatmul.f32.gmra.mxu3 %v8806_v25  ;;  %v8815_v42 = vld [vmem:[#allocation150_spill] sm:$0xff] }
 0x597   :  { %v3649_v8 = vpop.f32.mrf.mxu0  ;;  %v4014_v23 = vpop.f32.mrf.mxu1 }
 0x598   :  { %v4847_v54 = vmax.f32 %v8807_v32, %v4647_v24  ;;  %v3650_v39 = vadd.f32 %v3649_v8, %v8808_v48  ;;  %v4375_v17 = vpop.f32.mrf.mxu2  ;;  %v8816_v24 = vld [vmem:[#allocation143_spill] sm:$0xff]  ;;  %v8817_v48 = vld [vmem:[#allocation144_spill] sm:$0xff] }
 0x599   :  { %v4650_v26 = vpop.f32.mrf.mxu3 }
 0x59a   :  { %4912 = vst.msk [vmem:[#allocation2 + $0x90] sm:$0xff] %vm4893_vm5, %v4847_v54  ;;  %v4009_v31 = vadd.f32 %v4008_v44, %v3650_v39  ;;  %3728 = vmatmul.f32.gmra.mxu0 %v8809_v55  ;;  %4109 = vmatmul.f32.gmra.mxu1 %v8810_v49  ;;  %v8819_v49 = vld [vmem:[#allocation146_spill] sm:$0xff] }
 0x59c   :  { %v4376_v5 = vadd.f32 %v4375_v17, %v4009_v31  ;;  %4442 = vmatmul.f32.gmra.mxu2 %v8811_v45  ;;  %v8818_v17 = vld [vmem:[#allocation152_spill] sm:$0xff] }
 0x59e   :  { %v4651_v43 = vadd.f32 %v4650_v26, %v4376_v5  ;;  %4717 = vmatmul.f32.gmra.mxu3 %v8811_v45  ;;  %v8820_v5 = vld [vmem:[#allocation155_spill] sm:$0xff] }
 0x59f   :  { %v3654_v29 = vpop.f32.mrf.mxu0  ;;  %v4020_v16 = vpop.f32.mrf.mxu1 }
 0x5a0   :  { %v4848_v30 = vmax.f32 %v8812_v41, %v4651_v43  ;;  %v3655_v22 = vadd.f32 %v3654_v29, %v8813_v33  ;;  %v4379_v14 = vpop.f32.mrf.mxu2  ;;  %v8821_v43 = vld [vmem:[#allocation148_spill] sm:$0xff]  ;;  %v8822_v33 = vld [vmem:[#allocation149_spill] sm:$0xff] }
 0x5a1   :  { %v4654_v59 = vpop.f32.mrf.mxu3 }
 0x5a2   :  { %4913 = vst.msk [vmem:[#allocation2 + $0x98] sm:$0xff] %vm4893_vm5, %v4848_v30  ;;  %v4015_v44 = vadd.f32 %v4014_v23, %v3655_v22  ;;  %3733 = vmatmul.f32.gmra.mxu0 %v8814_v1  ;;  %4115 = vmatmul.f32.gmra.mxu1 %v8815_v42  ;;  %v8824_v42 = vld [vmem:[#allocation151_spill] sm:$0xff] }
 0x5a4   :  { %v4380_v25 = vadd.f32 %v4379_v14, %v4015_v44  ;;  %4446 = vmatmul.f32.gmra.mxu2 %v8816_v24  ;;  %v8823_v14 = vld [vmem:[#allocation157_spill] sm:$0xff] }
 0x5a6   :  { %v4655_v8 = vadd.f32 %v4654_v59, %v4380_v25  ;;  %4721 = vmatmul.f32.gmra.mxu3 %v8816_v24  ;;  %v8825_v25 = vld [vmem:[#allocation160_spill] sm:$0xff] }
 0x5a7   :  { %v3659_v32 = vpop.f32.mrf.mxu0  ;;  %v4026_v54 = vpop.f32.mrf.mxu1 }
 0x5a8   :  { %v4849_v39 = vmax.f32 %v8817_v48, %v4655_v8  ;;  %v3660_v26 = vadd.f32 %v3659_v32, %v8818_v17  ;;  %v4383_v31 = vpop.f32.mrf.mxu2  ;;  %v8826_v8 = vld [vmem:[#allocation153_spill] sm:$0xff]  ;;  %v8827_v17 = vld [vmem:[#allocation154_spill] sm:$0xff] }
 0x5a9   :  { %v4658_v55 = vpop.f32.mrf.mxu3 }
 0x5aa   :  { %4914 = vst.msk [vmem:[#allocation2 + $0xa0] sm:$0xff] %vm4893_vm5, %v4849_v39  ;;  %v4021_v23 = vadd.f32 %v4020_v16, %v3660_v26  ;;  %3738 = vmatmul.f32.gmra.mxu0 %v8819_v49  ;;  %4121 = vmatmul.f32.gmra.mxu1 %v8820_v5  ;;  %v8829_v5 = vld [vmem:[#allocation156_spill] sm:$0xff] }
 0x5ac   :  { %v4384_v45 = vadd.f32 %v4383_v31, %v4021_v23  ;;  %4450 = vmatmul.f32.gmra.mxu2 %v8821_v43  ;;  %v8828_v31 = vld [vmem:[#allocation162_spill] sm:$0xff] }
 0x5ae   :  { %v4659_v29 = vadd.f32 %v4658_v55, %v4384_v45  ;;  %4725 = vmatmul.f32.gmra.mxu3 %v8821_v43  ;;  %v8830_v45 = vld [vmem:[#allocation165_spill] sm:$0xff] }
 0x5af   :  { %v3664_v41 = vpop.f32.mrf.mxu0  ;;  %v4032_v30 = vpop.f32.mrf.mxu1 }
 0x5b0   :  { %v4850_v22 = vmax.f32 %v8822_v33, %v4659_v29  ;;  %v3665_v59 = vadd.f32 %v3664_v41, %v8823_v14  ;;  %v4387_v44 = vpop.f32.mrf.mxu2  ;;  %v8831_v29 = vld [vmem:[#allocation158_spill] sm:$0xff]  ;;  %v8832_v14 = vld [vmem:[#allocation159_spill] sm:$0xff] }
 0x5b1   :  { %v4662_v1 = vpop.f32.mrf.mxu3 }
 0x5b2   :  { %4915 = vst.msk [vmem:[#allocation2 + $0xa8] sm:$0xff] %vm4893_vm5, %v4850_v22  ;;  %v4027_v16 = vadd.f32 %v4026_v54, %v3665_v59  ;;  %3743 = vmatmul.f32.gmra.mxu0 %v8824_v42  ;;  %4127 = vmatmul.f32.gmra.mxu1 %v8825_v25  ;;  %v8834_v25 = vld [vmem:[#allocation161_spill] sm:$0xff] }
 0x5b4   :  { %v4388_v24 = vadd.f32 %v4387_v44, %v4027_v16  ;;  %4454 = vmatmul.f32.gmra.mxu2 %v8826_v8  ;;  %v8833_v44 = vld [vmem:[#allocation167_spill] sm:$0xff] }
 0x5b6   :  { %v4663_v32 = vadd.f32 %v4662_v1, %v4388_v24  ;;  %4729 = vmatmul.f32.gmra.mxu3 %v8826_v8  ;;  %v8835_v24 = vld [vmem:[#allocation170_spill] sm:$0xff] }
 0x5b7   :  { %v3669_v48 = vpop.f32.mrf.mxu0  ;;  %v4038_v39 = vpop.f32.mrf.mxu1 }
 0x5b8   :  { %v4851_v26 = vmax.f32 %v8827_v17, %v4663_v32  ;;  %v3670_v55 = vadd.f32 %v3669_v48, %v8828_v31  ;;  %v4391_v23 = vpop.f32.mrf.mxu2  ;;  %v8836_v32 = vld [vmem:[#allocation163_spill] sm:$0xff]  ;;  %v8837_v31 = vld [vmem:[#allocation164_spill] sm:$0xff] }
 0x5b9   :  { %v4666_v49 = vpop.f32.mrf.mxu3 }
 0x5ba   :  { %4916 = vst.msk [vmem:[#allocation2 + $0xb0] sm:$0xff] %vm4893_vm5, %v4851_v26  ;;  %v4033_v54 = vadd.f32 %v4032_v30, %v3670_v55  ;;  %3748 = vmatmul.f32.gmra.mxu0 %v8829_v5  ;;  %4133 = vmatmul.f32.gmra.mxu1 %v8830_v45  ;;  %v8839_v45 = vld [vmem:[#allocation166_spill] sm:$0xff] }
 0x5bc   :  { %v4392_v43 = vadd.f32 %v4391_v23, %v4033_v54  ;;  %4458 = vmatmul.f32.gmra.mxu2 %v8831_v29  ;;  %v8838_v23 = vld [vmem:[#allocation172_spill] sm:$0xff] }
 0x5be   :  { %v4667_v41 = vadd.f32 %v4666_v49, %v4392_v43  ;;  %4733 = vmatmul.f32.gmra.mxu3 %v8831_v29  ;;  %v8840_v43 = vld [vmem:[#allocation175_spill] sm:$0xff] }
 0x5bf   :  { %v3674_v33 = vpop.f32.mrf.mxu0  ;;  %v4044_v22 = vpop.f32.mrf.mxu1 }
 0x5c0   :  { %v4852_v59 = vmax.f32 %v8832_v14, %v4667_v41  ;;  %v3675_v1 = vadd.f32 %v3674_v33, %v8833_v44  ;;  %v4395_v16 = vpop.f32.mrf.mxu2 }
 0x5c1   :  { %v4670_v42 = vpop.f32.mrf.mxu3 }
 0x5c2   :  { %4917 = vst.msk [vmem:[#allocation2 + $0xb8] sm:$0xff] %vm4893_vm5, %v4852_v59  ;;  %v4039_v30 = vadd.f32 %v4038_v39, %v3675_v1  ;;  %3753 = vmatmul.f32.gmra.mxu0 %v8834_v25  ;;  %4139 = vmatmul.f32.gmra.mxu1 %v8835_v24  ;;  %v8841_v59 = vld [vmem:[#allocation169_spill] sm:$0xff]  ;;  %v8843_v25 = vld [vmem:[#allocation171_spill] sm:$0xff]  ;;  %v8844_v24 = vld [vmem:[#allocation180_spill] sm:$0xff] }
 0x5c3   :  { %v8842_v1 = vld [vmem:[#allocation177_spill] sm:$0xff] }
 0x5c4   :  { %v4396_v8 = vadd.f32 %v4395_v16, %v4039_v30  ;;  %4462 = vmatmul.f32.gmra.mxu2 %v8836_v32 }
 0x5c6   :  { %v4671_v48 = vadd.f32 %v4670_v42, %v4396_v8  ;;  %4737 = vmatmul.f32.gmra.mxu3 %v8836_v32  ;;  %v8845_v32 = vld [vmem:[#allocation173_spill] sm:$0xff] }
 0x5c7   :  { %v3679_v17 = vpop.f32.mrf.mxu0  ;;  %v4050_v26 = vpop.f32.mrf.mxu1 }
 0x5c8   :  { %v4853_v55 = vmax.f32 %v8837_v31, %v4671_v48  ;;  %v3680_v49 = vadd.f32 %v3679_v17, %v8838_v23  ;;  %v4399_v54 = vpop.f32.mrf.mxu2  ;;  %v8846_v31 = vld [vmem:[#allocation174_spill] sm:$0xff]  ;;  %v8847_v23 = vld [vmem:[#allocation179_spill] sm:$0xff] }
 0x5c9   :  { %v4674_v5 = vpop.f32.mrf.mxu3 }
 0x5ca   :  { %4918 = vst.msk [vmem:[#allocation2 + $0xc0] sm:$0xff] %vm4893_vm5, %v4853_v55  ;;  %v4045_v39 = vadd.f32 %v4044_v22, %v3680_v49  ;;  %3758 = vmatmul.f32.gmra.mxu0 %v8839_v45  ;;  %4145 = vmatmul.f32.gmra.mxu1 %v8840_v43  ;;  %v8849_v45 = vld [vmem:[#allocation185_spill] sm:$0xff] }
 0x5cc   :  { %v4400_v29 = vadd.f32 %v4399_v54, %v4045_v39  ;;  %4466 = vmatmul.f32.gmra.mxu2 %v8568_v19  ;;  %v8848_v39 = vld [vmem:[#allocation176_spill] sm:$0xff] }
 0x5ce   :  { %v4675_v41 = vadd.f32 %v4674_v5, %v4400_v29  ;;  %4741 = vmatmul.f32.gmra.mxu3 %v8568_v19 }
 0x5cf   :  { %v3684_v33 = vpop.f32.mrf.mxu0  ;;  %v4056_v14 = vpop.f32.mrf.mxu1 }
 0x5d0   :  { %v4854_v44 = vmax.f32 %v8841_v59, %v4675_v41  ;;  %v3685_v16 = vadd.f32 %v3684_v33, %v8842_v1  ;;  %v4403_v42 = vpop.f32.mrf.mxu2  ;;  %v8850_v59 = vld [vmem:[#allocation168_spill] sm:$0xff] }
 0x5d1   :  { %v4678_v30 = vpop.f32.mrf.mxu3  ;;  %v8851_v1 = vld [vmem:[#allocation184_spill] sm:$0xff] }
 0x5d2   :  { %4919 = vst.msk [vmem:[#allocation2 + $0xc8] sm:$0xff] %vm4893_vm5, %v4854_v44  ;;  %v4051_v22 = vadd.f32 %v4050_v26, %v3685_v16  ;;  %3763 = vmatmul.f32.gmra.mxu0 %v8843_v25  ;;  %4151 = vmatmul.f32.gmra.mxu1 %v8844_v24  ;;  %v8853_v25 = vld [vmem:[#allocation189_spill] sm:$0xff] }
 0x5d4   :  { %v4404_v8 = vadd.f32 %v4403_v42, %v4051_v22  ;;  %4470 = vmatmul.f32.gmra.mxu2 %v8845_v32  ;;  %v8852_v22 = vld [vmem:[#allocation181_spill] sm:$0xff] }
 0x5d6   :  { %v4679_v48 = vadd.f32 %v4678_v30, %v4404_v8  ;;  %4745 = vmatmul.f32.gmra.mxu3 %v8845_v32 }
 0x5d7   :  { %v3689_v19 = vpop.f32.mrf.mxu0  ;;  %v4062_v17 = vpop.f32.mrf.mxu1 }
 0x5d8   :  { %v4855_v55 = vmax.f32 %v8846_v31, %v4679_v48  ;;  %v3690_v49 = vadd.f32 %v3689_v19, %v8847_v23  ;;  %v4407_v54 = vpop.f32.mrf.mxu2  ;;  %v8854_v48 = vld [vmem:[#allocation182_spill] sm:$0xff] }
 0x5d9   :  { %v4682_v5 = vpop.f32.mrf.mxu3  ;;  %v8855_v31 = vld [vmem:[#allocation178_spill] sm:$0xff] }
 0x5da   :  { %4920 = vst.msk [vmem:[#allocation2 + $0xd0] sm:$0xff] %vm4893_vm5, %v4855_v55  ;;  %v4057_v26 = vadd.f32 %v4056_v14, %v3690_v49  ;;  %3768 = vmatmul.f32.gmra.mxu0 %v8848_v39  ;;  %4157 = vmatmul.f32.gmra.mxu1 %v8849_v45 }
 0x5dc   :  { %v4408_v43 = vadd.f32 %v4407_v54, %v4057_v26  ;;  %4474 = vmatmul.f32.gmra.mxu2 %v8578_v53  ;;  %v8856_v54 = vld [vmem:[#allocation186_spill] sm:$0xff] }
 0x5de   :  { %v4683_v29 = vadd.f32 %v4682_v5, %v4408_v43  ;;  %4749 = vmatmul.f32.gmra.mxu3 %v8578_v53  ;;  %v8857_v5 = vld [vmem:[#allocation194_spill] sm:$0xff]  ;;  %v8858_v43 = vld [vmem:[#allocation187_spill] sm:$0xff] }
 0x5df   :  { %v3694_v41 = vpop.f32.mrf.mxu0  ;;  %v4068_v33 = vpop.f32.mrf.mxu1 }
 0x5e0   :  { %v4856_v44 = vmax.f32 %v8850_v59, %v4683_v29  ;;  %v3695_v16 = vadd.f32 %v3694_v41, %v8851_v1  ;;  %v4411_v42 = vpop.f32.mrf.mxu2  ;;  %v8859_v41 = vld [vmem:[#allocation183_spill] sm:$0xff] }
 0x5e1   :  { %v4686_v30 = vpop.f32.mrf.mxu3 }
 0x5e2   :  { %4921 = vst.msk [vmem:[#allocation2 + $0xd8] sm:$0xff] %vm4893_vm5, %v4856_v44  ;;  %v4063_v14 = vadd.f32 %v4062_v17, %v3695_v16  ;;  %3773 = vmatmul.f32.gmra.mxu0 %v8852_v22  ;;  %4163 = vmatmul.f32.gmra.mxu1 %v8853_v25  ;;  %v8860_v16 = vld [vmem:[#allocation190_spill] sm:$0xff]  ;;  %v8862_v25 = vld [vmem:[#allocation191_spill] sm:$0xff] }
 0x5e4   :  { %v4412_v24 = vadd.f32 %v4411_v42, %v4063_v14  ;;  %4478 = vmatmul.f32.gmra.mxu2 %v8582_v47  ;;  %v8861_v42 = vld [vmem:[#allocation198_spill] sm:$0xff] }
 0x5e6   :  { %v4687_v8 = vadd.f32 %v4686_v30, %v4412_v24  ;;  %4753 = vmatmul.f32.gmra.mxu3 %v8582_v47 }
 0x5e7   :  { %v3699_v53 = vpop.f32.mrf.mxu0  ;;  %v4074_v32 = vpop.f32.mrf.mxu1 }
 0x5e8   :  { %v4857_v19 = vmax.f32 %v8854_v48, %v4687_v8  ;;  %v3700_v55 = vadd.f32 %v3699_v53, %v8855_v31  ;;  %v4415_v23 = vpop.f32.mrf.mxu2  ;;  %v8863_v8 = vld [vmem:[#allocation196_spill] sm:$0xff]  ;;  %v8864_v31 = vld [vmem:[#allocation195_spill] sm:$0xff] }
 0x5e9   :  { %v4690_v49 = vpop.f32.mrf.mxu3 }
 0x5ea   :  { %4922 = vst.msk [vmem:[#allocation2 + $0xe0] sm:$0xff] %vm4893_vm5, %v4857_v19  ;;  %v4069_v17 = vadd.f32 %v4068_v33, %v3700_v55  ;;  %3778 = vmatmul.f32.gmra.mxu0 %v8856_v54  ;;  %4169 = vmatmul.f32.gmra.mxu1 %v8857_v5  ;;  %v8865_v55 = vld [vmem:[#allocation202_spill] sm:$0xff]  ;;  %v8866_v54 = vld [vmem:[#allocation193_spill] sm:$0xff] }
 0x5ec   :  { %v4416_v26 = vadd.f32 %v4415_v23, %v4069_v17  ;;  %4482 = vmatmul.f32.gmra.mxu2 %v8587_v0 }
 0x5ee   :  { %v4691_v39 = vadd.f32 %v4690_v49, %v4416_v26  ;;  %4757 = vmatmul.f32.gmra.mxu3 %v8587_v0  ;;  %v8867_v26 = vld [vmem:[#allocation200_spill] sm:$0xff] }
 0x5ef   :  { %v3704_v47 = vpop.f32.mrf.mxu0  ;;  %v4080_v45 = vpop.f32.mrf.mxu1 }
 0x5f0   :  { %v4858_v29 = vmax.f32 %v8858_v43, %v4691_v39  ;;  %v3705_v59 = vadd.f32 %v3704_v47, %v8859_v41  ;;  %v4419_v44 = vpop.f32.mrf.mxu2  ;;  %v8869_v41 = vld [vmem:[#allocation206_spill] sm:$0xff] }
 0x5f1   :  { %v4694_v1 = vpop.f32.mrf.mxu3 }
 0x5f2   :  { %4923 = vst.msk [vmem:[#allocation2 + $0xe8] sm:$0xff] %vm4893_vm5, %v4858_v29  ;;  %v4075_v33 = vadd.f32 %v4074_v32, %v3705_v59  ;;  %3783 = vmatmul.f32.gmra.mxu0 %v8860_v16  ;;  %4175 = vmatmul.f32.gmra.mxu1 %v8861_v42  ;;  %v8868_v29 = vld [vmem:[#allocation199_spill] sm:$0xff]  ;;  %v8871_v42 = vld [vmem:[#allocation204_spill] sm:$0xff] }
 0x5f4   :  { %v4420_v30 = vadd.f32 %v4419_v44, %v4075_v33  ;;  %4486 = vmatmul.f32.gmra.mxu2 %v8591_v13  ;;  %v8870_v33 = vld [vmem:[#allocation188_spill] sm:$0xff] }
 0x5f6   :  { %v4695_v14 = vadd.f32 %v4694_v1, %v4420_v30  ;;  %4761 = vmatmul.f32.gmra.mxu3 %v8591_v13 }
 0x5f7   :  { %v3709_v0 = vpop.f32.mrf.mxu0  ;;  %v4086_v22 = vpop.f32.mrf.mxu1 }
 0x5f8   :  { %v4859_v24 = vmax.f32 %v8862_v25, %v4695_v14  ;;  %v3710_v53 = vadd.f32 %v3709_v0, %v8863_v8  ;;  %v4423_v48 = vpop.f32.mrf.mxu2  ;;  %v8872_v25 = vld [vmem:[#allocation203_spill] sm:$0xff] }
 0x5f9   :  { %v4698_v19 = vpop.f32.mrf.mxu3 }
 0x5fa   :  { %4924 = vst.msk [vmem:[#allocation2 + $0xf0] sm:$0xff] %vm4893_vm5, %v4859_v24  ;;  %v4081_v32 = vadd.f32 %v4080_v45, %v3710_v53  ;;  %3788 = vmatmul.f32.gmra.mxu0 %v8864_v31  ;;  %4181 = vmatmul.f32.gmra.mxu1 %v8865_v55  ;;  %v8873_v24 = vld [vmem:[#allocation210_spill] sm:$0xff]  ;;  %v8875_v31 = vld [vmem:[#allocation208_spill] sm:$0xff] }
 0x5fc   :  { %v4424_v23 = vadd.f32 %v4423_v48, %v4081_v32  ;;  %4490 = vmatmul.f32.gmra.mxu2 %v8595_v11 }
 0x5fe   :  { %v4699_v49 = vadd.f32 %v4698_v19, %v4424_v23  ;;  %4765 = vmatmul.f32.gmra.mxu3 %v8595_v11  ;;  %v8874_v19 = vld [vmem:[#allocation192_spill] sm:$0xff] }
 0x5ff   :  { %v3714_v13 = vpop.f32.mrf.mxu0  ;;  %v4092_v17 = vpop.f32.mrf.mxu1 }
 0x600   :  { %v4860_v5 = vmax.f32 %v8866_v54, %v4699_v49  ;;  %v3715_v39 = vadd.f32 %v3714_v13, %v8867_v26  ;;  %v4427_v47 = vpop.f32.mrf.mxu2  ;;  %v8877_v54 = vld [vmem:[#allocation214_spill] sm:$0xff] }
 0x601   :  { %v4702_v43 = vpop.f32.mrf.mxu3 }
 0x602   :  { %4925 = vst.msk [vmem:[#allocation2 + $0xf8] sm:$0xff] %vm4893_vm5, %v4860_v5  ;;  %v4087_v45 = vadd.f32 %v4086_v22, %v3715_v39  ;;  %3793 = vmatmul.f32.gmra.mxu0 %v8868_v29  ;;  %4187 = vmatmul.f32.gmra.mxu1 %v8869_v41 }
 0x604   :  { %v4428_v59 = vadd.f32 %v4427_v47, %v4087_v45  ;;  %4494 = vmatmul.f32.gmra.mxu2 %v8599_v10  ;;  %v8878_v47 = vld [vmem:[#allocation197_spill] sm:$0xff]  ;;  %v8879_v45 = vld [vmem:[#allocation212_spill] sm:$0xff] }
 0x606   :  { %v4703_v44 = vadd.f32 %v4702_v43, %v4428_v59  ;;  %4769 = vmatmul.f32.gmra.mxu3 %v8599_v10 }
 0x607   :  { %v3719_v11 = vpop.f32.mrf.mxu0  ;;  %v4098_v1 = vpop.f32.mrf.mxu1 }
 0x608   :  { %v4861_v16 = vmax.f32 %v8870_v33, %v4703_v44  ;;  %v3720_v30 = vadd.f32 %v3719_v11, %v8871_v42  ;;  %v4431_v14 = vpop.f32.mrf.mxu2  ;;  %v8880_v11 = vld [vmem:[#allocation211_spill] sm:$0xff] }
 0x609   :  { %v4706_v0 = vpop.f32.mrf.mxu3 }
 0x60a   :  { %4926 = vst.msk [vmem:[#allocation2 + $0x100] sm:$0xff] %vm4893_vm5, %v4861_v16  ;;  %v4093_v22 = vadd.f32 %v4092_v17, %v3720_v30  ;;  %3798 = vmatmul.f32.gmra.mxu0 %v8872_v25  ;;  %4193 = vmatmul.f32.gmra.mxu1 %v8873_v24  ;;  %v8876_v17 = vld [vmem:[#allocation207_spill] sm:$0xff]  ;;  %v8882_v30 = vld [vmem:[#allocation201_spill] sm:$0xff] }
 0x60c   :  { %v4432_v8 = vadd.f32 %v4431_v14, %v4093_v22  ;;  %4498 = vmatmul.f32.gmra.mxu2 %v8603_v18 }
 0x60e   :  { %v4707_v53 = vadd.f32 %v4706_v0, %v4432_v8  ;;  %4773 = vmatmul.f32.gmra.mxu3 %v8603_v18  ;;  %v8883_v0 = vld [vmem:[#allocation216_spill] sm:$0xff] }
 0x60f   :  { %v3724_v10 = vpop.f32.mrf.mxu0  ;;  %v4104_v48 = vpop.f32.mrf.mxu1 }
 0x610   :  { %v4862_v32 = vmax.f32 %v8874_v19, %v4707_v53  ;;  %v3725_v55 = vadd.f32 %v3724_v10, %v8875_v31  ;;  %v4435_v23 = vpop.f32.mrf.mxu2  ;;  %v8884_v53 = vld [vmem:[#allocation215_spill] sm:$0xff]  ;;  %v8885_v10 = vld [vmem:[#allocation222_spill] sm:$0xff]  ;;  %v8886_v31 = vld [vmem:[#allocation205_spill] sm:$0xff] }
 0x611   :  { %v4710_v49 = vpop.f32.mrf.mxu3 }
 0x612   :  { %4927 = vst.msk [vmem:[#allocation2 + $0x108] sm:$0xff] %vm4893_vm5, %v4862_v32  ;;  %v4099_v13 = vadd.f32 %v4098_v1, %v3725_v55  ;;  %3803 = vmatmul.f32.gmra.mxu0 %v8876_v17  ;;  %4199 = vmatmul.f32.gmra.mxu1 %v8877_v54  ;;  %v8881_v1 = vld [vmem:[#allocation218_spill] sm:$0xff] }
 0x614   :  { %v4436_v5 = vadd.f32 %v4435_v23, %v4099_v13  ;;  %4502 = vmatmul.f32.gmra.mxu2 %v8607_v12  ;;  %v8887_v23 = vld [vmem:[#allocation220_spill] sm:$0xff] }
 0x616   :  { %v4711_v26 = vadd.f32 %v4710_v49, %v4436_v5  ;;  %4777 = vmatmul.f32.gmra.mxu3 %v8607_v12  ;;  %v8888_v5 = vld [vmem:[#allocation219_spill] sm:$0xff] }
 0x617   :  { %v3729_v18 = vpop.f32.mrf.mxu0  ;;  %v4110_v39 = vpop.f32.mrf.mxu1 }
 0x618   :  { %v4863_v43 = vmax.f32 %v8878_v47, %v4711_v26  ;;  %v3730_v29 = vadd.f32 %v3729_v18, %v8879_v45  ;;  %v4439_v41 = vpop.f32.mrf.mxu2  ;;  %v8889_v26 = vld [vmem:[#allocation226_spill] sm:$0xff] }
 0x619   :  { %v4714_v59 = vpop.f32.mrf.mxu3 }
 0x61a   :  { %4928 = vst.msk [vmem:[#allocation2 + $0x110] sm:$0xff] %vm4893_vm5, %v4863_v43  ;;  %v4105_v44 = vadd.f32 %v4104_v48, %v3730_v29  ;;  %3808 = vmatmul.f32.gmra.mxu0 %v8880_v11  ;;  %4205 = vmatmul.f32.gmra.mxu1 %v8881_v1  ;;  %v8890_v43 = vld [vmem:[#allocation209_spill] sm:$0xff]  ;;  %v8891_v29 = vld [vmem:[#allocation224_spill] sm:$0xff]  ;;  %v8892_v1 = vld [vmem:[#allocation223_spill] sm:$0xff] }
 0x61c   :  { %v4440_v33 = vadd.f32 %v4439_v41, %v4105_v44  ;;  %4506 = vmatmul.f32.gmra.mxu2 %v8611_v51 }
 0x61e   :  { %v4715_v16 = vadd.f32 %v4714_v59, %v4440_v33  ;;  %4781 = vmatmul.f32.gmra.mxu3 %v8611_v51  ;;  %v8893_v33 = vld [vmem:[#allocation230_spill] sm:$0xff] }
 0x61f   :  { %v3734_v12 = vpop.f32.mrf.mxu0  ;;  %v4116_v42 = vpop.f32.mrf.mxu1 }
 0x620   :  { %v4864_v14 = vmax.f32 %v8882_v30, %v4715_v16  ;;  %v3735_v22 = vadd.f32 %v3734_v12, %v8883_v0  ;;  %v4443_v25 = vpop.f32.mrf.mxu2  ;;  %v8894_v30 = vld [vmem:[#allocation213_spill] sm:$0xff]  ;;  %v8895_v0 = vld [vmem:[#allocation228_spill] sm:$0xff] }
 0x621   :  { %v4718_v24 = vpop.f32.mrf.mxu3 }
 0x622   :  { %4929 = vst.msk [vmem:[#allocation2 + $0x118] sm:$0xff] %vm4893_vm5, %v4864_v14  ;;  %v4111_v8 = vadd.f32 %v4110_v39, %v3735_v22  ;;  %3813 = vmatmul.f32.gmra.mxu0 %v8884_v53  ;;  %4211 = vmatmul.f32.gmra.mxu1 %v8885_v10  ;;  %v8896_v53 = vld [vmem:[#allocation227_spill] sm:$0xff]  ;;  %v8897_v10 = vld [vmem:[#allocation234_spill] sm:$0xff] }
 0x624   :  { %v4444_v48 = vadd.f32 %v4443_v25, %v4111_v8  ;;  %4510 = vmatmul.f32.gmra.mxu2 %v8615_v40 }
 0x626   :  { %v4719_v19 = vadd.f32 %v4718_v24, %v4444_v48  ;;  %4785 = vmatmul.f32.gmra.mxu3 %v8615_v40 }
 0x627   :  { %v3739_v51 = vpop.f32.mrf.mxu0  ;;  %v4122_v32 = vpop.f32.mrf.mxu1 }
 0x628   :  { %v4865_v55 = vmax.f32 %v8886_v31, %v4719_v19  ;;  %v3740_v49 = vadd.f32 %v3739_v51, %v8887_v23  ;;  %v4447_v13 = vpop.f32.mrf.mxu2 }
 0x629   :  { %v4722_v17 = vpop.f32.mrf.mxu3 }
 0x62a   :  { %4930 = vst.msk [vmem:[#allocation2 + $0x120] sm:$0xff] %vm4893_vm5, %v4865_v55  ;;  %v4117_v54 = vadd.f32 %v4116_v42, %v3740_v49  ;;  %3818 = vmatmul.f32.gmra.mxu0 %v8888_v5  ;;  %4217 = vmatmul.f32.gmra.mxu1 %v8889_v26  ;;  %v8899_v55 = vld [vmem:[#allocation232_spill] sm:$0xff]  ;;  %v8901_v5 = vld [vmem:[#allocation238_spill] sm:$0xff] }
 0x62c   :  { %v4448_v18 = vadd.f32 %v4447_v13, %v4117_v54  ;;  %4514 = vmatmul.f32.gmra.mxu2 %v8619_v9  ;;  %v8900_v54 = vld [vmem:[#allocation231_spill] sm:$0xff] }
 0x62e   :  { %v4723_v39 = vadd.f32 %v4722_v17, %v4448_v18  ;;  %4789 = vmatmul.f32.gmra.mxu3 %v8619_v9 }
 0x62f   :  { %v3744_v40 = vpop.f32.mrf.mxu0  ;;  %v4128_v47 = vpop.f32.mrf.mxu1 }
 0x630   :  { %v4866_v45 = vmax.f32 %v8890_v43, %v4723_v39  ;;  %v3745_v41 = vadd.f32 %v3744_v40, %v8891_v29  ;;  %v4451_v59 = vpop.f32.mrf.mxu2  ;;  %v8902_v40 = vld [vmem:[#allocation221_spill] sm:$0xff]  ;;  %v8903_v43 = vld [vmem:[#allocation236_spill] sm:$0xff] }
 0x631   :  { %v4726_v44 = vpop.f32.mrf.mxu3 }
 0x632   :  { %4931 = vst.msk [vmem:[#allocation2 + $0x128] sm:$0xff] %vm4893_vm5, %v4866_v45  ;;  %v4123_v11 = vadd.f32 %v4122_v32, %v3745_v41  ;;  %3823 = vmatmul.f32.gmra.mxu0 %v8892_v1  ;;  %4223 = vmatmul.f32.gmra.mxu1 %v8893_v33  ;;  %v8898_v32 = vld [vmem:[#allocation217_spill] sm:$0xff] }
 0x634   :  { %v4452_v16 = vadd.f32 %v4451_v59, %v4123_v11  ;;  %4518 = vmatmul.f32.gmra.mxu2 %v8623_v34  ;;  %v8905_v11 = vld [vmem:[#allocation242_spill] sm:$0xff] }
 0x636   :  { %v4727_v12 = vadd.f32 %v4726_v44, %v4452_v16  ;;  %4793 = vmatmul.f32.gmra.mxu3 %v8623_v34  ;;  %v8904_v44 = vld [vmem:[#allocation235_spill] sm:$0xff] }
 0x637   :  { %v3749_v9 = vpop.f32.mrf.mxu0  ;;  %v4134_v42 = vpop.f32.mrf.mxu1 }
 0x638   :  { %v4867_v14 = vmax.f32 %v8894_v30, %v4727_v12  ;;  %v3750_v22 = vadd.f32 %v3749_v9, %v8895_v0  ;;  %v4455_v25 = vpop.f32.mrf.mxu2  ;;  %v8906_v12 = vld [vmem:[#allocation225_spill] sm:$0xff] }
 0x639   :  { %v4730_v24 = vpop.f32.mrf.mxu3 }
 0x63a   :  { %4932 = vst.msk [vmem:[#allocation2 + $0x130] sm:$0xff] %vm4893_vm5, %v4867_v14  ;;  %v4129_v8 = vadd.f32 %v4128_v47, %v3750_v22  ;;  %3828 = vmatmul.f32.gmra.mxu0 %v8896_v53  ;;  %4229 = vmatmul.f32.gmra.mxu1 %v8897_v10  ;;  %v8907_v22 = vld [vmem:[#allocation239_spill] sm:$0xff]  ;;  %v8909_v10 = vld [vmem:[#allocation229_spill] sm:$0xff] }
 0x63c   :  { %v4456_v48 = vadd.f32 %v4455_v25, %v4129_v8  ;;  %4522 = vmatmul.f32.gmra.mxu2 %v8627_v6  ;;  %v8908_v25 = vld [vmem:[#allocation246_spill] sm:$0xff] }
 0x63e   :  { %v4731_v19 = vadd.f32 %v4730_v24, %v4456_v48  ;;  %4797 = vmatmul.f32.gmra.mxu3 %v8627_v6 }
 0x63f   :  { %v3754_v34 = vpop.f32.mrf.mxu0  ;;  %v4140_v51 = vpop.f32.mrf.mxu1 }
 0x640   :  { %v4868_v31 = vmax.f32 %v8898_v32, %v4731_v19  ;;  %v3755_v23 = vadd.f32 %v3754_v34, %v8899_v55  ;;  %v4459_v49 = vpop.f32.mrf.mxu2  ;;  %v8912_v55 = vld [vmem:[#allocation250_spill] sm:$0xff] }
 0x641   :  { %v4734_v13 = vpop.f32.mrf.mxu3 }
 0x642   :  { %4933 = vst.msk [vmem:[#allocation2 + $0x138] sm:$0xff] %vm4893_vm5, %v4868_v31  ;;  %v4135_v17 = vadd.f32 %v4134_v42, %v3755_v23  ;;  %3833 = vmatmul.f32.gmra.mxu0 %v8900_v54  ;;  %4235 = vmatmul.f32.gmra.mxu1 %v8901_v5  ;;  %v8911_v31 = vld [vmem:[#allocation243_spill] sm:$0xff] }
 0x644   :  { %v4460_v26 = vadd.f32 %v4459_v49, %v4135_v17  ;;  %4526 = vmatmul.f32.gmra.mxu2 %v8631_v35  ;;  %v8913_v17 = vld [vmem:[#allocation240_spill] sm:$0xff] }
 0x646   :  { %v4735_v18 = vadd.f32 %v4734_v13, %v4460_v26  ;;  %4801 = vmatmul.f32.gmra.mxu3 %v8631_v35 }
 0x647   :  { %v3759_v6 = vpop.f32.mrf.mxu0  ;;  %v4146_v39 = vpop.f32.mrf.mxu1 }
 0x648   :  { %v4869_v47 = vmax.f32 %v8902_v40, %v4735_v18  ;;  %v3760_v45 = vadd.f32 %v3759_v6, %v8903_v43  ;;  %v4463_v29 = vpop.f32.mrf.mxu2  ;;  %v8915_v40 = vld [vmem:[#allocation254_spill] sm:$0xff] }
 0x649   :  { %v4738_v41 = vpop.f32.mrf.mxu3 }
 0x64a   :  { %4934 = vst.msk [vmem:[#allocation2 + $0x140] sm:$0xff] %vm4893_vm5, %v4869_v47  ;;  %v4141_v59 = vadd.f32 %v4140_v51, %v3760_v45  ;;  %3838 = vmatmul.f32.gmra.mxu0 %v8904_v44  ;;  %4241 = vmatmul.f32.gmra.mxu1 %v8905_v11 }
 0x64c   :  { %v4464_v1 = vadd.f32 %v4463_v29, %v4141_v59  ;;  %4530 = vmatmul.f32.gmra.mxu2 %v8635_v21  ;;  %v8916_v29 = vld [vmem:[#allocation244_spill] sm:$0xff] }
 0x64e   :  { %v4739_v33 = vadd.f32 %v4738_v41, %v4464_v1  ;;  %4805 = vmatmul.f32.gmra.mxu3 %v8635_v21 }
 0x64f   :  { %v3764_v35 = vpop.f32.mrf.mxu0  ;;  %v4152_v16 = vpop.f32.mrf.mxu1 }
 0x650   :  { %v4870_v9 = vmax.f32 %v8906_v12, %v4739_v33  ;;  %v3765_v42 = vadd.f32 %v3764_v35, %v7294_v37  ;;  %v4467_v30 = vpop.f32.mrf.mxu2  ;;  %v8910_v37 = vld [vmem:[#allocation233_spill] sm:$0xff]  ;;  %v8918_v33 = vld [vmem:[#allocation251_spill] sm:$0xff]  ;;  %v8919_v35 = vld [vmem:[#allocation258_spill] sm:$0xff] }
 0x651   :  { %v4742_v14 = vpop.f32.mrf.mxu3 }
 0x652   :  { %4935 = vst.msk [vmem:[#allocation2 + $0x148] sm:$0xff] %vm4893_vm5, %v4870_v9  ;;  %v4147_v0 = vadd.f32 %v4146_v39, %v3765_v42  ;;  %3843 = vmatmul.f32.gmra.mxu0 %v8907_v22  ;;  %4247 = vmatmul.f32.gmra.mxu1 %v8908_v25  ;;  %v8914_v39 = vld [vmem:[#allocation247_spill] sm:$0xff]  ;;  %v8920_v42 = vld [vmem:[#allocation237_spill] sm:$0xff] }
 0x654   :  { %v4468_v24 = vadd.f32 %v4467_v30, %v4147_v0  ;;  %4534 = vmatmul.f32.gmra.mxu2 %v8638_v63 }
 0x656   :  { %v4743_v8 = vadd.f32 %v4742_v14, %v4468_v24  ;;  %4809 = vmatmul.f32.gmra.mxu3 %v8638_v63  ;;  %v8921_v24 = vld [vmem:[#allocation255_spill] sm:$0xff] }
 0x657   :  { %v3769_v21 = vpop.f32.mrf.mxu0  ;;  %v4158_v53 = vpop.f32.mrf.mxu1 }
 0x658   :  { %v4871_v48 = vmax.f32 %v8909_v10, %v4743_v8  ;;  %v3770_v19 = vadd.f32 %v3769_v21, %v8910_v37  ;;  %v4471_v34 = vpop.f32.mrf.mxu2  ;;  %v8922_v8 = vld [vmem:[#allocation260_spill] sm:$0xff] }
 0x659   :  { %v4746_v51 = vpop.f32.mrf.mxu3 }
 0x65a   :  { %4936 = vst.msk [vmem:[#allocation2 + $0x150] sm:$0xff] %vm4893_vm5, %v4871_v48  ;;  %v4153_v32 = vadd.f32 %v4152_v16, %v3770_v19  ;;  %3848 = vmatmul.f32.gmra.mxu0 %v8911_v31  ;;  %4253 = vmatmul.f32.gmra.mxu1 %v8912_v55  ;;  %v8923_v48 = vld [vmem:[#allocation241_spill] sm:$0xff] }
 0x65c   :  { %v4472_v23 = vadd.f32 %v4471_v34, %v4153_v32  ;;  %4538 = vmatmul.f32.gmra.mxu2 %v8642_v62  ;;  %v8924_v32 = vld [vmem:[#allocation259_spill] sm:$0xff] }
 0x65e   :  { %v4747_v49 = vadd.f32 %v4746_v51, %v4472_v23  ;;  %4813 = vmatmul.f32.gmra.mxu3 %v8642_v62 }
 0x65f   :  { %v3774_v63 = vpop.f32.mrf.mxu0  ;;  %v4164_v13 = vpop.f32.mrf.mxu1 }
 0x660   :  { %v4872_v54 = vmax.f32 %v8913_v17, %v4747_v49  ;;  %v3775_v5 = vadd.f32 %v3774_v63, %v7312_v38  ;;  %v4475_v26 = vpop.f32.mrf.mxu2  ;;  %v8917_v38 = vld [vmem:[#allocation248_spill] sm:$0xff] }
 0x661   :  { %v4750_v18 = vpop.f32.mrf.mxu3  ;;  %v8925_v63 = vld [vmem:[#allocation252_spill] sm:$0xff] }
 0x662   :  { %4937 = vst.msk [vmem:[#allocation2 + $0x158] sm:$0xff] %vm4893_vm5, %v4872_v54  ;;  %v4159_v6 = vadd.f32 %v4158_v53, %v3775_v5  ;;  %3853 = vmatmul.f32.gmra.mxu0 %v8914_v39  ;;  %4259 = vmatmul.f32.gmra.mxu1 %v8915_v40 }
 0x664   :  { %v4476_v47 = vadd.f32 %v4475_v26, %v4159_v6  ;;  %4542 = vmatmul.f32.gmra.mxu2 %v8644_v60 }
 0x666   :  { %v4751_v43 = vadd.f32 %v4750_v18, %v4476_v47  ;;  %4817 = vmatmul.f32.gmra.mxu3 %v8644_v60 }
 0x667   :  { %v3779_v62 = vpop.f32.mrf.mxu0  ;;  %v4170_v45 = vpop.f32.mrf.mxu1 }
 0x668   :  { %v4873_v41 = vmax.f32 %v8916_v29, %v4751_v43  ;;  %v3780_v59 = vadd.f32 %v3779_v62, %v8917_v38  ;;  %v4479_v44 = vpop.f32.mrf.mxu2 }
 0x669   :  { %v4754_v11 = vpop.f32.mrf.mxu3 }
 0x66a   :  { %4938 = vst.msk [vmem:[#allocation2 + $0x160] sm:$0xff] %vm4893_vm5, %v4873_v41  ;;  %v4165_v1 = vadd.f32 %v4164_v13, %v3780_v59  ;;  %3858 = vmatmul.f32.gmra.mxu0 %v8918_v33  ;;  %4265 = vmatmul.f32.gmra.mxu1 %v8919_v35 }
 0x66c   :  { %v4480_v16 = vadd.f32 %v4479_v44, %v4165_v1  ;;  %4546 = vmatmul.f32.gmra.mxu2 %v8648_v2 }
 0x66e   :  { %v4755_v12 = vadd.f32 %v4754_v11, %v4480_v16  ;;  %4821 = vmatmul.f32.gmra.mxu3 %v8648_v2 }
 0x66f   :  { %v3784_v60 = vpop.f32.mrf.mxu0  ;;  %v4176_v9 = vpop.f32.mrf.mxu1 }
 0x670   :  { %v4874_v30 = vmax.f32 %v8920_v42, %v4755_v12  ;;  %v3785_v14 = vadd.f32 %v3784_v60, %v7330_v61  ;;  %v4483_v0 = vpop.f32.mrf.mxu2 }
 0x671   :  { %v4758_v22 = vpop.f32.mrf.mxu3 }
 0x672   :  { %4939 = vst.msk [vmem:[#allocation2 + $0x168] sm:$0xff] %vm4893_vm5, %v4874_v30  ;;  %v4171_v25 = vadd.f32 %v4170_v45, %v3785_v14  ;;  %3863 = vmatmul.f32.gmra.mxu0 %v8921_v24  ;;  %4271 = vmatmul.f32.gmra.mxu1 %v8922_v8 }
 0x674   :  { %v4484_v21 = vadd.f32 %v4483_v0, %v4171_v25  ;;  %4550 = vmatmul.f32.gmra.mxu2 %v8650_v27 }
 0x676   :  { %v4759_v53 = vadd.f32 %v4758_v22, %v4484_v21  ;;  %4825 = vmatmul.f32.gmra.mxu3 %v8650_v27 }
 0x677   :  { %v3789_v2 = vpop.f32.mrf.mxu0  ;;  %v4182_v10 = vpop.f32.mrf.mxu1 }
 0x678   :  { %v4875_v37 = vmax.f32 %v8923_v48, %v4759_v53  ;;  %v3790_v61 = vadd.f32 %v3789_v2, %v7339_v28  ;;  %v4487_v19 = vpop.f32.mrf.mxu2 }
 0x679   :  { %v4762_v34 = vpop.f32.mrf.mxu3 }
 0x67a   :  { %4940 = vst.msk [vmem:[#allocation2 + $0x170] sm:$0xff] %vm4893_vm5, %v4875_v37  ;;  %v4177_v51 = vadd.f32 %v4176_v9, %v3790_v61  ;;  %3868 = vmatmul.f32.gmra.mxu0 %v8924_v32  ;;  %v8926_v32 = vld [vmem:[#allocation249_spill] sm:$0xff] }
 0x67c   :  { %v4488_v31 = vadd.f32 %v4487_v19, %v4177_v51 }
 0x67e   :  { %v4763_v55 = vadd.f32 %v4762_v34, %v4488_v31 }
 0x67f   :  { %v3794_v23 = vpop.f32.mrf.mxu0  ;;  %v4188_v49 = vpop.f32.mrf.mxu1 }
 0x680   :  { %v4876_v13 = vmax.f32 %v8925_v63, %v4763_v55  ;;  %v3795_v27 = vadd.f32 %v3794_v23, %v7348_v7  ;;  %v4491_v17 = vpop.f32.mrf.mxu2 }
 0x681   :  { %v4766_v54 = vpop.f32.mrf.mxu3 }
 0x682   :  { %4941 = vst.msk [vmem:[#allocation2 + $0x178] sm:$0xff] %vm4893_vm5, %v4876_v13  ;;  %v4183_v28 = vadd.f32 %v4182_v10, %v3795_v27  ;;  %v8927_v27 = vld [vmem:[#allocation245_spill] sm:$0xff] }
 0x684   :  { %v4492_v5 = vadd.f32 %v4491_v17, %v4183_v28 }
 0x686   :  { %v4767_v26 = vadd.f32 %v4766_v54, %v4492_v5  ;;  %v8928_v54 = vld [vmem:[#allocation253_spill] sm:$0xff] }
 0x687   :  { %v3799_v18 = vpop.f32.mrf.mxu0  ;;  %v4194_v6 = vpop.f32.mrf.mxu1 }
 0x688   :  { %v4877_v39 = vmax.f32 %v7346_v36, %v4767_v26  ;;  %v3800_v40 = vadd.f32 %v3799_v18, %v7357_v4  ;;  %v4495_v47 = vpop.f32.mrf.mxu2 }
 0x689   :  { %v4770_v43 = vpop.f32.mrf.mxu3 }
 0x68a   :  { %4942 = vst.msk [vmem:[#allocation2 + $0x180] sm:$0xff] %vm4893_vm5, %v4877_v39  ;;  %v4189_v62 = vadd.f32 %v4188_v49, %v3800_v40 }
 0x68c   :  { %v4496_v45 = vadd.f32 %v4495_v47, %v4189_v62  ;;  %v8929_v47 = vld [vmem:[#allocation257_spill] sm:$0xff] }
 0x68d   :  { %v8930_v62 = vld [vmem:[#allocation261_spill] sm:$0xff] }
 0x68e   :  { %v4771_v7 = vadd.f32 %v4770_v43, %v4496_v45 }
 0x68f   :  { %v3804_v29 = vpop.f32.mrf.mxu0  ;;  %v4200_v41 = vpop.f32.mrf.mxu1 }
 0x690   :  { %v4878_v38 = vmax.f32 %v7355_v52, %v4771_v7  ;;  %v3805_v59 = vadd.f32 %v3804_v29, %v7366_v20  ;;  %v4499_v44 = vpop.f32.mrf.mxu2 }
 0x691   :  { %v4774_v11 = vpop.f32.mrf.mxu3 }
 0x692   :  { %4943 = vst.msk [vmem:[#allocation2 + $0x188] sm:$0xff] %vm4893_vm5, %v4878_v38  ;;  %v4195_v36 = vadd.f32 %v4194_v6, %v3805_v59 }
 0x694   :  { %v4500_v1 = vadd.f32 %v4499_v44, %v4195_v36  ;;  %v8931_v36 = vld [vmem:[#allocation256_spill] sm:$0xff] }
 0x696   :  { %v4775_v4 = vadd.f32 %v4774_v11, %v4500_v1 }
 0x697   :  { %v3809_v33 = vpop.f32.mrf.mxu0  ;;  %v4206_v35 = vpop.f32.mrf.mxu1 }
 0x698   :  { %v4879_v16 = vmax.f32 %v7364_v15, %v4775_v4  ;;  %v3810_v12 = vadd.f32 %v3809_v33, %v7375_v46  ;;  %v4503_v60 = vpop.f32.mrf.mxu2  ;;  %v8932_v4 = vld [vmem:[#allocation5_spill] sm:$0xff] }
 0x699   :  { %v4778_v9 = vpop.f32.mrf.mxu3 }
 0x69a   :  { %4944 = vst.msk [vmem:[#allocation2 + $0x190] sm:$0xff] %vm4893_vm5, %v4879_v16  ;;  %v4201_v52 = vadd.f32 %v4200_v41, %v3810_v12 }
 0x69c   :  { %v4504_v42 = vadd.f32 %v4503_v60, %v4201_v52 }
 0x69e   :  { %v4779_v20 = vadd.f32 %v4778_v9, %v4504_v42  ;;  %v8933_v42 = vld [vmem:[#allocation6_spill] sm:$0xff] }
 0x69f   :  { %v3814_v30 = vpop.f32.mrf.mxu0  ;;  %v4212_v14 = vpop.f32.mrf.mxu1 }
 0x6a0   :  { %v4880_v0 = vmax.f32 %v7373_v56, %v4779_v20  ;;  %v3815_v22 = vadd.f32 %v3814_v30, %v7384_v57  ;;  %v4507_v25 = vpop.f32.mrf.mxu2  ;;  %v8934_v30 = vld [vmem:[#allocation7_spill] sm:$0xff] }
 0x6a1   :  { %v4782_v24 = vpop.f32.mrf.mxu3 }
 0x6a2   :  { %4945 = vst.msk [vmem:[#allocation2 + $0x198] sm:$0xff] %vm4893_vm5, %v4880_v0  ;;  %v4207_v15 = vadd.f32 %v4206_v35, %v3815_v22 }
 0x6a4   :  { %v4508_v8 = vadd.f32 %v4507_v25, %v4207_v15 }
 0x6a6   :  { %v4783_v46 = vadd.f32 %v4782_v24, %v4508_v8 }
 0x6a7   :  { %v3819_v21 = vpop.f32.mrf.mxu0  ;;  %v4218_v53 = vpop.f32.mrf.mxu1 }
 0x6a8   :  { %v4881_v2 = vmax.f32 %v7382_v50, %v4783_v46  ;;  %v3820_v10 = vadd.f32 %v3819_v21, %v7393_v58  ;;  %v4511_v48 = vpop.f32.mrf.mxu2  ;;  %v8935_v21 = vld [vmem:[#allocation9_spill] sm:$0xff] }
 0x6a9   :  { %v4786_v37 = vpop.f32.mrf.mxu3 }
 0x6aa   :  { %4946 = vst.msk [vmem:[#allocation2 + $0x1a0] sm:$0xff] %vm4893_vm5, %v4881_v2  ;;  %v4213_v56 = vadd.f32 %v4212_v14, %v3820_v10  ;;  %v8936_v2 = vld [vmem:[#allocation8_spill] sm:$0xff] }
 0x6ac   :  { %v4512_v61 = vadd.f32 %v4511_v48, %v4213_v56 }
 0x6ae   :  { %v4787_v57 = vadd.f32 %v4786_v37, %v4512_v61 }
 0x6af   :  { %v3824_v19 = vpop.f32.mrf.mxu0  ;;  %v4224_v34 = vpop.f32.mrf.mxu1 }
 0x6b0   :  { %v4882_v51 = vmax.f32 %v7391_v3, %v4787_v57  ;;  %v3825_v31 = vadd.f32 %v3824_v19, %v8926_v32  ;;  %v4515_v55 = vpop.f32.mrf.mxu2 }
 0x6b1   :  { %v4790_v23 = vpop.f32.mrf.mxu3 }
 0x6b2   :  { %4947 = vst.msk [vmem:[#allocation2 + $0x1a8] sm:$0xff] %vm4893_vm5, %v4882_v51  ;;  %v4219_v50 = vadd.f32 %v4218_v53, %v3825_v31  ;;  %v8937_v51 = vld [vmem:[#allocation10_spill] sm:$0xff]  ;;  %v8938_v31 = vld [vmem:[#allocation11_spill] sm:$0xff] }
 0x6b4   :  { %v4516_v49 = vadd.f32 %v4515_v55, %v4219_v50 }
 0x6b6   :  { %v4791_v58 = vadd.f32 %v4790_v23, %v4516_v49 }
 0x6b7   :  { %v3829_v63 = vpop.f32.mrf.mxu0  ;;  %v4230_v13 = vpop.f32.mrf.mxu1 }
 0x6b8   :  { %v4883_v17 = vmax.f32 %v8927_v27, %v4791_v58  ;;  %v3830_v28 = vadd.f32 %v3829_v63, %v8928_v54  ;;  %v4519_v5 = vpop.f32.mrf.mxu2 }
 0x6b9   :  { %v4794_v26 = vpop.f32.mrf.mxu3 }
 0x6ba   :  { %4948 = vst.msk [vmem:[#allocation2 + $0x1b0] sm:$0xff] %vm4893_vm5, %v4883_v17  ;;  %v4225_v3 = vadd.f32 %v4224_v34, %v3830_v28  ;;  %v8939_v17 = vld [vmem:[#allocation12_spill] sm:$0xff]  ;;  %v8940_v28 = vld [vmem:[#allocation13_spill] sm:$0xff] }
 0x6bc   :  { %v4520_v18 = vadd.f32 %v4519_v5, %v4225_v3 }
 0x6be   :  { %v4795_v6 = vadd.f32 %v4794_v26, %v4520_v18 }
 0x6bf   :  { %v3834_v39 = vpop.f32.mrf.mxu0  ;;  %v4236_v40 = vpop.f32.mrf.mxu1 }
 0x6c0   :  { %v4884_v43 = vmax.f32 %v8929_v47, %v4795_v6  ;;  %v3835_v45 = vadd.f32 %v3834_v39, %v8930_v62  ;;  %v4523_v7 = vpop.f32.mrf.mxu2 }
 0x6c1   :  { %v4798_v29 = vpop.f32.mrf.mxu3 }
 0x6c2   :  { %4949 = vst.msk [vmem:[#allocation2 + $0x1b8] sm:$0xff] %vm4893_vm5, %v4884_v43  ;;  %v4231_v41 = vadd.f32 %v4230_v13, %v3835_v45  ;;  %v8941_v43 = vld [vmem:[#allocation14_spill] sm:$0xff]  ;;  %v8942_v45 = vld [vmem:[#allocation15_spill] sm:$0xff] }
 0x6c4   :  { %v4524_v38 = vadd.f32 %v4523_v7, %v4231_v41 }
 0x6c6   :  { %v4799_v59 = vadd.f32 %v4798_v29, %v4524_v38 }
 0x6c7   :  { %v3839_v44 = vpop.f32.mrf.mxu0  ;;  %v4242_v11 = vpop.f32.mrf.mxu1 }
 0x6c8   :  { %v4885_v1 = vmax.f32 %v8931_v36, %v4799_v59  ;;  %v3840_v33 = vadd.f32 %v3839_v44, %v8932_v4  ;;  %v4527_v35 = vpop.f32.mrf.mxu2  ;;  %v8943_v36 = vld [vmem:[#allocation16_spill] sm:$0xff]  ;;  %v8944_v4 = vld [vmem:[#allocation17_spill] sm:$0xff] }
 0x6c9   :  { %v4802_v16 = vpop.f32.mrf.mxu3 }
 0x6ca   :  { %4950 = vst.msk [vmem:[#allocation2 + $0x1c0] sm:$0xff] %vm4893_vm5, %v4885_v1  ;;  %v4237_v12 = vadd.f32 %v4236_v40, %v3840_v33 }
 0x6cc   :  { %v4528_v60 = vadd.f32 %v4527_v35, %v4237_v12 }
 0x6ce   :  { %v4803_v9 = vadd.f32 %v4802_v16, %v4528_v60 }
 0x6cf   :  { %v3844_v52 = vpop.f32.mrf.mxu0  ;;  %v4248_v22 = vpop.f32.mrf.mxu1 }
 0x6d0   :  { %v4886_v20 = vmax.f32 %v8933_v42, %v4803_v9  ;;  %v3845_v14 = vadd.f32 %v3844_v52, %v8934_v30  ;;  %v4531_v0 = vpop.f32.mrf.mxu2  ;;  %v8945_v42 = vld [vmem:[#allocation18_spill] sm:$0xff] }
 0x6d1   :  { %v4806_v25 = vpop.f32.mrf.mxu3 }
 0x6d2   :  { %4951 = vst.msk [vmem:[#allocation2 + $0x1c8] sm:$0xff] %vm4893_vm5, %v4886_v20  ;;  %v4243_v24 = vadd.f32 %v4242_v11, %v3845_v14 }
 0x6d4   :  { %v4532_v15 = vadd.f32 %v4531_v0, %v4243_v24 }
 0x6d6   :  { %v4807_v8 = vadd.f32 %v4806_v25, %v4532_v15 }
 0x6d7   :  { %v3849_v46 = vpop.f32.mrf.mxu0  ;;  %v4254_v61 = vpop.f32.mrf.mxu1 }
 0x6d8   :  { %v4887_v53 = vmax.f32 %v8935_v21, %v4807_v8  ;;  %v3850_v10 = vadd.f32 %v3849_v46, %v8936_v2  ;;  %v4535_v48 = vpop.f32.mrf.mxu2 }
 0x6d9   :  { %v4810_v37 = vpop.f32.mrf.mxu3 }
 0x6da   :  { %4952 = vst.msk [vmem:[#allocation2 + $0x1d0] sm:$0xff] %vm4893_vm5, %v4887_v53  ;;  %v4249_v56 = vadd.f32 %v4248_v22, %v3850_v10 }
 0x6dc   :  { %v4536_v57 = vadd.f32 %v4535_v48, %v4249_v56 }
 0x6de   :  { %v4811_v19 = vadd.f32 %v4810_v37, %v4536_v57 }
 0x6df   :  { %v3854_v34 = vpop.f32.mrf.mxu0  ;;  %v4260_v63 = vpop.f32.mrf.mxu1 }
 0x6e0   :  { %v4888_v32 = vmax.f32 %v8937_v51, %v4811_v19  ;;  %v3855_v55 = vadd.f32 %v3854_v34, %v8938_v31  ;;  %v4539_v23 = vpop.f32.mrf.mxu2 }
 0x6e1   :  { %v4814_v50 = vpop.f32.mrf.mxu3 }
 0x6e2   :  { %4953 = vst.msk [vmem:[#allocation2 + $0x1d8] sm:$0xff] %vm4893_vm5, %v4888_v32  ;;  %v4255_v49 = vadd.f32 %v4254_v61, %v3855_v55 }
 0x6e4   :  { %v4540_v58 = vadd.f32 %v4539_v23, %v4255_v49 }
 0x6e6   :  { %v4815_v13 = vadd.f32 %v4814_v50, %v4540_v58 }
 0x6e7   :  { %v3859_v27 = vpop.f32.mrf.mxu0  ;;  %v4266_v40 = vpop.f32.mrf.mxu1 }
 0x6e8   :  { %v4889_v54 = vmax.f32 %v8939_v17, %v4815_v13  ;;  %v3860_v5 = vadd.f32 %v3859_v27, %v8940_v28  ;;  %v4543_v26 = vpop.f32.mrf.mxu2 }
 0x6e9   :  { %v4818_v3 = vpop.f32.mrf.mxu3 }
 0x6ea   :  { %4954 = vst.msk [vmem:[#allocation2 + $0x1e0] sm:$0xff] %vm4893_vm5, %v4889_v54  ;;  %v4261_v18 = vadd.f32 %v4260_v63, %v3860_v5 }
 0x6ec   :  { %v4544_v6 = vadd.f32 %v4543_v26, %v4261_v18 }
 0x6ee   :  { %v4819_v39 = vadd.f32 %v4818_v3, %v4544_v6 }
 0x6ef   :  { %v3864_v47 = vpop.f32.mrf.mxu0  ;;  %v4272_v35 = vpop.f32.mrf.mxu1 }
 0x6f0   :  { %v4890_v62 = vmax.f32 %v8941_v43, %v4819_v39  ;;  %v3865_v7 = vadd.f32 %v3864_v47, %v8942_v45  ;;  %v4547_v29 = vpop.f32.mrf.mxu2 }
 0x6f1   :  { %v4822_v38 = vpop.f32.mrf.mxu3 }
 0x6f2   :  { %4955 = vst.msk [vmem:[#allocation2 + $0x1e8] sm:$0xff] %vm4893_vm5, %v4890_v62  ;;  %v4267_v41 = vadd.f32 %v4266_v40, %v3865_v7 }
 0x6f4   :  { %v4548_v59 = vadd.f32 %v4547_v29, %v4267_v41 }
 0x6f6   :  { %v4823_v44 = vadd.f32 %v4822_v38, %v4548_v59 }
 0x6f7   :  { %v3869_v11 = vpop.f32.mrf.mxu0 }
 0x6f8   :  { %v4891_v1 = vmax.f32 %v8943_v36, %v4823_v44  ;;  %v3870_v33 = vadd.f32 %v3869_v11, %v8944_v4  ;;  %v4551_v12 = vpop.f32.mrf.mxu2 }
 0x6f9   :  { %v4826_v9 = vpop.f32.mrf.mxu3 }
 0x6fa   :  { %4956 = vst.msk [vmem:[#allocation2 + $0x1f0] sm:$0xff] %vm4893_vm5, %v4891_v1  ;;  %v4273_v16 = vadd.f32 %v4272_v35, %v3870_v33 }
 0x6fc   :  { %v4552_v60 = vadd.f32 %v4551_v12, %v4273_v16 }
 0x6fe   :  { %v4827_v52 = vadd.f32 %v4826_v9, %v4552_v60 }
 0x700   :  { %v4892_v20 = vmax.f32 %v8945_v42, %v4827_v52 }
 0x702   :  { %4957 = vst.msk [vmem:[#allocation2 + $0x1f8] sm:$0xff] %vm4893_vm5, %v4892_v20 }
 0x703   :  { %4970 = dma.vmem_to_hbm [thread:$0]  %s4963_s10, 8192, %s4965_s25, [#allocation3], %s5028_s26, %s5028_s26, %s5029_s27  }
 0x704   :  { %5022 = dma.done.wait [#allocation3], 8192  }
 0x705   :  { %5023 = vsyncadd [#allocation3], 4294959104 }
 0x706   :  { %4975 = vsyncpa [#allocation3], 1 }

</bundles_post_ra>
